<compile_context>
chip_gen: v6e
topology: v6e:2x2x1
jax: 0.10.0
libtpu: 0.0.40
codegen_flags: <defaults>
</compile_context>

<pallas_src>
import jax
import jax.numpy as jnp
from jax.experimental import pallas as pl
from jax.experimental.pallas import tpu as pltpu


# ----------------------------- Pallas kernel -------------------------------

def _kernel(d_ref, pose_ref, xy_ref, w1p_ref, wbbb_ref, wln_ref, out_ref, scr_ref):
    # d_ref    : (1, T)   raw depth pixels (lane-dense)
    # pose_ref : (3, T)   pose channels
    # xy_ref   : (2, T)   normalized pixel coordinates [x, y]
    # w1p_ref  : (32, 72) bf16 packed W1, K order [feat(64), pose(3), x, y, 0(3)]
    # wbbb_ref : (64, 2)  per-image backbone [w_eff | b_eff] (standardization folded)
    # wln_ref  : (32, 4)  [gamma | beta | w2 | b2-in-row-0]
    # out_ref  : (1, T)
    # scr_ref  : (72, T)  bf16 MXU operand scratch
    T = out_ref.shape[-1]
    inv_c = 1.0 / 32.0

    # --- backbone placeholder: per-pixel 1 -> 64 affine + ReLU (f32 VPU) ---
    # rank-1, so a VPU broadcast FMA; per-image depth standardization is
    # already folded into (w_eff, b_eff) by the wrapper.
    feats = jnp.maximum(wbbb_ref[:, 0:1] * d_ref[...] + wbbb_ref[:, 1:2], 0.0)   # (64, T)

    # --- pack the single K=72 MXU operand (bf16 at the dot boundary only) ---
    scr_ref[0:64, :] = feats.astype(jnp.bfloat16)
    scr_ref[64:72, :] = jnp.concatenate(
        [pose_ref[...], xy_ref[...], jnp.zeros((3, T), jnp.float32)], axis=0
    ).astype(jnp.bfloat16)

    # --- decoder Linear(69 -> 32, bias=False): one bf16 MXU pass, f32 acc ---
    h = jnp.dot(w1p_ref[...], scr_ref[...],
                preferred_element_type=jnp.float32)                              # (32, T)

    # --- LayerNorm([32]) over channels, single pass (E[x], E[x^2]), f32 ---
    mu = jnp.sum(h, axis=0, keepdims=True) * inv_c                               # (1, T)
    var = jnp.sum(h * h, axis=0, keepdims=True) * inv_c - mu * mu
    hn = (h - mu) * jax.lax.rsqrt(var + 1e-5)
    hn = hn * wln_ref[:, 0:1] + wln_ref[:, 1:2]

    # --- ReLU ---
    hn = jnp.maximum(hn, 0.0)

    # --- Linear(32 -> 1): w2 . hn + b2 (channel reduce, f32) ---
    out_ref[...] = (jnp.sum(wln_ref[:, 2:3] * hn, axis=0, keepdims=True)
                    + wln_ref[0:1, 3:4])


# ------------------------------- wrapper ------------------------------------

def _round_up(x, m):
    return ((x + m - 1) // m) * m


def _pick_tile(hw, batch, max_tile=8192):
    """Large lane-dense tile; grid uses cdiv so no divisibility requirement."""
    tile = min(max_tile, _round_up(hw, 128))
    # keep at least 2 total grid steps so both v7x TensorCores get work
    if batch * pl.cdiv(hw, tile) < 2 and hw > 128:
        tile = _round_up(pl.cdiv(hw, 2), 128)
    return tile


def suction_quality_forward(depth, pose, params, *, max_tile=8192):
    """depth: (B,1,H,W) f32, pose: (B,3,H,W) f32 -> (B,1,H,W) f32."""
    B, cd, H, W = depth.shape
    assert cd == 1 and pose.shape == (B, 3, H, W)
    HW = H * W
    f32, bf16 = jnp.float32, jnp.bfloat16

    depth = depth.astype(f32)
    pose = pose.astype(f32)

    tile = _pick_tile(HW, B, max_tile)
    grid = (B, pl.cdiv(HW, tile))

    # per-image standardization (x - mean) * 1/(std+eps) folded into the
    # rank-1 backbone affine: relu(w*(d-m)*s + b) == relu((w*s)*d + (b - w*m*s))
    mean = jnp.mean(depth, axis=(1, 2, 3))                                 # (B,)
    istd = 1.0 / (jnp.std(depth, axis=(1, 2, 3)) + 1e-6)                   # (B,)
    w_bb = params["w_bb"].astype(f32)
    b_bb = params["b_bb"].astype(f32)
    w_eff = w_bb[None, :] * istd[:, None]                                  # (B, 64)
    b_eff = b_bb[None, :] - w_bb[None, :] * (mean * istd)[:, None]         # (B, 64)
    wbbb = jnp.stack([w_eff, b_eff], axis=-1)                              # (B, 64, 2)

    # channels-first flattened views (pure reshapes — no transpose passes)
    depth_cf = depth.reshape(B, 1, HW)
    pose_cf = pose.reshape(B, 3, HW)

    # normalized pixel-coordinate map, shared across the batch, lane-dense.
    # TODO(synk): depth_to_mesh_grid(camera) is undefined in the source.
    xs = jnp.arange(W, dtype=f32) * (1.0 / W)
    ys = jnp.arange(H, dtype=f32) * (1.0 / H)
    yy, xx = jnp.meshgrid(ys, xs, indexing="ij")
    xymap = jnp.stack([xx, yy], axis=0).reshape(2, HW)                     # (2, HW)

    # pack W1 (32, 69) [pose(3), x, y, feat(64)] into the kernel's K=72 order
    # [feat(64), pose(3), x, y, zero-pad(3)], stored bf16 for the MXU.
    w1 = params["w1"].astype(f32)                                          # (32, 69)
    w1p = jnp.zeros((32, 72), f32)
    w1p = w1p.at[:, 0:64].set(w1[:, 5:69])
    w1p = w1p.at[:, 64:67].set(w1[:, 0:3])
    w1p = w1p.at[:, 67].set(w1[:, 3])
    w1p = w1p.at[:, 68].set(w1[:, 4])
    w1p = w1p.astype(bf16)

    # LayerNorm affine + Linear(32 -> 1) packed in one small resident block
    b2col = jnp.zeros((32,), f32).at[0].set(params["b2"].astype(f32)[0])
    wln = jnp.stack([params["ln_gamma"].astype(f32),
                     params["ln_beta"].astype(f32),
                     params["w2"].astype(f32)[0],
                     b2col], axis=1)                                       # (32, 4)

    out_cf = pl.pallas_call(
        _kernel,
        out_shape=jax.ShapeDtypeStruct((B, 1, HW), f32),
        grid_spec=pltpu.PrefetchScalarGridSpec(
            num_scalar_prefetch=0,
            grid=grid,
            in_specs=[
                pl.BlockSpec((None, 1, tile), lambda b, j: (b, 0, j)),     # depth
                pl.BlockSpec((None, 3, tile), lambda b, j: (b, 0, j)),     # pose
                pl.BlockSpec((2, tile), lambda b, j: (0, j)),              # xymap
                pl.BlockSpec((32, 72), lambda b, j: (0, 0)),               # W1 packed (bf16)
                pl.BlockSpec((None, 64, 2), lambda b, j: (b, 0, 0)),       # backbone w/b per image
                pl.BlockSpec((32, 4), lambda b, j: (0, 0)),                # LN affine + w2/b2
            ],
            out_specs=pl.BlockSpec((None, 1, tile), lambda b, j: (b, 0, j)),
            scratch_shapes=[pltpu.VMEM((72, tile), bf16)],
        ),
        compiler_params=pltpu.CompilerParams(
            dimension_semantics=("parallel", "parallel")),
    )(depth_cf, pose_cf, xymap, w1p, wbbb, wln)

    return out_cf.reshape(B, 1, H, W)


# ----------------------------- parameter init ------------------------------

def init_params(key):
    ks = jax.random.split(key, 5)
    scale = 0.05
    return {
        # backbone placeholder (per-pixel 1 -> 64)
        "w_bb": scale * jax.random.normal(ks[0], (64,), jnp.float32),
        "b_bb": scale * jax.random.normal(ks[1], (64,), jnp.float32),
        # decoder Linear(69 -> 32, bias=False); input order [pose(3), xy(2), feat(64)]
        "w1": scale * jax.random.normal(ks[2], (32, 69), jnp.float32),
        # LayerNorm(32) affine params (PyTorch default init)
        "ln_gamma": jnp.ones((32,), jnp.float32),
        "ln_beta": jnp.zeros((32,), jnp.float32),
        # decoder Linear(32 -> 1)
        "w2": scale * jax.random.normal(ks[3], (1, 32), jnp.float32),
        "b2": scale * jax.random.normal(ks[4], (1,), jnp.float32),
    }


# --------------------------- pure-JAX reference -----------------------------

def reference_forward(depth, pose, params):
    B, _, H, W = depth.shape
    mean = jnp.mean(depth, axis=(1, 2, 3), keepdims=True)
    std = jnp.std(depth, axis=(1, 2, 3), keepdims=True)
    d = (depth - mean) / (std + 1e-6)
    d2 = d.transpose(0, 2, 3, 1).reshape(-1, 1)
    feats = jnp.maximum(d2 * params["w_bb"][None, :] + params["b_bb"][None, :], 0.0)
    ys = jnp.arange(H, dtype=jnp.float32) / H
    xs = jnp.arange(W, dtype=jnp.float32) / W
    yy, xx = jnp.meshgrid(ys, xs, indexing="ij")
    xy = jnp.broadcast_to(jnp.stack([xx, yy], -1)[None], (B, H, W, 2)).reshape(-1, 2)
    p2 = pose.transpose(0, 2, 3, 1).reshape(-1, 3)
    f = jnp.concatenate([p2, xy, feats], axis=1)
    h = f @ params["w1"].T
    mu = h.mean(-1, keepdims=True)
    var = ((h - mu) ** 2).mean(-1, keepdims=True)
    hn = (h - mu) * jax.lax.rsqrt(var + 1e-5) * params["ln_gamma"] + params["ln_beta"]
    hn = jnp.maximum(hn, 0.0)
    o = hn @ params["w2"].T + params["b2"]
    return o.reshape(B, H, W, 1).transpose(0, 3, 1, 2)


# --------------------------------- main -------------------------------------

if __name__ == "__main__":
    key = jax.random.PRNGKey(0)
    k_depth, k_pose, k_params = jax.random.split(key, 3)

    B, H, W = 2, 64, 64
    depth = jax.random.uniform(k_depth, (B, 1, H, W), jnp.float32, 0.3, 1.2)
    pose = jax.random.normal(k_pose, (B, 3, H, W), jnp.float32)
    params = init_params(k_params)

    fwd = jax.jit(suction_quality_forward)
    out = jax.block_until_ready(fwd(depth, pose, params))

    assert out.shape == (B, 1, H, W), out.shape
    assert out.dtype == jnp.float32
    assert bool(jnp.all(jnp.isfinite(out)))

    ref = reference_forward(depth, pose, params)
    err = float(jnp.max(jnp.abs(out - ref)))
    # Tolerance accounts for bf16 MXU operands (LayerNorm amplifies the bf16
    # rounding of the K=72 contraction); typical max-abs error is ~1e-3.
    assert err < 2e-2, f"max abs error vs JAX reference: {err}"

    print("KERNEL_OK")
</pallas_src>

<mosaic_0001>
module attributes {stable_mosaic.version = 11 : i64} {
  func.func @_kernel(%arg0: i32, %arg1: i32, %arg2: memref<1x1x4096xf32, #tpu.memory_space<vmem>>, %arg3: memref<1x3x4096xf32, #tpu.memory_space<vmem>>, %arg4: memref<2x4096xf32, #tpu.memory_space<vmem>>, %arg5: memref<32x72xbf16, #tpu.memory_space<vmem>>, %arg6: memref<1x64x2xf32, #tpu.memory_space<vmem>>, %arg7: memref<32x4xf32, #tpu.memory_space<vmem>>, %arg8: memref<1x1x4096xf32, #tpu.memory_space<vmem>>, %arg9: memref<72x4096xbf16, #tpu.memory_space<vmem>>) attributes {dimension_semantics = [#tpu.dimension_semantics<parallel>, #tpu.dimension_semantics<parallel>], iteration_bounds = array<i64: 2, 1>, scalar_prefetch = 0 : i64, scratch_operands = 1 : i64, tpu.core_type = #tpu.core_type<tc>, window_params = [{transform_indices = @transform_0, window_bounds = array<i64: 1, 1, 4096>}, {transform_indices = @transform_1, window_bounds = array<i64: 1, 3, 4096>}, {transform_indices = @transform_2, window_bounds = array<i64: 2, 4096>}, {pipeline_mode = #tpu.pipeline_mode<synchronous>, transform_indices = @transform_3, window_bounds = array<i64: 32, 72>}, {transform_indices = @transform_4, window_bounds = array<i64: 1, 64, 2>}, {pipeline_mode = #tpu.pipeline_mode<synchronous>, transform_indices = @transform_5, window_bounds = array<i64: 32, 4>}, {transform_indices = @transform_6, window_bounds = array<i64: 1, 1, 4096>}]} {
    %c0 = arith.constant 0 : index
    %c0_0 = arith.constant 0 : index
    %c0_1 = arith.constant 0 : index
    %0 = vector.load %arg6[%c0, %c0_0, %c0_1] : memref<1x64x2xf32, #tpu.memory_space<vmem>>, vector<1x64x1xf32>
    %1 = vector.shape_cast %0 : vector<1x64x1xf32> to vector<64x1xf32>
    %c0_2 = arith.constant 0 : index
    %c0_3 = arith.constant 0 : index
    %c0_4 = arith.constant 0 : index
    %2 = vector.load %arg2[%c0_2, %c0_3, %c0_4] : memref<1x1x4096xf32, #tpu.memory_space<vmem>>, vector<1x1x4096xf32>
    %3 = vector.shape_cast %2 : vector<1x1x4096xf32> to vector<1x4096xf32>
    %4 = vector.broadcast %1 : vector<64x1xf32> to vector<64x4096xf32>
    %5 = vector.broadcast %3 : vector<1x4096xf32> to vector<64x4096xf32>
    %6 = arith.mulf %4, %5 : vector<64x4096xf32>
    %c0_5 = arith.constant 0 : index
    %c0_6 = arith.constant 0 : index
    %c1 = arith.constant 1 : index
    %7 = vector.load %arg6[%c0_5, %c0_6, %c1] : memref<1x64x2xf32, #tpu.memory_space<vmem>>, vector<1x64x1xf32>
    %8 = vector.shape_cast %7 : vector<1x64x1xf32> to vector<64x1xf32>
    %9 = vector.broadcast %8 : vector<64x1xf32> to vector<64x4096xf32>
    %10 = arith.addf %6, %9 : vector<64x4096xf32>
    %cst = arith.constant 0.000000e+00 : f32
    %11 = vector.broadcast %cst : f32 to vector<64x4096xf32>
    %12 = arith.maximumf %10, %11 : vector<64x4096xf32>
    %13 = arith.truncf %12 : vector<64x4096xf32> to vector<64x4096xbf16>
    %c0_7 = arith.constant 0 : index
    %c0_8 = arith.constant 0 : index
    %14 = vector.load %arg9[%c0_7, %c0_8] : memref<72x4096xbf16, #tpu.memory_space<vmem>>, vector<64x4096xbf16>
    tpu.vector_store %arg9[%c0_7, %c0_8], %13 {strides = array<i32>} : memref<72x4096xbf16, #tpu.memory_space<vmem>>, vector<64x4096xbf16>,
    %c0_9 = arith.constant 0 : index
    %c0_10 = arith.constant 0 : index
    %c0_11 = arith.constant 0 : index
    %15 = vector.load %arg3[%c0_9, %c0_10, %c0_11] : memref<1x3x4096xf32, #tpu.memory_space<vmem>>, vector<1x3x4096xf32>
    %16 = vector.shape_cast %15 : vector<1x3x4096xf32> to vector<3x4096xf32>
    %c0_12 = arith.constant 0 : index
    %c0_13 = arith.constant 0 : index
    %17 = vector.load %arg4[%c0_12, %c0_13] : memref<2x4096xf32, #tpu.memory_space<vmem>>, vector<2x4096xf32>
    %cst_14 = arith.constant 0.000000e+00 : f32
    %18 = vector.broadcast %cst_14 : f32 to vector<3x4096xf32>
    %19 = tpu.concatenate %16, %17, %18 in 0 : vector<3x4096xf32>, vector<2x4096xf32>, vector<3x4096xf32> -> vector<8x4096xf32>
    %20 = arith.truncf %19 : vector<8x4096xf32> to vector<8x4096xbf16>
    %c64 = arith.constant 64 : index
    %c0_15 = arith.constant 0 : index
    %21 = vector.load %arg9[%c64, %c0_15] : memref<72x4096xbf16, #tpu.memory_space<vmem>>, vector<8x4096xbf16>
    tpu.vector_store %arg9[%c64, %c0_15], %20 {strides = array<i32>} : memref<72x4096xbf16, #tpu.memory_space<vmem>>, vector<8x4096xbf16>,
    %c0_16 = arith.constant 0 : index
    %c0_17 = arith.constant 0 : index
    %22 = vector.load %arg5[%c0_16, %c0_17] : memref<32x72xbf16, #tpu.memory_space<vmem>>, vector<32x72xbf16>
    %c0_18 = arith.constant 0 : index
    %c0_19 = arith.constant 0 : index
    %23 = vector.load %arg9[%c0_18, %c0_19] : memref<72x4096xbf16, #tpu.memory_space<vmem>>, vector<72x4096xbf16>
    %cst_20 = arith.constant dense<0.000000e+00> : vector<32x4096xf32>
    %24 = tpu.matmul %22, %23, %cst_20 {dimension_numbers = #tpu.dot_dimension_numbers<[1], [0], [0], [1], [0, 0, 1, 1], [], []>} : vector<32x72xbf16>, vector<72x4096xbf16>, vector<32x4096xf32> -> vector<32x4096xf32>
    %cst_21 = arith.constant dense<0.000000e+00> : vector<4096xf32>
    %25 = vector.multi_reduction <add>, %24, %cst_21 [0] : vector<32x4096xf32> to vector<4096xf32>
    %26 = vector.shape_cast %25 : vector<4096xf32> to vector<1x4096xf32>
    %cst_22 = arith.constant 3.125000e-02 : f32
    %27 = vector.broadcast %cst_22 : f32 to vector<1x4096xf32>
    %28 = arith.mulf %26, %27 : vector<1x4096xf32>
    %29 = arith.mulf %24, %24 : vector<32x4096xf32>
    %cst_23 = arith.constant dense<0.000000e+00> : vector<4096xf32>
    %30 = vector.multi_reduction <add>, %29, %cst_23 [0] : vector<32x4096xf32> to vector<4096xf32>
    %31 = vector.shape_cast %30 : vector<4096xf32> to vector<1x4096xf32>
    %cst_24 = arith.constant 3.125000e-02 : f32
    %32 = vector.broadcast %cst_24 : f32 to vector<1x4096xf32>
    %33 = arith.mulf %31, %32 : vector<1x4096xf32>
    %34 = arith.mulf %28, %28 : vector<1x4096xf32>
    %35 = arith.subf %33, %34 : vector<1x4096xf32>
    %36 = vector.broadcast %28 : vector<1x4096xf32> to vector<32x4096xf32>
    %37 = arith.subf %24, %36 : vector<32x4096xf32>
    %cst_25 = arith.constant 9.99999974E-6 : f32
    %38 = vector.broadcast %cst_25 : f32 to vector<1x4096xf32>
    %39 = arith.addf %35, %38 : vector<1x4096xf32>
    %40 = math.rsqrt %39 : vector<1x4096xf32>
    %41 = vector.broadcast %40 : vector<1x4096xf32> to vector<32x4096xf32>
    %42 = arith.mulf %37, %41 : vector<32x4096xf32>
    %c0_26 = arith.constant 0 : index
    %c0_27 = arith.constant 0 : index
    %43 = vector.load %arg7[%c0_26, %c0_27] : memref<32x4xf32, #tpu.memory_space<vmem>>, vector<32x1xf32>
    %44 = vector.broadcast %43 : vector<32x1xf32> to vector<32x4096xf32>
    %45 = arith.mulf %42, %44 : vector<32x4096xf32>
    %c0_28 = arith.constant 0 : index
    %c1_29 = arith.constant 1 : index
    %46 = vector.load %arg7[%c0_28, %c1_29] : memref<32x4xf32, #tpu.memory_space<vmem>>, vector<32x1xf32>
    %47 = vector.broadcast %46 : vector<32x1xf32> to vector<32x4096xf32>
    %48 = arith.addf %45, %47 : vector<32x4096xf32>
    %cst_30 = arith.constant 0.000000e+00 : f32
    %49 = vector.broadcast %cst_30 : f32 to vector<32x4096xf32>
    %50 = arith.maximumf %48, %49 : vector<32x4096xf32>
    %c0_31 = arith.constant 0 : index
    %c2 = arith.constant 2 : index
    %51 = vector.load %arg7[%c0_31, %c2] : memref<32x4xf32, #tpu.memory_space<vmem>>, vector<32x1xf32>
    %52 = vector.broadcast %51 : vector<32x1xf32> to vector<32x4096xf32>
    %53 = arith.mulf %52, %50 : vector<32x4096xf32>
    %cst_32 = arith.constant dense<0.000000e+00> : vector<4096xf32>
    %54 = vector.multi_reduction <add>, %53, %cst_32 [0] : vector<32x4096xf32> to vector<4096xf32>
    %55 = vector.shape_cast %54 : vector<4096xf32> to vector<1x4096xf32>
    %c0_33 = arith.constant 0 : index
    %c3 = arith.constant 3 : index
    %56 = vector.load %arg7[%c0_33, %c3] : memref<32x4xf32, #tpu.memory_space<vmem>>, vector<1x1xf32>
    %57 = vector.broadcast %56 : vector<1x1xf32> to vector<1x4096xf32>
    %58 = arith.addf %55, %57 : vector<1x4096xf32>
    %c0_34 = arith.constant 0 : index
    %c0_35 = arith.constant 0 : index
    %c0_36 = arith.constant 0 : index
    %59 = vector.load %arg8[%c0_34, %c0_35, %c0_36] : memref<1x1x4096xf32, #tpu.memory_space<vmem>>, vector<1x1x4096xf32>
    %60 = vector.shape_cast %59 : vector<1x1x4096xf32> to vector<1x4096xf32>
    %61 = vector.shape_cast %58 : vector<1x4096xf32> to vector<1x1x4096xf32>
    tpu.vector_store %arg8[%c0_34, %c0_35, %c0_36], %61 {strides = array<i32>} : memref<1x1x4096xf32, #tpu.memory_space<vmem>>, vector<1x1x4096xf32>,
    return
  }
  func.func @transform_0(%arg0: i32, %arg1: i32) -> (i32, i32, i32) {
    %c0_i32 = arith.constant 0 : i32
    %c0_i32_0 = arith.constant 0 : i32
    return %arg0, %c0_i32, %arg1 : i32, i32, i32
  }
  func.func @transform_1(%arg0: i32, %arg1: i32) -> (i32, i32, i32) {
    %c0_i32 = arith.constant 0 : i32
    %c0_i32_0 = arith.constant 0 : i32
    return %arg0, %c0_i32, %arg1 : i32, i32, i32
  }
  func.func @transform_2(%arg0: i32, %arg1: i32) -> (i32, i32) {
    %c0_i32 = arith.constant 0 : i32
    %c0_i32_0 = arith.constant 0 : i32
    return %c0_i32, %arg1 : i32, i32
  }
  func.func @transform_3(%arg0: i32, %arg1: i32) -> (i32, i32) {
    %c0_i32 = arith.constant 0 : i32
    %c0_i32_0 = arith.constant 0 : i32
    %c0_i32_1 = arith.constant 0 : i32
    return %c0_i32, %c0_i32_0 : i32, i32
  }
  func.func @transform_4(%arg0: i32, %arg1: i32) -> (i32, i32, i32) {
    %c0_i32 = arith.constant 0 : i32
    %c0_i32_0 = arith.constant 0 : i32
    %c0_i32_1 = arith.constant 0 : i32
    return %arg0, %c0_i32, %c0_i32_0 : i32, i32, i32
  }
  func.func @transform_5(%arg0: i32, %arg1: i32) -> (i32, i32) {
    %c0_i32 = arith.constant 0 : i32
    %c0_i32_0 = arith.constant 0 : i32
    %c0_i32_1 = arith.constant 0 : i32
    return %c0_i32, %c0_i32_0 : i32, i32
  }
  func.func @transform_6(%arg0: i32, %arg1: i32) -> (i32, i32, i32) {
    %c0_i32 = arith.constant 0 : i32
    %c0_i32_0 = arith.constant 0 : i32
    return %arg0, %c0_i32, %arg1 : i32, i32, i32
  }
}

</mosaic_0001>

<bundles_post_ra>
// kernel: suction_quality_forward.1
= control target key start
LH: loop header
LB: loop body
LE: loop exit
PB: predicated region body
PF: predicated region fallthrough
CT: control target
= control target key end

     0   :  { %s7885_s21 = smov 0   ;;  %s7887_s22 = smov 0   ;;  %s11604_s0 = inlined_call_operand.vmem [shape: f32[2,1,4096], index: 0, kind: input, shape index: {}]   ;;  %s11605_s1 = inlined_call_operand.vmem [shape: f32[2,3,4096], index: 1, kind: input, shape index: {}]   ;;  %s11606_s2 = inlined_call_operand.vmem [shape: f32[2,4096], index: 2, kind: input, shape index: {}]   ;;  %s11607_s3 = inlined_call_operand.vmem [shape: bf16[32,72], index: 3, kind: input, shape index: {}]   ;;  %s11608_s4 = inlined_call_operand.vmem [shape: f32[2,64,2], index: 4, kind: input, shape index: {}]   ;;  %s11609_s5 = inlined_call_operand.vmem [shape: f32[32,4], index: 5, kind: input, shape index: {}]   ;;  %s11610_s6 = inlined_call_operand.vmem [shape: f32[2,1,4096], index: 6, kind: output, shape index: {}]  }
   0x1   :  { %s7889_s23 = smov 0  }
   0x2 LB: > { %s28_s24 = sadd.s32 1, %s7838_s22  ;;  %p7007_p0 = scmp.ge.s32.totalorder %s7842_s23, 1  ;;  %s7842_s23 = sphi %s7889_s23, %s16_s23   ;;  %s7838_s22 = sphi %s7887_s22, %s12030_s22   ;;  %s7834_s21 = sphi %s7885_s21, %s12029_s21  }
   0x3   : > { %p30_p1 = scmp.ge.s32.totalorder %s28_s24, 2  ;;  %p270_p2 = scmp.lt.s32.totalorder %s7842_s23, 3 }
   0x5   : > { %s12032_s24 = smov (%p30_p1, %s28_s24), 0  ;;  %p271_p3 = pnand %p7007_p0, %p270_p2 }
   0x7   : > { %274 = sbr.rel (%p271_p3) target bundleno = 961 (0x3c1), region = 44 }
   0xc   : > { %p326_p4 = scmp.lt.s32.totalorder %s7834_s21, 1  ;;  %v11611_v0 = vmov 1   ;;  %v421_v1 = vlaneseq  ;;  %v7845_v2 = vmov 1983009808   ;;  %v11613_v4 = vmov 0   ;;  %v2293_v7 = vld [vmem:[%s11606_s2] sm:$0xff] }
   0xd   : > { %7708 = vset.pattern.permute.xlu0 %v11611_v0  ;;  %7706 = vset.pattern.permute.xlu1 %v11611_v0  ;;  %v2359_v3 = vunpack.c.l.s4 %v7845_v2  ;;  %v2357_v9 = vcombine.high %v2293_v7, %v2293_v7  ;;  %vm2557_vm0 = vcmask 1042432   ;;  %vm2590_vm1 = vcmask 1044480   ;;  %v2294_v44 = vld [vmem:[%s11606_s2 + $0x8] sm:$0xff]  ;;  %v2295_v46 = vld [vmem:[%s11606_s2 + $0x10] sm:$0xff]  ;;  %v2296_v58 = vld [vmem:[%s11606_s2 + $0x18] sm:$0xff] }
   0xe   : > { %s12034_s21 = smov (!%p326_p4, %s7834_s21), 1  ;;  %3781 = vmatprep.mubr.bf16.mxu0 %v11613_v4  ;;  %3834 = vmatprep.mubr.bf16.mxu1 %v11613_v4  ;;  %v7909_v5 = vshrl.u32 %v421_v1, 7  ;;  %vm3652_vm2 = vcmask 1043456   ;;  %v2374_v45 = vcombine.high %v2294_v44, %v2294_v44  ;;  %v2391_v51 = vcombine.high %v2295_v46, %v2295_v46 }
   0xf   : > { %v2360_v6 = vunpack.c.0.s8 %v2359_v3  ;;  %s7371_s25 = sshll.u32 %s12034_s21, 6  ;;  %s7370_s7 = sshll.u32 %s12034_s21, 7  ;;  %v7847_v53 = vmov 1966171168   ;;  %vm3645_vm3 = vcmask 588800  }
  0x10   : > { %s7918_s30 = scalar_lea.vmem %s11608_s4, %s7371_s25  ;;  %s7928_s10 = scalar_lea.vmem %s11605_s1, %s7370_s7  ;;  %v7980_v49 = vsub.s32 1, %v7909_v5  ;;  %v7983_v50 = vsub.s32 3, %v7909_v5  ;;  %v6680_v54 = vunpack.c.l.s4 %v7847_v53  ;;  %v7989_v55 = vsub.s32 0, %v7909_v5 }
  0x11   : > { %v7921_v8 = vsub.s32 %v2360_v6, %v7909_v5  ;;  %v371_v10 = vld [vmem:[%s7918_s30 + $0x30] sm:$0xff]  ;;  %v369_v11 = vld [vmem:[%s7918_s30 + $0x20] sm:$0xff]  ;;  %v372_v14 = vld [vmem:[%s7918_s30 + $0x38] sm:$0xff]  ;;  %s7008_s13 = sshll.u32 %s12034_s21, 5  ;;  %v7995_v59 = vsub.s32 2, %v7909_v5 }
  0x12   : > { %862 = vperm.xlu1 %7706, %v371_v10   ;;  %854 = vperm.xlu0 %7708, %v369_v11   ;;  %v2277_v17 = vld [vmem:[%s7928_s10] sm:$0x77]  ;;  %v2278_v18 = vld [vmem:[%s7928_s10 + $0x8] sm:$0x77]  ;;  %v368_v40 = vld [vmem:[%s7918_s30 + $0x18] sm:$0xff]  ;;  %s7975_s18 = scalar_lea.vmem %s11604_s0, %s7008_s13  ;;  %11703 = vst [vmem:[#allocation4_spill] sm:$0xff] %v7980_v49  ;;  %s10645_s16 = scalar_lea.vmem %s11610_s6, %s7008_s13 }
  0x13   : > { %11702 = vst [vmem:[#allocation3_spill] sm:$0xff] %v7921_v8  ;;  %v2364_v12 = vrot.slane %v2293_v7, %v7921_v8  ;;  %v2371_v13 = vrot.slane %v2357_v9, %v7921_v8  ;;  %v2317_v19 = vcombine.high %v2277_v17, %v2277_v17  ;;  %v2318_v21 = vcombine.high %v2278_v18, %v2278_v18  ;;  %v370_v25 = vld [vmem:[%s7918_s30 + $0x28] sm:$0xff]  ;;  %v367_v41 = vld [vmem:[%s7918_s30 + $0x10] sm:$0xff]  ;;  %v365_v42 = vld [vmem:[%s7918_s30] sm:$0xff] }
  0x14   : > { %v366_v43 = vld [vmem:[%s7918_s30 + $0x8] sm:$0xff]  ;;  %v2381_v47 = vrot.slane %v2294_v44, %v7921_v8  ;;  %v2388_v48 = vrot.slane %v2374_v45, %v7921_v8  ;;  %11704 = vst [vmem:[#allocation5_spill] sm:$0xff] %v7983_v50  ;;  %v7986_v52 = vld [vmem:[%s7975_s18] sm:$0xff]  ;;  %11705 = vst [vmem:[#allocation6_spill] sm:$0xff] %v7989_v55  ;;  %v2398_v63 = vrot.slane %v2295_v46, %v7921_v8  ;;  %v6681_v7 = vunpack.c.0.s8 %v6680_v54 }
  0x15   : > { %v2372_v15 = vcombine.high %v2364_v12, %v2364_v12  ;;  %v2373_v16 = vcombine.high %v2371_v13, %v2371_v13  ;;  %v2493_v23 = vrot.slane %v2364_v12, 5  ;;  %v2495_v24 = vrot.slane %v2371_v13, 5  ;;  %11706 = vst [vmem:[#allocation7_spill] sm:$0xff] %v7995_v59  ;;  %v2279_v60 = vld [vmem:[%s7928_s10 + $0x10] sm:$0x77] }
  0x16   : > { %866 = vperm.xlu1 %7706, %v372_v14   ;;  %7709 = vset.pattern.permute.xlu0 %v11613_v4  ;;  %v2389_v56 = vcombine.high %v2381_v47, %v2381_v47  ;;  %v2390_v57 = vcombine.high %v2388_v48, %v2388_v48  ;;  %v2280_v61 = vld [vmem:[%s7928_s10 + $0x18] sm:$0x77]  ;;  %v2497_v62 = vrot.slane %v2381_v47, 5  ;;  %v8002_v1 = vrot.slane %v7986_v52, %v7980_v49 }
  0x17   : > { %v2494_v20 = vrot.slane %v2372_v15, 5  ;;  %v2496_v22 = vrot.slane %v2373_v16, 5  ;;  %409 = vperm.xlu0 %7709, %v371_v10   ;;  %v2558_v30 = vsel %vm2557_vm0, %v2277_v17, %v2493_v23  ;;  %v2560_v31 = vsel %vm2557_vm0, %v2278_v18, %v2495_v24  ;;  %v2284_v44 = vld [vmem:[%s7928_s10 + $0x38] sm:$0x77] }
  0x18   : > { %v2591_v34 = vsel %vm2590_vm1, %v2558_v30, 0.0  ;;  %v2593_v35 = vsel %vm2590_vm1, %v2560_v31, 0.0  ;;  %v8006_v2 = vrot.slane %v7986_v52, %v7983_v50  ;;  %v2499_v3 = vrot.slane %v2388_v48, 5 }
  0x19   : > { %v2559_v26 = vsel %vm2557_vm0, %v2317_v19, %v2494_v20  ;;  %v2561_v27 = vsel %vm2557_vm0, %v2318_v21, %v2496_v22  ;;  %v7644_v36 = vpack.c.bf16 %v2591_v34, %v2591_v34  ;;  %v7646_v37 = vpack.c.bf16 %v2593_v35, %v2593_v35  ;;  %v2281_v21 = vld [vmem:[%s7928_s10 + $0x20] sm:$0x77] }
  0x1a   : > { %v2592_v28 = vsel %vm2590_vm1, %v2559_v26, 0.0  ;;  %v2594_v29 = vsel %vm2590_vm1, %v2561_v27, 0.0  ;;  %7707 = vset.pattern.permute.xlu1 %v11613_v4  ;;  %v2405_v6 = vrot.slane %v2391_v51, %v7921_v8  ;;  %v8010_v9 = vsub.s32 5, %v7909_v5  ;;  %v2282_v27 = vld [vmem:[%s7928_s10 + $0x28] sm:$0x77] }
  0x1b   : > { %v7645_v32 = vpack.c.bf16 %v2592_v28, %v2592_v28  ;;  %v7647_v33 = vpack.c.bf16 %v2594_v29, %v2594_v29  ;;  %404 = vperm.xlu1 %7707, %v370_v25   ;;  %414 = vperm.xlu0 %7709, %v372_v14   ;;  %v3654_v38 = vsel %vm3652_vm2, %v7644_v36, 0  ;;  %v3660_v39 = vsel %vm3652_vm2, %v7646_v37, 0 }
  0x1c   : > { %11707 = vst [vmem:[#allocation8_spill] sm:$0xff] %v8010_v9  ;;  %v8013_v10 = vsub.s32 7, %v7909_v5  ;;  %v2319_v12 = vcombine.high %v2279_v60, %v2279_v60  ;;  %v2498_v13 = vrot.slane %v2389_v56, 5  ;;  %v2320_v14 = vcombine.high %v2280_v61, %v2280_v61  ;;  %v374_v56 = vld [vmem:[%s7975_s18 + $0x8] sm:$0xff] }
  0x1d   : > { %7320 = vmatprep.subr.msk.bf16.mxu0 %vm3652_vm2, %v7645_v32  ;;  %7323 = vmatprep.subr.msk.bf16.mxu1 %vm3652_vm2, %v7647_v33  ;;  %v2500_v15 = vrot.slane %v2390_v57, 5  ;;  %v8017_v16 = vrot.slane %v7986_v52, %v7989_v55  ;;  %v8021_v17 = vrot.slane %v7986_v52, %v7995_v59  ;;  %v2562_v18 = vsel %vm2557_vm0, %v2279_v60, %v2497_v62 }
  0x1e   : > { %3756 = vmatpush1.bf16.msra.mxu0 %v3654_v38  ;;  %3809 = vmatpush1.bf16.msra.mxu1 %v3660_v39  ;;  %11708 = vst [vmem:[#allocation9_spill] sm:$0xff] %v8013_v10  ;;  %v2406_v19 = vcombine.high %v2398_v63, %v2398_v63  ;;  %v2564_v20 = vsel %vm2557_vm0, %v2280_v61, %v2499_v3  ;;  %v2501_v23 = vrot.slane %v2398_v63, 5  ;;  %v2503_v24 = vrot.slane %v2405_v6, 5 }
  0x1f   : > { %7710 = vset.pattern.permute.xlu1 %v11611_v0  ;;  %399 = vperm.xlu0 %7709, %v369_v11   ;;  %v2408_v11 = vcombine.high %v2296_v58, %v2296_v58  ;;  %v2407_v22 = vcombine.high %v2405_v6, %v2405_v6  ;;  %v8031_v26 = vrot.slane %v7986_v52, %v8010_v9  ;;  %v8043_v33 = vsub.s32 4, %v7909_v5 }
  0x20   : > { %858 = vperm.xlu1 %7710, %v370_v25   ;;  %v8027_v25 = vsub.s32 %v6681_v7, %v7909_v5  ;;  %v2415_v28 = vrot.slane %v2296_v58, %v7921_v8  ;;  %v2563_v30 = vsel %vm2557_vm0, %v2319_v12, %v2498_v13  ;;  %v2565_v31 = vsel %vm2557_vm0, %v2320_v14, %v2500_v15 }
  0x21   : > { %v2422_v29 = vrot.slane %v2408_v11, %v7921_v8  ;;  %v8040_v32 = vrot.slane %v7986_v52, %v8013_v10  ;;  %11710 = vst [vmem:[#allocation11_spill] sm:$0xff] %v8043_v33  ;;  %v2595_v34 = vsel %vm2590_vm1, %v2562_v18, 0.0  ;;  %v2597_v35 = vsel %vm2590_vm1, %v2564_v20, 0.0 }
  0x22   : > { %11709 = vst [vmem:[#allocation10_spill] sm:$0xff] %v8027_v25  ;;  %v2321_v36 = vcombine.high %v2281_v21, %v2281_v21  ;;  %v2502_v37 = vrot.slane %v2406_v19, 5  ;;  %v2322_v38 = vcombine.high %v2282_v27, %v2282_v27  ;;  %v2504_v39 = vrot.slane %v2407_v22, 5 }
  0x23   : > { %394 = vperm.xlu0 %7709, %v368_v40   ;;  %v2424_v45 = vcombine.high %v2422_v29, %v2422_v29  ;;  %v2505_v46 = vrot.slane %v2415_v28, 5  ;;  %v2507_v47 = vrot.slane %v2422_v29, 5  ;;  %v8052_v48 = vsel %vm2590_vm1, %v2563_v30, 0.0 }
  0x24   : > { %7711 = vset.pattern.permute.xlu1 %v11613_v4  ;;  %v8055_v51 = vsel %vm2590_vm1, %v2565_v31, 0.0  ;;  %v8059_v53 = vrot.slane %v7986_v52, %v8043_v33  ;;  %v8062_v54 = vsub.s32 6, %v7909_v5  ;;  %v7648_v57 = vpack.c.bf16 %v2595_v34, %v2595_v34  ;;  %v375_v34 = vld [vmem:[%s7975_s18 + $0x10] sm:$0xff] }
  0x25   : > { %389 = vperm.xlu1 %7711, %v367_v41   ;;  %v7650_v58 = vpack.c.bf16 %v2597_v35, %v2597_v35  ;;  %v2567_v60 = vsel %vm2557_vm0, %v2321_v36, %v2502_v37  ;;  %v2569_v62 = vsel %vm2557_vm0, %v2322_v38, %v2504_v39  ;;  %v2324_v6 = vcombine.high %v2284_v44, %v2284_v44 }
  0x26   : > { %11711 = vst [vmem:[#allocation12_spill] sm:$0xff] %v8062_v54  ;;  %v2508_v11 = vrot.slane %v2424_v45, 5  ;;  %v2572_v5 = vsel %vm2557_vm0, %v2284_v44, %v2507_v47  ;;  %v8075_v14 = vrot.slane %v7986_v52, %v8062_v54  ;;  %v8078_v18 = vrot.slane %v374_v56, %v7980_v49  ;;  %v2297_v44 = vld [vmem:[%s11606_s2 + $0x20] sm:$0xff] }
  0x27   : > { %379 = vperm.xlu0 %7709, %v365_v42   ;;  %v8083_v20 = vsel %vm3652_vm2, %v7648_v57, 0  ;;  %v8092_v52 = vsel %vm2590_vm1, %v2569_v62, 0.0  ;;  %v8100_v29 = vrot.slane %v374_v56, %v7989_v55  ;;  %v8111_v37 = vrot.slane %v374_v56, %v7995_v59 }
  0x28   : > { %11713 = vst [vmem:[#allocation14_spill] sm:$0xff] %v8092_v52  ;;  %v2573_v31 = vsel %vm2557_vm0, %v2324_v6, %v2508_v11  ;;  %v8114_v38 = vrot.slane %v374_v56, %v8010_v9  ;;  %v2432_v57 = vrot.slane %v2297_v44, %v7921_v8  ;;  %v8140_v62 = vrot.slane %v374_v56, %v8043_v33 }
  0x29   : > { %7712 = vset.pattern.permute.xlu1 %v11611_v0  ;;  %11715 = vst [vmem:[#allocation16_spill] sm:$0xff] %v8100_v29  ;;  %11717 = vst [vmem:[#allocation18_spill] sm:$0xff] %v8111_v37  ;;  %v8131_v47 = vsel %vm2590_vm1, %v2573_v31, 0.0 }
  0x2a   : > { %846 = vperm.xlu1 %7712, %v367_v41   ;;  %v2568_v41 = vsel %vm2557_vm0, %v2282_v27, %v2503_v24  ;;  %v2605_v27 = vsel %vm2590_vm1, %v2572_v5, 0.0  ;;  %11718 = vst [vmem:[#allocation19_spill] sm:$0xff] %v8114_v38  ;;  %11721 = vst [vmem:[#allocation22_spill] sm:$0xff] %v8131_v47 }
  0x2b   : > { %7714 = vset.pattern.permute.xlu0 %v11611_v0  ;;  %v2601_v63 = vsel %vm2590_vm1, %v2568_v41, 0.0  ;;  %11723 = vst [vmem:[#allocation24_spill] sm:$0xff] %v8140_v62 }
  0x2c   : > { %838 = vperm.xlu0 %7714, %v365_v42   ;;  %v2283_v42 = vld [vmem:[%s7928_s10 + $0x30] sm:$0x77]  ;;  %v7654_v22 = vpack.c.bf16 %v2601_v63, %v2601_v63  ;;  %v8143_v63 = vrot.slane %v374_v56, %v8062_v54 }
  0x2d   : > { %v2323_v3 = vcombine.high %v2283_v42, %v2283_v42  ;;  %v2570_v12 = vsel %vm2557_vm0, %v2283_v42, %v2505_v46  ;;  %v7658_v42 = vpack.c.bf16 %v2605_v27, %v2605_v27 }
  0x2e   : > { %850 = vperm.xlu1 %7712, %v368_v40   ;;  %v2566_v40 = vsel %vm2557_vm0, %v2281_v21, %v2501_v23  ;;  %v8086_v21 = vsel %vm2590_vm1, %v2567_v60, 0.0  ;;  %v8089_v23 = vsel %vm3652_vm2, %v7650_v58, 0  ;;  %v2603_v24 = vsel %vm2590_vm1, %v2570_v12, 0.0  ;;  %11724 = vst [vmem:[#allocation25_spill] sm:$0xff] %v8143_v63 }
  0x2f   : > { %v2599_v61 = vsel %vm2590_vm1, %v2566_v40, 0.0  ;;  %11712 = vst [vmem:[#allocation13_spill] sm:$0xff] %v8086_v21  ;;  %v8119_v40 = vsel %vm3652_vm2, %v7654_v22, 0  ;;  %v7656_v41 = vpack.c.bf16 %v2603_v24, %v2603_v24  ;;  %v2425_v58 = vcombine.high %v2297_v44, %v2297_v44  ;;  %v8162_v24 = vld [vmem:[%s7928_s10 + $0x48] sm:$0x77] }
  0x30   : > { %7717 = vset.pattern.permute.xlu0 %v11613_v4  ;;  %v7652_v15 = vpack.c.bf16 %v2599_v61, %v2599_v61  ;;  %11719 = vst [vmem:[#allocation20_spill] sm:$0xff] %v8119_v40  ;;  %v8137_v61 = vrot.slane %v374_v56, %v8013_v10  ;;  %v2509_v12 = vrot.slane %v2432_v57, 5  ;;  %11728 = vst [vmem:[#allocation29_spill] sm:$0xff] %v8162_v24 }
  0x31   : > { %v8149_v11 = vrot.slane %v2425_v58, %v7921_v8  ;;  %v8156_v22 = vsel %vm3652_vm2, %v7656_v41, 0  ;;  %v8175_v41 = vrot.slane %v375_v34, %v7989_v55 }
  0x32   : > { %7713 = vset.pattern.permute.xlu1 %v11613_v4  ;;  %v8108_v36 = vsel %vm3652_vm2, %v7652_v15, 0  ;;  %11722 = vst [vmem:[#allocation23_spill] sm:$0xff] %v8137_v61  ;;  %11726 = vst [vmem:[#allocation27_spill] sm:$0xff] %v8156_v22  ;;  %v8181_v15 = vrot.slane %v375_v34, %v8010_v9 }
  0x33   : > { %384 = vperm.xlu1 %7713, %v366_v43   ;;  %11716 = vst [vmem:[#allocation17_spill] sm:$0xff] %v8108_v36  ;;  %v2511_v44 = vrot.slane %v8149_v11, 5  ;;  %11730 = vst [vmem:[#allocation31_spill] sm:$0xff] %v8175_v41 }
  0x34   : > { %11732 = vst [vmem:[#allocation33_spill] sm:$0xff] %v8181_v15 }
  0x37   : > { %7715 = vset.pattern.permute.xlu1 %v11611_v0 }
  0x38   : > { %842 = vperm.xlu1 %7715, %v366_v43   ;;  %v2423_v43 = vcombine.high %v2415_v28, %v2415_v28  ;;  %v8097_v28 = vrot.slane %v374_v56, %v7983_v50  ;;  %v8159_v56 = vsel %vm3652_vm2, %v7658_v42, 0  ;;  %v8178_v42 = vrot.slane %v375_v34, %v7995_v59 }
  0x39   : > { %11727 = vst [vmem:[#allocation28_spill] sm:$0xff] %v8159_v56 }
  0x3a   : > { %v2506_v7 = vrot.slane %v2423_v43, 5  ;;  %11714 = vst [vmem:[#allocation15_spill] sm:$0xff] %v8097_v28  ;;  %v2285_v43 = vld [vmem:[%s7928_s10 + $0x40] sm:$0x77]  ;;  %11731 = vst [vmem:[#allocation32_spill] sm:$0xff] %v8178_v42 }
  0x3b   : > { %v2325_v6 = vcombine.high %v2285_v43, %v2285_v43  ;;  %v2574_v31 = vsel %vm2557_vm0, %v2285_v43, %v2509_v12 }
  0x3c   : > { %7716 = vset.pattern.permute.xlu1 %v11613_v4  ;;  %v2571_v30 = vsel %vm2557_vm0, %v2323_v3, %v2506_v7  ;;  %v8146_v3 = vrot.slane %v375_v34, %v7980_v49  ;;  %v2440_v7 = vcombine.high %v2432_v57, %v2432_v57  ;;  %v8169_v57 = vrot.slane %v375_v34, %v7983_v50 }
  0x3d   : > { %v8128_v46 = vsel %vm2590_vm1, %v2571_v30, 0.0  ;;  %v8172_v58 = vsel %vm2590_vm1, %v2574_v31, 0.0  ;;  %v8212_v4 = vsel %vm2557_vm0, %v8162_v24, %v2511_v44 }
  0x3e   : > { %11720 = vst [vmem:[#allocation21_spill] sm:$0xff] %v8128_v46  ;;  %11725 = vst [vmem:[#allocation26_spill] sm:$0xff] %v8146_v3  ;;  %v2510_v30 = vrot.slane %v2440_v7, 5 }
  0x3f   : > { %11729 = vst [vmem:[#allocation30_spill] sm:$0xff] %v8169_v57 }
  0x40   : > { %v8186_v43 = vsel %vm2557_vm0, %v2325_v6, %v2510_v30 }
  0x8d   : > { %v8125_v45 = vpop.permute.xlu1 %862  ;;  %v8134_v60 = vpop.permute.xlu0 %854 }
  0x91   : > { %v8164_v27 = vpop.permute.xlu1 %866 }
  0x92   : > { %v8183_v7 = vpop.permute.xlu0 %409 }
  0x93   : > { %v774_v39 = vmul.f32 %v8002_v1, %v8183_v7  ;;  %v776_v34 = vmul.f32 %v8006_v2, %v8183_v7  ;;  %v773_v35 = vmul.f32 %v8017_v16, %v8183_v7  ;;  %v775_v6 = vmul.f32 %v8021_v17, %v8183_v7 }
  0x94   : > { %v778_v30 = vmul.f32 %v8031_v26, %v8183_v7  ;;  %v780_v12 = vmul.f32 %v8040_v32, %v8183_v7  ;;  %v8208_v0 = vmul.f32 %v8059_v53, %v8183_v7 }
  0x95   : > { %v1062_v19 = vadd.f32 %v8125_v45, %v774_v39  ;;  %v1064_v13 = vadd.f32 %v8125_v45, %v776_v34  ;;  %v1061_v31 = vadd.f32 %v8125_v45, %v773_v35  ;;  %v1063_v25 = vadd.f32 %v8125_v45, %v775_v6 }
  0x96   : > { %v8214_v5 = vpop.permute.xlu1 %404  ;;  %v8220_v9 = vpop.permute.xlu0 %414  ;;  %v8230_v39 = vmul.f32 %v8075_v14, %v8183_v7  ;;  %v8255_v3 = vadd.f32 %v8125_v45, %v778_v30 }
  0x97   : > { %v742_v59 = vmul.f32 %v8002_v1, %v8214_v5  ;;  %v744_v55 = vmul.f32 %v8006_v2, %v8214_v5  ;;  %v741_v44 = vmul.f32 %v8017_v16, %v8214_v5  ;;  %v806_v35 = vmul.f32 %v8002_v1, %v8220_v9 }
  0x98   : > { %v1318_v34 = vmax.f32 %v1062_v19, 0.0  ;;  %v808_v6 = vmul.f32 %v8006_v2, %v8220_v9  ;;  %v743_v50 = vmul.f32 %v8021_v17, %v8214_v5  ;;  %v1320_v49 = vmax.f32 %v1064_v13, 0.0 }
  0x99   : > { %v805_v54 = vmul.f32 %v8017_v16, %v8220_v9  ;;  %v1317_v33 = vmax.f32 %v1061_v31, 0.0  ;;  %v807_v10 = vmul.f32 %v8021_v17, %v8220_v9  ;;  %v1094_v15 = vadd.f32 %v8164_v27, %v806_v35 }
  0x9a   : > { %v1096_v8 = vadd.f32 %v8164_v27, %v808_v6  ;;  %v1319_v42 = vmax.f32 %v1063_v25, 0.0  ;;  %v8246_v19 = vmul.f32 %v8031_v26, %v8220_v9  ;;  %v8248_v41 = vpop.permute.xlu0 %399  ;;  %v8259_v35 = vmul.f32 %v8040_v32, %v8220_v9 }
  0x9b   : > { %v8250_v57 = vpop.permute.xlu1 %858  ;;  %v1093_v13 = vadd.f32 %v8164_v27, %v805_v54  ;;  %v1095_v31 = vadd.f32 %v8164_v27, %v807_v10  ;;  %v1350_v25 = vmax.f32 %v1094_v15, 0.0  ;;  %v710_v24 = vmul.f32 %v8002_v1, %v8248_v41 }
  0x9c   : > { %v1352_v6 = vmax.f32 %v1096_v8, 0.0  ;;  %v1030_v56 = vadd.f32 %v8250_v57, %v742_v59  ;;  %v712_v54 = vmul.f32 %v8006_v2, %v8248_v41  ;;  %v1032_v10 = vadd.f32 %v8250_v57, %v744_v55 }
  0x9d   : > { %v1349_v22 = vmax.f32 %v1093_v13, 0.0  ;;  %v1351_v47 = vmax.f32 %v1095_v31, 0.0  ;;  %v7613_v30 = vpack.c.bf16 %v1350_v25, %v1318_v34  ;;  %v998_v63 = vadd.f32 %v8134_v60, %v710_v24 }
  0x9e   : > { %v7615_v46 = vpack.c.bf16 %v1352_v6, %v1320_v49  ;;  %v1286_v62 = vmax.f32 %v1030_v56, 0.0  ;;  %v8268_v61 = vpop.permute.xlu0 %394  ;;  %v1000_v38 = vadd.f32 %v8134_v60, %v712_v54  ;;  %v1288_v40 = vmax.f32 %v1032_v10, 0.0 }
  0x9f   : > { %v7612_v8 = vpack.c.bf16 %v1349_v22, %v1317_v33  ;;  %v7614_v15 = vpack.c.bf16 %v1351_v47, %v1319_v42  ;;  %3757 = vmatprep.subr.bf16.mxu0 %v7613_v30  ;;  %v1254_v13 = vmax.f32 %v998_v63, 0.0  ;;  %v709_v55 = vmul.f32 %v8017_v16, %v8248_v41 }
  0xa0   : > { %3810 = vmatprep.subr.bf16.mxu1 %v7615_v46  ;;  %v8271_v59 = vpop.permute.xlu1 %389  ;;  %v1029_v49 = vadd.f32 %v8250_v57, %v741_v44  ;;  %v711_v56 = vmul.f32 %v8021_v17, %v8248_v41  ;;  %v1256_v33 = vmax.f32 %v1000_v38, 0.0  ;;  %v1031_v47 = vadd.f32 %v8250_v57, %v743_v50 }
  0xa1   : > { %3758 = vmatpush1.bf16.msra.mxu0 %v7612_v8  ;;  %3811 = vmatpush1.bf16.msra.mxu1 %v7614_v15  ;;  %v646_v22 = vmul.f32 %v8002_v1, %v8271_v59  ;;  %v8282_v46 = vadd.f32 %v8125_v45, %v780_v12  ;;  %v7581_v63 = vpack.c.bf16 %v1286_v62, %v1254_v13 }
  0xa2   : > { %v997_v24 = vadd.f32 %v8134_v60, %v709_v55  ;;  %v1285_v42 = vmax.f32 %v1029_v49, 0.0  ;;  %v999_v44 = vadd.f32 %v8134_v60, %v711_v56  ;;  %v8286_v34 = vpop.permute.xlu0 %379  ;;  %v7583_v31 = vpack.c.bf16 %v1288_v40, %v1256_v33 }
  0xa3   : > { %v1287_v25 = vmax.f32 %v1031_v47, 0.0  ;;  %v678_v38 = vmul.f32 %v8002_v1, %v8268_v61  ;;  %v648_v50 = vmul.f32 %v8006_v2, %v8271_v59  ;;  %3759 = vmatprep.subr.bf16.mxu0 %v7581_v63  ;;  %v680_v62 = vmul.f32 %v8006_v2, %v8268_v61 }
  0xa4   : > { %v1253_v6 = vmax.f32 %v997_v24, 0.0  ;;  %v1255_v12 = vmax.f32 %v999_v44, 0.0  ;;  %v645_v54 = vmul.f32 %v8017_v16, %v8271_v59  ;;  %3812 = vmatprep.subr.bf16.mxu1 %v7583_v31  ;;  %v677_v40 = vmul.f32 %v8017_v16, %v8268_v61 }
  0xa5   : > { %v8296_v10 = vpop.permute.xlu1 %846  ;;  %v647_v30 = vmul.f32 %v8021_v17, %v8271_v59  ;;  %v679_v8 = vmul.f32 %v8021_v17, %v8268_v61  ;;  %v582_v15 = vmul.f32 %v8002_v1, %v8286_v34  ;;  %v584_v63 = vmul.f32 %v8006_v2, %v8286_v34 }
  0xa6   : > { %v7580_v13 = vpack.c.bf16 %v1285_v42, %v1253_v6  ;;  %v7582_v55 = vpack.c.bf16 %v1287_v25, %v1255_v12  ;;  %v934_v49 = vadd.f32 %v8296_v10, %v646_v22  ;;  %v936_v56 = vadd.f32 %v8296_v10, %v648_v50 }
  0xa7   : > { %v933_v33 = vadd.f32 %v8296_v10, %v645_v54  ;;  %v935_v47 = vadd.f32 %v8296_v10, %v647_v30  ;;  %v581_v24 = vmul.f32 %v8017_v16, %v8286_v34  ;;  %v8314_v44 = vpop.permute.xlu0 %838  ;;  %v583_v22 = vmul.f32 %v8021_v17, %v8286_v34 }
  0xa8   : > { %3760 = vmatpush1.bf16.msra.mxu0 %v7580_v13  ;;  %3813 = vmatpush1.bf16.msra.mxu1 %v7582_v55  ;;  %v1190_v42 = vmax.f32 %v934_v49, 0.0  ;;  %v1192_v31 = vmax.f32 %v936_v56, 0.0  ;;  %v1098_v25 = vadd.f32 %v8164_v27, %v8246_v19  ;;  %v8323_v12 = vadd.f32 %v8314_v44, %v582_v15 }
  0xa9   : > { %v8320_v50 = vpop.permute.xlu1 %850  ;;  %v1189_v6 = vmax.f32 %v933_v33, 0.0  ;;  %v8326_v54 = vadd.f32 %v8314_v44, %v584_v63  ;;  %v1322_v30 = vmax.f32 %v8255_v3, 0.0  ;;  %v1191_v19 = vmax.f32 %v935_v47, 0.0 }
  0xaa   : > { %v966_v13 = vadd.f32 %v8320_v50, %v678_v38  ;;  %v968_v55 = vadd.f32 %v8320_v50, %v680_v62  ;;  %v965_v49 = vadd.f32 %v8320_v50, %v677_v40  ;;  %v967_v56 = vadd.f32 %v8320_v50, %v679_v8 }
  0xab   : > { %v1126_v36 = vmax.f32 %v8323_v12, 0.0  ;;  %v1128_v33 = vmax.f32 %v8326_v54, 0.0  ;;  %v869_v15 = vadd.f32 %v8314_v44, %v581_v24  ;;  %v871_v38 = vadd.f32 %v8314_v44, %v583_v22 }
  0xac   : > { %v1222_v52 = vmax.f32 %v966_v13, 0.0  ;;  %v1224_v63 = vmax.f32 %v968_v55, 0.0  ;;  %v1221_v21 = vmax.f32 %v965_v49, 0.0  ;;  %v1223_v37 = vmax.f32 %v967_v56, 0.0 }
  0xad   : > { %v1125_v3 = vmax.f32 %v869_v15, 0.0  ;;  %v1354_v29 = vmax.f32 %v1098_v25, 0.0  ;;  %v1100_v62 = vadd.f32 %v8164_v27, %v8259_v35 }
  0xae   : > { %v8339_v40 = vpop.permute.xlu1 %384  ;;  %v7549_v8 = vpack.c.bf16 %v1222_v52, %v1190_v42  ;;  %v7551_v47 = vpack.c.bf16 %v1224_v63, %v1192_v31  ;;  %v7548_v12 = vpack.c.bf16 %v1221_v21, %v1189_v6  ;;  %v7550_v28 = vpack.c.bf16 %v1223_v37, %v1191_v19 }
  0xaf   : > { %v614_v24 = vmul.f32 %v8002_v1, %v8339_v40  ;;  %v616_v54 = vmul.f32 %v8006_v2, %v8339_v40  ;;  %v613_v13 = vmul.f32 %v8017_v16, %v8339_v40  ;;  %v615_v22 = vmul.f32 %v8021_v17, %v8339_v40 }
  0xb0   : > { %3761 = vmatprep.subr.bf16.mxu0 %v7549_v8  ;;  %3814 = vmatprep.subr.bf16.mxu1 %v7551_v47  ;;  %v8349_v35 = vpack.c.bf16 %v1354_v29, %v1322_v30  ;;  %v1324_v52 = vmax.f32 %v8282_v46, 0.0  ;;  %v1356_v21 = vmax.f32 %v1100_v62, 0.0  ;;  %v809_v37 = vmul.f32 %v8059_v53, %v8220_v9 }
  0xb1   : > { %3762 = vmatpush1.bf16.msra.mxu0 %v7548_v12  ;;  %3815 = vmatpush1.bf16.msra.mxu1 %v7550_v28  ;;  %v1127_v1 = vmax.f32 %v871_v38, 0.0  ;;  %v1065_v2 = vadd.f32 %v8125_v45, %v8208_v0  ;;  %v811_v16 = vmul.f32 %v8075_v14, %v8220_v9  ;;  %v1067_v17 = vadd.f32 %v8125_v45, %v8230_v39 }
  0xb2   : > { %v8360_v29 = vpack.c.bf16 %v1356_v21, %v1324_v52  ;;  %v1097_v46 = vadd.f32 %v8164_v27, %v809_v37  ;;  %v714_v42 = vmul.f32 %v8031_v26, %v8248_v41  ;;  %v746_v28 = vmul.f32 %v8031_v26, %v8214_v5 }
  0xb3   : > { %v8367_v31 = vpop.permute.xlu1 %842  ;;  %v1321_v0 = vmax.f32 %v1065_v2, 0.0  ;;  %v1099_v25 = vadd.f32 %v8164_v27, %v811_v16  ;;  %v1323_v6 = vmax.f32 %v1067_v17, 0.0  ;;  %v716_v39 = vmul.f32 %v8040_v32, %v8248_v41 }
  0xb4   : > { %v902_v30 = vadd.f32 %v8367_v31, %v614_v24  ;;  %v904_v55 = vadd.f32 %v8367_v31, %v616_v54  ;;  %v901_v49 = vadd.f32 %v8367_v31, %v613_v13  ;;  %v903_v56 = vadd.f32 %v8367_v31, %v615_v22 }
  0xb5   : > { %v1353_v19 = vmax.f32 %v1097_v46, 0.0  ;;  %v1355_v15 = vmax.f32 %v1099_v25, 0.0  ;;  %v1002_v63 = vadd.f32 %v8134_v60, %v714_v42  ;;  %v1034_v38 = vadd.f32 %v8250_v57, %v746_v28  ;;  %v8392_v28 = vld [vmem:[%s11607_s3] sm:$0xff]  }
  0xb6   : > { %v1158_v62 = vmax.f32 %v902_v30, 0.0  ;;  %v1160_v8 = vmax.f32 %v904_v55, 0.0  ;;  %v1157_v47 = vmax.f32 %v901_v49, 0.0  ;;  %v1159_v12 = vmax.f32 %v903_v56, 0.0 }
  0xb7   : > { %v8378_v52 = vpack.c.bf16 %v1353_v19, %v1321_v0  ;;  %v8380_v21 = vpack.c.bf16 %v1355_v15, %v1323_v6  ;;  %v1258_v24 = vmax.f32 %v1002_v63, 0.0  ;;  %v1290_v54 = vmax.f32 %v1034_v38, 0.0 }
  0xb8   : > { %v7517_v37 = vpack.c.bf16 %v1158_v62, %v1126_v36  ;;  %v7519_v13 = vpack.c.bf16 %v1160_v8, %v1128_v33  ;;  %v7516_v2 = vpack.c.bf16 %v1157_v47, %v1125_v3  ;;  %v7518_v22 = vpack.c.bf16 %v1159_v12, %v1127_v1 }
  0xb9   : > { %v8382_v16 = vpack.c.bf16 %v1290_v54, %v1258_v24  ;;  %v748_v17 = vmul.f32 %v8040_v32, %v8214_v5  ;;  %v1004_v46 = vadd.f32 %v8134_v60, %v716_v39  ;;  %v713_v42 = vmul.f32 %v8059_v53, %v8248_v41 }
  0xba   : > { %3763 = vmatprep.subr.bf16.mxu0 %v7517_v37  ;;  %3816 = vmatprep.subr.bf16.mxu1 %v7519_v13  ;;  %v745_v36 = vmul.f32 %v8059_v53, %v8214_v5  ;;  %v715_v33 = vmul.f32 %v8075_v14, %v8248_v41  ;;  %v747_v3 = vmul.f32 %v8075_v14, %v8214_v5  ;;  %v8422_v15 = vsel %vm2590_vm1, %v8186_v43, 0.0 }
  0xbb   : > { %v11733_v1 = vcombine.high %v8149_v11, %v8149_v11  ;;  %3764 = vmatpush1.bf16.msra.mxu0 %v7516_v2  ;;  %3817 = vmatpush1.bf16.msra.mxu1 %v7518_v22  ;;  %v1036_v25 = vadd.f32 %v8250_v57, %v748_v17  ;;  %v1260_v6 = vmax.f32 %v1004_v46, 0.0  ;;  %v1001_v39 = vadd.f32 %v8134_v60, %v713_v42  ;;  %v8450_v17 = vld [vmem:[%s11609_s5] sm:$0xff] }
  0xbc   : > { %v650_v30 = vmul.f32 %v8031_v26, %v8271_v59  ;;  %v11734_v55 = vpack.c.bf16 %v8052_v48, %v8052_v48  ;;  %v11735_v11 = vpack.c.bf16 %v8055_v51, %v8055_v51  ;;  %v1033_v49 = vadd.f32 %v8250_v57, %v745_v36  ;;  %v8462_v36 = vld [vmem:[%s11607_s3 + $0x8] sm:$0xff]   ;;  %5755 = vperm.xlu1 %7716, %v8450_v17  }
  0xbd   : > { %v8403_v0 = vrot.slane %v11733_v1, 5  ;;  %v1003_v56 = vadd.f32 %v8134_v60, %v715_v33  ;;  %v1035_v19 = vadd.f32 %v8250_v57, %v747_v3  ;;  %v1292_v63 = vmax.f32 %v1036_v25, 0.0 }
  0xbe   : > { %7326 = vmatprep.subr.msk.bf16.mxu0 %vm3652_vm2, %v11734_v55  ;;  %7329 = vmatprep.subr.msk.bf16.mxu1 %vm3652_vm2, %v11735_v11  ;;  %v1257_v38 = vmax.f32 %v1001_v39, 0.0  ;;  %v682_v48 = vmul.f32 %v8031_v26, %v8268_v61  ;;  %v938_v62 = vadd.f32 %v8296_v10, %v650_v30  ;;  %v1289_v51 = vmax.f32 %v1033_v49, 0.0 }
  0xbf   : > { %7321 = vmatmul.mubr.msk.bf16.vlgmr.msra.gmra.mxu0 %vm3645_vm3, %v8392_v28  ;;  %7324 = vmatmul.mubr.msk.bf16.vlgmr.msra.gmra.mxu1 %vm3645_vm3, %v8392_v28  ;;  %v1259_v8 = vmax.f32 %v1003_v56, 0.0  ;;  %v1291_v47 = vmax.f32 %v1035_v19, 0.0  ;;  %v652_v43 = vmul.f32 %v8040_v32, %v8271_v59  ;;  %v7587_v12 = vpack.c.bf16 %v1292_v63, %v1260_v6 }
  0xc0   : > { %3862 = vmatpush1.bf16.msra.mxu0 %v8083_v20  ;;  %3915 = vmatpush1.bf16.msra.mxu1 %v8089_v23  ;;  %v970_v24 = vadd.f32 %v8320_v50, %v682_v48  ;;  %v684_v54 = vmul.f32 %v8040_v32, %v8268_v61  ;;  %v11736_v37 = vpack.c.bf16 %v8172_v58, %v8172_v58  ;;  %v1194_v22 = vmax.f32 %v938_v62, 0.0 }
  0xc1   : > { %3863 = vmatprep.subr.bf16.mxu0 %v8349_v35  ;;  %3916 = vmatprep.subr.bf16.mxu1 %v8360_v29  ;;  %v7584_v2 = vpack.c.bf16 %v1289_v51, %v1257_v38  ;;  %v7586_v20 = vpack.c.bf16 %v1291_v47, %v1259_v8  ;;  %v940_v23 = vadd.f32 %v8296_v10, %v652_v43  ;;  %v11737_v46 = vmov 0   ;;  %v8499_v43 = vld [vmem:[%s11609_s5 + $0x10] sm:$0xff] }
  0xc2   : > { %v8442_v13 = vsel %vm3652_vm2, %v11736_v37, 0  ;;  %3791 = vmatprep.mubr.bf16.mxu0 %v11737_v46  ;;  %3844 = vmatprep.mubr.bf16.mxu1 %v11737_v46  ;;  %v1226_v58 = vmax.f32 %v970_v24, 0.0  ;;  %v972_v42 = vadd.f32 %v8320_v50, %v684_v54  ;;  %v649_v35 = vmul.f32 %v8059_v53, %v8271_v59 }
  0xc3   : > { %v681_v29 = vmul.f32 %v8059_v53, %v8268_v61  ;;  %v1196_v33 = vmax.f32 %v940_v23, 0.0  ;;  %v651_v3 = vmul.f32 %v8075_v14, %v8271_v59  ;;  %v683_v1 = vmul.f32 %v8075_v14, %v8268_v61  ;;  %5765 = vperm.xlu1 %7716, %v8499_v43  }
  0xc4   : > { %v586_v25 = vmul.f32 %v8031_v26, %v8286_v34  ;;  %3864 = vmatpush1.bf16.msra.mxu0 %v8378_v52  ;;  %3917 = vmatpush1.bf16.msra.mxu1 %v8380_v21  ;;  %v7553_v6 = vpack.c.bf16 %v1226_v58, %v1194_v22  ;;  %v1228_v39 = vmax.f32 %v972_v42, 0.0  ;;  %v937_v30 = vadd.f32 %v8296_v10, %v649_v35 }
  0xc5   : > { %v969_v55 = vadd.f32 %v8320_v50, %v681_v29  ;;  %3865 = vmatprep.subr.bf16.mxu0 %v8382_v16  ;;  %3918 = vmatprep.subr.bf16.mxu1 %v7587_v12  ;;  %v939_v11 = vadd.f32 %v8296_v10, %v651_v3  ;;  %v971_v49 = vadd.f32 %v8320_v50, %v683_v1  ;;  %v8482_v52 = vsel %vm2590_vm1, %v8212_v4, 0.0 }
  0xc6   : > { %v618_v56 = vmul.f32 %v8031_v26, %v8339_v40  ;;  %v7555_v21 = vpack.c.bf16 %v1228_v39, %v1196_v33  ;;  %v1193_v19 = vmax.f32 %v937_v30, 0.0  ;;  %v874_v38 = vadd.f32 %v8314_v44, %v586_v25 }
  0xc7   : > { %v1225_v63 = vmax.f32 %v969_v55, 0.0  ;;  %7322 = vmatmul.mubr.msk.bf16.gmra.mxu0 %vm3645_vm3, %v8462_v36  ;;  %7325 = vmatmul.mubr.msk.bf16.gmra.mxu1 %vm3645_vm3, %v8462_v36  ;;  %v1195_v16 = vmax.f32 %v939_v11, 0.0  ;;  %v1227_v48 = vmax.f32 %v971_v49, 0.0  ;;  %v588_v26 = vmul.f32 %v8040_v32, %v8286_v34 }
  0xc8   : > { %v906_v62 = vadd.f32 %v8367_v31, %v618_v56  ;;  %3866 = vmatpush1.bf16.msra.mxu0 %v7584_v2  ;;  %3919 = vmatpush1.bf16.msra.mxu1 %v7586_v20  ;;  %v1130_v51 = vmax.f32 %v874_v38, 0.0  ;;  %v620_v8 = vmul.f32 %v8040_v32, %v8339_v40  ;;  %v585_v47 = vmul.f32 %v8059_v53, %v8286_v34 }
  0xc9   : > { %v7552_v4 = vpack.c.bf16 %v1225_v63, %v1193_v19  ;;  %3867 = vmatprep.subr.bf16.mxu0 %v7553_v6  ;;  %3920 = vmatprep.subr.bf16.mxu1 %v7555_v21  ;;  %v7554_v12 = vpack.c.bf16 %v1227_v48, %v1195_v16  ;;  %v876_v54 = vadd.f32 %v8314_v44, %v588_v26  ;;  %v11738_v6 = vld [vmem:[#allocation15_spill] sm:$0xff]  ;;  %v11739_v38 = vmov 1  }
  0xca   : > { %v1162_v24 = vmax.f32 %v906_v62, 0.0  ;;  %v617_v37 = vmul.f32 %v8059_v53, %v8339_v40  ;;  %v908_v2 = vadd.f32 %v8367_v31, %v620_v8  ;;  %v873_v32 = vadd.f32 %v8314_v44, %v585_v47  ;;  %3887 = vmatprep.mubr.bf16.mxu0 %v11737_v46  ;;  %3940 = vmatprep.mubr.bf16.mxu1 %v11737_v46  ;;  %v11740_v62 = vld [vmem:[#allocation16_spill] sm:$0xff]  ;;  %v11741_v47 = vld [vmem:[#allocation18_spill] sm:$0xff] }
  0xcb   : > { %v587_v20 = vmul.f32 %v8075_v14, %v8286_v34  ;;  %v619_v22 = vmul.f32 %v8075_v14, %v8339_v40  ;;  %v1132_v58 = vmax.f32 %v876_v54, 0.0  ;;  %v782_v53 = vmul.f32 %v8078_v18, %v8183_v7  ;;  %7718 = vset.pattern.permute.xlu1 %v11739_v38  ;;  %v11742_v54 = vld [vmem:[#allocation13_spill] sm:$0xff] }
  0xcc   : > { %v7521_v23 = vpack.c.bf16 %v1162_v24, %v1130_v51  ;;  %v905_v42 = vadd.f32 %v8367_v31, %v617_v37  ;;  %3868 = vmatpush1.bf16.msra.mxu0 %v7552_v4  ;;  %3921 = vmatpush1.bf16.msra.mxu1 %v7554_v12  ;;  %v1164_v35 = vmax.f32 %v908_v2, 0.0  ;;  %v1129_v29 = vmax.f32 %v873_v32, 0.0 }
  0xcd   : > { %v875_v33 = vadd.f32 %v8314_v44, %v587_v20  ;;  %v907_v14 = vadd.f32 %v8367_v31, %v619_v22  ;;  %v814_v1 = vmul.f32 %v8078_v18, %v8220_v9  ;;  %v1070_v25 = vadd.f32 %v8125_v45, %v782_v53  ;;  %5902 = vperm.xlu1 %7718, %v8450_v17  }
  0xce   : > { %3869 = vmatprep.subr.bf16.mxu0 %v7521_v23  ;;  %v1161_v3 = vmax.f32 %v905_v42, 0.0  ;;  %v784_v39 = vmul.f32 %v11738_v6, %v8183_v7  ;;  %v7523_v30 = vpack.c.bf16 %v1164_v35, %v1132_v58  ;;  %v816_v49 = vmul.f32 %v11738_v6, %v8220_v9  ;;  %v11744_v23 = vld [vmem:[#allocation14_spill] sm:$0xff] }
  0xcf   : > { %v1131_v55 = vmax.f32 %v875_v33, 0.0  ;;  %v1163_v11 = vmax.f32 %v907_v14, 0.0  ;;  %v1102_v21 = vadd.f32 %v8164_v27, %v814_v1  ;;  %v1326_v19 = vmax.f32 %v1070_v25, 0.0  ;;  %v11746_v25 = vld [vmem:[#allocation17_spill] sm:$0xff] }
  0xd0   : > { %v7520_v56 = vpack.c.bf16 %v1161_v3, %v1129_v29  ;;  %v1072_v63 = vadd.f32 %v8125_v45, %v784_v39  ;;  %3922 = vmatprep.subr.bf16.mxu1 %v7523_v30  ;;  %v1104_v48 = vadd.f32 %v8164_v27, %v816_v49  ;;  %v781_v26 = vmul.f32 %v11740_v62, %v8183_v7  ;;  %v11747_v49 = vld [vmem:[#allocation20_spill] sm:$0xff] }
  0xd1   : > { %v7522_v16 = vpack.c.bf16 %v1163_v11, %v1131_v55  ;;  %v813_v4 = vmul.f32 %v11740_v62, %v8220_v9  ;;  %v1358_v51 = vmax.f32 %v1102_v21, 0.0  ;;  %v783_v12 = vmul.f32 %v11741_v47, %v8183_v7  ;;  %7720 = vset.pattern.permute.xlu1 %v11737_v46 }
  0xd2   : > { %3870 = vmatpush1.bf16.msra.mxu0 %v7520_v56  ;;  %v1328_v8 = vmax.f32 %v1072_v63, 0.0  ;;  %v815_v24 = vmul.f32 %v11741_v47, %v8220_v9  ;;  %v11743_v37 = vpack.c.bf16 %v11742_v54, %v11742_v54  ;;  %v1360_v2 = vmax.f32 %v1104_v48, 0.0 }
  0xd3   : > { %3923 = vmatpush1.bf16.msra.mxu1 %v7522_v16  ;;  %v1069_v32 = vadd.f32 %v8125_v45, %v781_v26  ;;  %v1101_v20 = vadd.f32 %v8164_v27, %v813_v4  ;;  %v718_v22 = vmul.f32 %v8078_v18, %v8248_v41  ;;  %v11745_v58 = vpack.c.bf16 %v11744_v23, %v11744_v23 }
  0xd4   : > { %7332 = vmatprep.subr.msk.bf16.mxu0 %vm3652_vm2, %v11743_v37  ;;  %v7621_v42 = vpack.c.bf16 %v1358_v51, %v1326_v19  ;;  %v1071_v53 = vadd.f32 %v8125_v45, %v783_v12  ;;  %v1103_v35 = vadd.f32 %v8164_v27, %v815_v24  ;;  %v750_v29 = vmul.f32 %v8078_v18, %v8214_v5 }
  0xd5   : > { %7335 = vmatprep.subr.msk.bf16.mxu1 %vm3652_vm2, %v11745_v58  ;;  %7327 = vmatmul.mubr.msk.bf16.vlgmr.msra.gmra.mxu0 %vm3645_vm3, %v8392_v28  ;;  %v7623_v33 = vpack.c.bf16 %v1360_v2, %v1328_v8  ;;  %v1325_v14 = vmax.f32 %v1069_v32, 0.0  ;;  %v1357_v3 = vmax.f32 %v1101_v20, 0.0  ;;  %v1006_v1 = vadd.f32 %v8134_v60, %v718_v22 }
  0xd6   : > { %7330 = vmatmul.mubr.msk.bf16.vlgmr.msra.gmra.mxu1 %vm3645_vm3, %v8392_v28  ;;  %3968 = vmatpush1.bf16.msra.mxu0 %v11746_v25  ;;  %v1327_v39 = vmax.f32 %v1071_v53, 0.0  ;;  %v1359_v30 = vmax.f32 %v1103_v35, 0.0  ;;  %v1038_v55 = vadd.f32 %v8250_v57, %v750_v29  ;;  %v720_v11 = vmul.f32 %v11738_v6, %v8248_v41 }
  0xd7   : > { %4021 = vmatpush1.bf16.msra.mxu1 %v11747_v49  ;;  %3969 = vmatprep.subr.bf16.mxu0 %v7621_v42  ;;  %v7620_v56 = vpack.c.bf16 %v1357_v3, %v1325_v14  ;;  %v1262_v21 = vmax.f32 %v1006_v1, 0.0  ;;  %v752_v19 = vmul.f32 %v11738_v6, %v8214_v5  ;;  %v717_v63 = vmul.f32 %v11740_v62, %v8248_v41 }
  0xd8   : > { %4022 = vmatprep.subr.bf16.mxu1 %v7623_v33  ;;  %v7622_v16 = vpack.c.bf16 %v1359_v30, %v1327_v39  ;;  %v1294_v48 = vmax.f32 %v1038_v55, 0.0  ;;  %v1008_v26 = vadd.f32 %v8134_v60, %v720_v11  ;;  %3897 = vmatprep.mubr.bf16.mxu0 %v11737_v46  ;;  %v749_v4 = vmul.f32 %v11740_v62, %v8214_v5  ;;  %v8602_v11 = vld [vmem:[%s11609_s5 + $0x18] sm:$0xff] }
  0xd9   : > { %v1040_v51 = vadd.f32 %v8250_v57, %v752_v19  ;;  %3950 = vmatprep.mubr.bf16.mxu1 %v11737_v46  ;;  %v1005_v8 = vadd.f32 %v8134_v60, %v717_v63  ;;  %v719_v12 = vmul.f32 %v11741_v47, %v8248_v41  ;;  %v751_v24 = vmul.f32 %v11741_v47, %v8214_v5 }
  0xda   : > { %3970 = vmatpush1.bf16.msra.mxu0 %v7620_v56  ;;  %v7589_v54 = vpack.c.bf16 %v1294_v48, %v1262_v21  ;;  %v1264_v37 = vmax.f32 %v1008_v26, 0.0  ;;  %v1037_v2 = vadd.f32 %v8250_v57, %v749_v4  ;;  %v654_v32 = vmul.f32 %v8078_v18, %v8271_v59  ;;  %5770 = vperm.xlu1 %7720, %v8602_v11  }
  0xdb   : > { %4023 = vmatpush1.bf16.msra.mxu1 %v7622_v16  ;;  %v1296_v20 = vmax.f32 %v1040_v51, 0.0  ;;  %v1261_v22 = vmax.f32 %v1005_v8, 0.0  ;;  %v1007_v23 = vadd.f32 %v8134_v60, %v719_v12  ;;  %v1039_v58 = vadd.f32 %v8250_v57, %v751_v24 }
  0xdc   : > { %3971 = vmatprep.subr.bf16.mxu0 %v7589_v54  ;;  %v1293_v42 = vmax.f32 %v1037_v2, 0.0  ;;  %v686_v53 = vmul.f32 %v8078_v18, %v8268_v61  ;;  %v942_v35 = vadd.f32 %v8296_v10, %v654_v32  ;;  %v656_v29 = vmul.f32 %v11738_v6, %v8271_v59 }
  0xdd   : > { %v7591_v33 = vpack.c.bf16 %v1296_v20, %v1264_v37  ;;  %7328 = vmatmul.mubr.msk.bf16.gmra.mxu0 %vm3645_vm3, %v8462_v36  ;;  %v1263_v14 = vmax.f32 %v1007_v23, 0.0  ;;  %v1295_v3 = vmax.f32 %v1039_v58, 0.0  ;;  %v688_v1 = vmul.f32 %v11738_v6, %v8268_v61 }
  0xde   : > { %7331 = vmatmul.mubr.msk.bf16.gmra.mxu1 %vm3645_vm3, %v8462_v36  ;;  %v7588_v25 = vpack.c.bf16 %v1293_v42, %v1261_v22  ;;  %v974_v39 = vadd.f32 %v8320_v50, %v686_v53  ;;  %v1198_v30 = vmax.f32 %v942_v35, 0.0  ;;  %v944_v55 = vadd.f32 %v8296_v10, %v656_v29  ;;  %3993 = vmatprep.mubr.bf16.mxu0 %v11737_v46 }
  0xdf   : > { %4024 = vmatprep.subr.bf16.mxu1 %v7591_v33  ;;  %v7590_v49 = vpack.c.bf16 %v1295_v3, %v1263_v14  ;;  %v976_v56 = vadd.f32 %v8320_v50, %v688_v1  ;;  %v653_v21 = vmul.f32 %v11740_v62, %v8271_v59  ;;  %v685_v19 = vmul.f32 %v11740_v62, %v8268_v61  ;;  %v8635_v3 = vld [vmem:[%s11609_s5 + $0x8] sm:$0xff] }
  0xe0   : > { %3972 = vmatpush1.bf16.msra.mxu0 %v7588_v25  ;;  %v1230_v63 = vmax.f32 %v974_v39, 0.0  ;;  %v1200_v16 = vmax.f32 %v944_v55, 0.0  ;;  %v655_v48 = vmul.f32 %v11741_v47, %v8271_v59  ;;  %v687_v26 = vmul.f32 %v11741_v47, %v8268_v61  ;;  %4046 = vmatprep.mubr.bf16.mxu1 %v11737_v46 }
  0xe1   : > { %4025 = vmatpush1.bf16.msra.mxu1 %v7590_v49  ;;  %v1232_v4 = vmax.f32 %v976_v56, 0.0  ;;  %v941_v51 = vadd.f32 %v8296_v10, %v653_v21  ;;  %v973_v8 = vadd.f32 %v8320_v50, %v685_v19  ;;  %v590_v12 = vmul.f32 %v8078_v18, %v8286_v34  ;;  %7721 = vset.pattern.permute.xlu1 %v11739_v38 }
  0xe2   : > { %v7557_v24 = vpack.c.bf16 %v1230_v63, %v1198_v30  ;;  %v943_v54 = vadd.f32 %v8296_v10, %v655_v48  ;;  %v975_v37 = vadd.f32 %v8320_v50, %v687_v26  ;;  %v622_v2 = vmul.f32 %v8078_v18, %v8339_v40  ;;  %5760 = vperm.xlu0 %7717, %v8635_v3   ;;  %v11748_v63 = vld [vmem:[#allocation19_spill] sm:$0xff] }
  0xe3   : > { %v7559_v32 = vpack.c.bf16 %v1232_v4, %v1200_v16  ;;  %v1197_v20 = vmax.f32 %v941_v51, 0.0  ;;  %v1229_v22 = vmax.f32 %v973_v8, 0.0  ;;  %v878_v23 = vadd.f32 %v8314_v44, %v590_v12  ;;  %5910 = vperm.xlu1 %7721, %v8499_v43  }
  0xe4   : > { %3973 = vmatprep.subr.bf16.mxu0 %v7557_v24  ;;  %v1199_v58 = vmax.f32 %v943_v54, 0.0  ;;  %v1231_v42 = vmax.f32 %v975_v37, 0.0  ;;  %v910_v53 = vadd.f32 %v8367_v31, %v622_v2  ;;  %v592_v35 = vmul.f32 %v11738_v6, %v8286_v34  ;;  %v11749_v24 = vld [vmem:[#allocation23_spill] sm:$0xff] }
  0xe5   : > { %4026 = vmatprep.subr.bf16.mxu1 %v7559_v32  ;;  %v7556_v29 = vpack.c.bf16 %v1229_v22, %v1197_v20  ;;  %v1134_v33 = vmax.f32 %v878_v23, 0.0  ;;  %v624_v14 = vmul.f32 %v11738_v6, %v8339_v40  ;;  %v589_v18 = vmul.f32 %v11740_v62, %v8286_v34 }
  0xe6   : > { %v7558_v1 = vpack.c.bf16 %v1231_v42, %v1199_v58  ;;  %v1166_v25 = vmax.f32 %v910_v53, 0.0  ;;  %v880_v39 = vadd.f32 %v8314_v44, %v592_v35  ;;  %v621_v30 = vmul.f32 %v11740_v62, %v8339_v40  ;;  %7719 = vset.pattern.permute.xlu0 %v11739_v38  ;;  %v11750_v38 = vld [vmem:[#allocation24_spill] sm:$0xff] }
  0xe7   : > { %3974 = vmatpush1.bf16.msra.mxu0 %v7556_v29  ;;  %v912_v6 = vadd.f32 %v8367_v31, %v624_v14  ;;  %v877_v55 = vadd.f32 %v8314_v44, %v589_v18  ;;  %v591_v49 = vmul.f32 %v11741_v47, %v8286_v34  ;;  %v623_v56 = vmul.f32 %v11741_v47, %v8339_v40 }
  0xe8   : > { %4027 = vmatpush1.bf16.msra.mxu1 %v7558_v1  ;;  %v7525_v21 = vpack.c.bf16 %v1166_v25, %v1134_v33  ;;  %v1136_v19 = vmax.f32 %v880_v39, 0.0  ;;  %v909_v62 = vadd.f32 %v8367_v31, %v621_v30  ;;  %v786_v16 = vmul.f32 %v11748_v63, %v8183_v7  ;;  %5906 = vperm.xlu0 %7719, %v8635_v3   ;;  %v11751_v1 = vld [vmem:[#allocation25_spill] sm:$0xff] }
  0xe9   : > { %v1168_v48 = vmax.f32 %v912_v6, 0.0  ;;  %v1133_v26 = vmax.f32 %v877_v55, 0.0  ;;  %v879_v4 = vadd.f32 %v8314_v44, %v591_v49  ;;  %v911_v51 = vadd.f32 %v8367_v31, %v623_v56  ;;  %v11752_v30 = vld [vmem:[#allocation21_spill] sm:$0xff] }
  0xea   : > { %3975 = vmatprep.subr.bf16.mxu0 %v7525_v21  ;;  %v1165_v8 = vmax.f32 %v909_v62, 0.0  ;;  %v818_v12 = vmul.f32 %v11748_v63, %v8220_v9  ;;  %v1074_v47 = vadd.f32 %v8125_v45, %v786_v16  ;;  %v788_v54 = vmul.f32 %v11749_v24, %v8183_v7 }
  0xeb   : > { %v7527_v37 = vpack.c.bf16 %v1168_v48, %v1136_v19  ;;  %v1135_v2 = vmax.f32 %v879_v4, 0.0  ;;  %v1167_v32 = vmax.f32 %v911_v51, 0.0  ;;  %v820_v20 = vmul.f32 %v11749_v24, %v8220_v9  ;;  %v11754_v19 = vld [vmem:[#allocation22_spill] sm:$0xff] }
  0xec   : > { %v7524_v22 = vpack.c.bf16 %v1165_v8, %v1133_v26  ;;  %v1106_v23 = vadd.f32 %v8164_v27, %v818_v12  ;;  %v1330_v58 = vmax.f32 %v1074_v47, 0.0  ;;  %v1076_v42 = vadd.f32 %v8125_v45, %v788_v54  ;;  %5914 = vperm.xlu0 %7719, %v8602_v11   ;;  %v11756_v54 = vld [vmem:[#allocation27_spill] sm:$0xff] }
  0xed   : > { %4028 = vmatprep.subr.bf16.mxu1 %v7527_v37  ;;  %v7526_v53 = vpack.c.bf16 %v1167_v32, %v1135_v2  ;;  %v1108_v35 = vadd.f32 %v8164_v27, %v820_v20  ;;  %v785_v29 = vmul.f32 %v11750_v38, %v8183_v7  ;;  %v817_v33 = vmul.f32 %v11750_v38, %v8220_v9 }
  0xee   : > { %3976 = vmatpush1.bf16.msra.mxu0 %v7524_v22  ;;  %v1362_v14 = vmax.f32 %v1106_v23, 0.0  ;;  %v1332_v18 = vmax.f32 %v1076_v42, 0.0  ;;  %v787_v25 = vmul.f32 %v11751_v1, %v8183_v7  ;;  %v819_v39 = vmul.f32 %v11751_v1, %v8220_v9  ;;  %v11757_v22 = vld [vmem:[#allocation28_spill] sm:$0xff] }
  0xef   : > { %4029 = vmatpush1.bf16.msra.mxu1 %v7526_v53  ;;  %v11753_v6 = vpack.c.bf16 %v11752_v30, %v11752_v30  ;;  %v1364_v55 = vmax.f32 %v1108_v35, 0.0  ;;  %v1073_v49 = vadd.f32 %v8125_v45, %v785_v29  ;;  %v1105_v56 = vadd.f32 %v8164_v27, %v817_v33 }
  0xf0   : > { %v722_v21 = vmul.f32 %v11748_v63, %v8248_v41  ;;  %v11755_v62 = vpack.c.bf16 %v11754_v19, %v11754_v19  ;;  %v7625_v16 = vpack.c.bf16 %v1362_v14, %v1330_v58  ;;  %v1075_v48 = vadd.f32 %v8125_v45, %v787_v25 }
  0xf1   : > { %7338 = vmatprep.subr.msk.bf16.mxu0 %vm3652_vm2, %v11753_v6  ;;  %v1107_v26 = vadd.f32 %v8164_v27, %v819_v39  ;;  %v754_v4 = vmul.f32 %v11748_v63, %v8214_v5  ;;  %7333 = vmatmul.mubr.msk.bf16.vlgmr.msra.gmra.mxu0 %vm3645_vm3, %v8392_v28  ;;  %v7627_v51 = vpack.c.bf16 %v1364_v55, %v1332_v18  ;;  %v1329_v8 = vmax.f32 %v1073_v49, 0.0 }
  0xf2   : > { %7341 = vmatprep.subr.msk.bf16.mxu1 %vm3652_vm2, %v11755_v62  ;;  %v1361_v12 = vmax.f32 %v1105_v56, 0.0  ;;  %v1010_v47 = vadd.f32 %v8134_v60, %v722_v21  ;;  %7336 = vmatmul.mubr.msk.bf16.vlgmr.msra.gmra.mxu1 %vm3645_vm3, %v8392_v28  ;;  %v1331_v37 = vmax.f32 %v1075_v48, 0.0  ;;  %v724_v20 = vmul.f32 %v11749_v24, %v8248_v41 }
  0xf3   : > { %4074 = vmatpush1.bf16.msra.mxu0 %v11756_v54  ;;  %v1363_v2 = vmax.f32 %v1107_v26, 0.0  ;;  %v1042_v32 = vadd.f32 %v8250_v57, %v754_v4  ;;  %4127 = vmatpush1.bf16.msra.mxu1 %v11757_v22  ;;  %v756_v42 = vmul.f32 %v11749_v24, %v8214_v5  ;;  %v721_v53 = vmul.f32 %v11750_v38, %v8248_v41 }
  0xf4   : > { %4075 = vmatprep.subr.bf16.mxu0 %v7625_v16  ;;  %v7624_v23 = vpack.c.bf16 %v1361_v12, %v1329_v8  ;;  %v1266_v58 = vmax.f32 %v1010_v47, 0.0  ;;  %4128 = vmatprep.subr.bf16.mxu1 %v7627_v51  ;;  %v1012_v33 = vadd.f32 %v8134_v60, %v724_v20  ;;  %v753_v14 = vmul.f32 %v11750_v38, %v8214_v5 }
  0xf5   : > { %v7626_v35 = vpack.c.bf16 %v1363_v2, %v1331_v37  ;;  %v1298_v29 = vmax.f32 %v1042_v32, 0.0  ;;  %4003 = vmatprep.mubr.bf16.mxu0 %v11737_v46  ;;  %v1044_v18 = vadd.f32 %v8250_v57, %v756_v42  ;;  %4056 = vmatprep.mubr.bf16.mxu1 %v11737_v46  ;;  %v1009_v25 = vadd.f32 %v8134_v60, %v721_v53 }
  0xf6   : > { %v723_v39 = vmul.f32 %v11751_v1, %v8248_v41  ;;  %v755_v30 = vmul.f32 %v11751_v1, %v8214_v5  ;;  %v1268_v55 = vmax.f32 %v1012_v33, 0.0  ;;  %v1041_v49 = vadd.f32 %v8250_v57, %v753_v14 }
  0xf7   : > { %4076 = vmatpush1.bf16.msra.mxu0 %v7624_v23  ;;  %v7593_v6 = vpack.c.bf16 %v1298_v29, %v1266_v58  ;;  %v658_v56 = vmul.f32 %v11748_v63, %v8271_v59  ;;  %4129 = vmatpush1.bf16.msra.mxu1 %v7626_v35  ;;  %v1300_v21 = vmax.f32 %v1044_v18, 0.0  ;;  %v1265_v19 = vmax.f32 %v1009_v25, 0.0 }
  0xf8   : > { %v1011_v62 = vadd.f32 %v8134_v60, %v723_v39  ;;  %v1043_v16 = vadd.f32 %v8250_v57, %v755_v30  ;;  %v1297_v48 = vmax.f32 %v1041_v49, 0.0  ;;  %v690_v26 = vmul.f32 %v11748_v63, %v8268_v61 }
  0xf9   : > { %4077 = vmatprep.subr.bf16.mxu0 %v7593_v6  ;;  %v946_v4 = vadd.f32 %v8296_v10, %v658_v56  ;;  %v660_v51 = vmul.f32 %v11749_v24, %v8271_v59  ;;  %v7595_v8 = vpack.c.bf16 %v1300_v21, %v1268_v55  ;;  %7334 = vmatmul.mubr.msk.bf16.gmra.mxu0 %vm3645_vm3, %v8462_v36 }
  0xfa   : > { %v1267_v12 = vmax.f32 %v1011_v62, 0.0  ;;  %v1299_v47 = vmax.f32 %v1043_v16, 0.0  ;;  %v692_v54 = vmul.f32 %v11749_v24, %v8268_v61  ;;  %7337 = vmatmul.mubr.msk.bf16.gmra.mxu1 %vm3645_vm3, %v8462_v36  ;;  %v7592_v37 = vpack.c.bf16 %v1297_v48, %v1265_v19  ;;  %4099 = vmatprep.mubr.bf16.mxu0 %v11737_v46 }
  0xfb   : > { %v978_v2 = vadd.f32 %v8320_v50, %v690_v26  ;;  %v1202_v32 = vmax.f32 %v946_v4, 0.0  ;;  %v948_v20 = vadd.f32 %v8296_v10, %v660_v51  ;;  %4130 = vmatprep.subr.bf16.mxu1 %v7595_v8  ;;  %v657_v58 = vmul.f32 %v11750_v38, %v8271_v59  ;;  %4152 = vmatprep.mubr.bf16.mxu1 %v11737_v46 }
  0xfc   : > { %v7594_v22 = vpack.c.bf16 %v1299_v47, %v1267_v12  ;;  %v980_v23 = vadd.f32 %v8320_v50, %v692_v54  ;;  %v689_v42 = vmul.f32 %v11750_v38, %v8268_v61  ;;  %4078 = vmatpush1.bf16.msra.mxu0 %v7592_v37  ;;  %v659_v29 = vmul.f32 %v11751_v1, %v8271_v59 }
  0xfd   : > { %v1234_v53 = vmax.f32 %v978_v2, 0.0  ;;  %v1204_v35 = vmax.f32 %v948_v20, 0.0  ;;  %v691_v33 = vmul.f32 %v11751_v1, %v8268_v61  ;;  %v945_v18 = vadd.f32 %v8296_v10, %v657_v58 }
  0xfe   : > { %4131 = vmatpush1.bf16.msra.mxu1 %v7594_v22  ;;  %v1236_v14 = vmax.f32 %v980_v23, 0.0  ;;  %v977_v25 = vadd.f32 %v8320_v50, %v689_v42  ;;  %v594_v39 = vmul.f32 %v11748_v63, %v8286_v34  ;;  %v947_v6 = vadd.f32 %v8296_v10, %v659_v29 }
  0xff   : > { %v7561_v30 = vpack.c.bf16 %v1234_v53, %v1202_v32  ;;  %v979_v55 = vadd.f32 %v8320_v50, %v691_v33  ;;  %v626_v49 = vmul.f32 %v11748_v63, %v8339_v40  ;;  %v1201_v21 = vmax.f32 %v945_v18, 0.0  ;;  %v11758_v18 = vld [vmem:[#allocation29_spill] sm:$0xff] }
 0x100   : > { %v7563_v56 = vpack.c.bf16 %v1236_v14, %v1204_v35  ;;  %v1233_v19 = vmax.f32 %v977_v25, 0.0  ;;  %v882_v62 = vadd.f32 %v8314_v44, %v594_v39  ;;  %v1203_v16 = vmax.f32 %v947_v6, 0.0 }
 0x101   : > { %4079 = vmatprep.subr.bf16.mxu0 %v7561_v30  ;;  %v1235_v48 = vmax.f32 %v979_v55, 0.0  ;;  %v914_v26 = vadd.f32 %v8367_v31, %v626_v49  ;;  %v596_v4 = vmul.f32 %v11749_v24, %v8286_v34  ;;  %v628_v12 = vmul.f32 %v11749_v24, %v8339_v40  ;;  %v11760_v30 = vld [vmem:[#allocation26_spill] sm:$0xff] }
 0x102   : > { %4132 = vmatprep.subr.bf16.mxu1 %v7563_v56  ;;  %v7560_v51 = vpack.c.bf16 %v1233_v19, %v1201_v21  ;;  %v1138_v8 = vmax.f32 %v882_v62, 0.0  ;;  %v593_v63 = vmul.f32 %v11750_v38, %v8286_v34  ;;  %v625_v2 = vmul.f32 %v11750_v38, %v8339_v40 }
 0x103   : > { %v7562_v47 = vpack.c.bf16 %v1235_v48, %v1203_v16  ;;  %v1170_v54 = vmax.f32 %v914_v26, 0.0  ;;  %v884_v37 = vadd.f32 %v8314_v44, %v596_v4  ;;  %v916_v32 = vadd.f32 %v8367_v31, %v628_v12 }
 0x104   : > { %4080 = vmatpush1.bf16.msra.mxu0 %v7560_v51  ;;  %v881_v20 = vadd.f32 %v8314_v44, %v593_v63  ;;  %v595_v22 = vmul.f32 %v11751_v1, %v8286_v34  ;;  %v627_v24 = vmul.f32 %v11751_v1, %v8339_v40  ;;  %v913_v42 = vadd.f32 %v8367_v31, %v625_v2 }
 0x105   : > { %4133 = vmatpush1.bf16.msra.mxu1 %v7562_v47  ;;  %v7529_v23 = vpack.c.bf16 %v1170_v54, %v1138_v8  ;;  %v1140_v58 = vmax.f32 %v884_v37, 0.0  ;;  %v7661_v53 = vpack.c.bf16 %v8422_v15, %v8422_v15  ;;  %v1172_v38 = vmax.f32 %v916_v32, 0.0  ;;  %v11762_v8 = vld [vmem:[#allocation31_spill] sm:$0xff]  ;;  %v11763_v47 = vld [vmem:[#allocation32_spill] sm:$0xff] }
 0x106   : > { %v1137_v35 = vmax.f32 %v881_v20, 0.0  ;;  %v883_v29 = vadd.f32 %v8314_v44, %v595_v22  ;;  %v915_v33 = vadd.f32 %v8367_v31, %v627_v24  ;;  %v1169_v14 = vmax.f32 %v913_v42, 0.0 }
 0x107   : > { %4081 = vmatprep.subr.bf16.mxu0 %v7529_v23  ;;  %v11759_v1 = vcombine.high %v11758_v18, %v11758_v18  ;;  %v7662_v39 = vpack.c.bf16 %v8482_v52, %v8482_v52  ;;  %v790_v15 = vmul.f32 %v11760_v30, %v8183_v7  ;;  %v7531_v6 = vpack.c.bf16 %v1172_v38, %v1140_v58  ;;  %v11761_v52 = vld [vmem:[#allocation30_spill] sm:$0xff] }
 0x108   : > { %v1139_v55 = vmax.f32 %v883_v29, 0.0  ;;  %v1171_v49 = vmax.f32 %v915_v33, 0.0  ;;  %v7528_v21 = vpack.c.bf16 %v1169_v14, %v1137_v35  ;;  %v822_v16 = vmul.f32 %v11760_v30, %v8220_v9 }
 0x109   : > { %v2577_v25 = vsel %vm2557_vm0, %v11759_v1, %v8403_v0  ;;  %v3708_v62 = vsel %vm3652_vm2, %v7662_v39, 0  ;;  %4134 = vmatprep.subr.bf16.mxu1 %v7531_v6  ;;  %v1078_v48 = vadd.f32 %v8125_v45, %v790_v15  ;;  %v792_v26 = vmul.f32 %v11761_v52, %v8183_v7 }
 0x10a   : > { %v2610_v56 = vsel %vm2590_vm1, %v2577_v25, 0.0  ;;  %v7530_v0 = vpack.c.bf16 %v1171_v49, %v1139_v55  ;;  %v824_v4 = vmul.f32 %v11761_v52, %v8220_v9  ;;  %4082 = vmatpush1.bf16.msra.mxu0 %v7528_v21  ;;  %v1110_v51 = vadd.f32 %v8164_v27, %v822_v16 }
 0x10b   : > { %v7663_v19 = vpack.c.bf16 %v2610_v56, %v2610_v56  ;;  %v789_v12 = vmul.f32 %v11762_v8, %v8183_v7  ;;  %v821_v63 = vmul.f32 %v11762_v8, %v8220_v9  ;;  %v791_v54 = vmul.f32 %v11763_v47, %v8183_v7  ;;  %7344 = vmatprep.subr.msk.bf16.mxu0 %vm3652_vm2, %v7661_v53 }
 0x10c   : > { %4135 = vmatpush1.bf16.msra.mxu1 %v7530_v0  ;;  %v1334_v37 = vmax.f32 %v1078_v48, 0.0  ;;  %v1080_v2 = vadd.f32 %v8125_v45, %v792_v26  ;;  %v1112_v32 = vadd.f32 %v8164_v27, %v824_v4  ;;  %v823_v20 = vmul.f32 %v11763_v47, %v8220_v9 }
 0x10d   : > { %7347 = vmatprep.subr.msk.bf16.mxu1 %vm3652_vm2, %v7663_v19  ;;  %v1366_v22 = vmax.f32 %v1110_v51, 0.0  ;;  %v1077_v24 = vadd.f32 %v8125_v45, %v789_v12  ;;  %v1109_v23 = vadd.f32 %v8164_v27, %v821_v63  ;;  %v1079_v58 = vadd.f32 %v8125_v45, %v791_v54  ;;  %7339 = vmatmul.mubr.msk.bf16.vlgmr.msra.gmra.mxu0 %vm3645_vm3, %v8392_v28 }
 0x10e   : > { %v1336_v42 = vmax.f32 %v1080_v2, 0.0  ;;  %v1368_v53 = vmax.f32 %v1112_v32, 0.0  ;;  %v1111_v38 = vadd.f32 %v8164_v27, %v823_v20  ;;  %v726_v35 = vmul.f32 %v11760_v30, %v8248_v41  ;;  %4180 = vmatpush1.bf16.msra.mxu0 %v8442_v13  ;;  %4109 = vmatprep.mubr.bf16.mxu0 %v11737_v46 }
 0x10f   : > { %7342 = vmatmul.mubr.msk.bf16.vlgmr.msra.gmra.mxu1 %vm3645_vm3, %v8392_v28  ;;  %v7629_v29 = vpack.c.bf16 %v1366_v22, %v1334_v37  ;;  %v1333_v33 = vmax.f32 %v1077_v24, 0.0  ;;  %v1365_v14 = vmax.f32 %v1109_v23, 0.0  ;;  %v1335_v18 = vmax.f32 %v1079_v58, 0.0 }
 0x110   : > { %4233 = vmatpush1.bf16.msra.mxu1 %v3708_v62  ;;  %v7631_v1 = vpack.c.bf16 %v1368_v53, %v1336_v42  ;;  %v1367_v25 = vmax.f32 %v1111_v38, 0.0  ;;  %v758_v39 = vmul.f32 %v11760_v30, %v8214_v5  ;;  %v1014_v15 = vadd.f32 %v8134_v60, %v726_v35  ;;  %4162 = vmatprep.mubr.bf16.mxu1 %v11737_v46 }
 0x111   : > { %4181 = vmatprep.subr.bf16.mxu0 %v7629_v29  ;;  %v7628_v6 = vpack.c.bf16 %v1365_v14, %v1333_v33  ;;  %v728_v28 = vmul.f32 %v11761_v52, %v8248_v41  ;;  %v760_v13 = vmul.f32 %v11761_v52, %v8214_v5  ;;  %v725_v21 = vmul.f32 %v11762_v8, %v8248_v41 }
 0x112   : > { %4234 = vmatprep.subr.bf16.mxu1 %v7631_v1  ;;  %v7630_v55 = vpack.c.bf16 %v1367_v25, %v1335_v18  ;;  %v1046_v49 = vadd.f32 %v8250_v57, %v758_v39  ;;  %v1270_v56 = vmax.f32 %v1014_v15, 0.0  ;;  %v7848_v19 = vmov 2  }
 0x113   : > { %7722 = vset.pattern.permute.xlu1 %v7848_v19  ;;  %4182 = vmatpush1.bf16.msra.mxu0 %v7628_v6  ;;  %v1016_v62 = vadd.f32 %v8134_v60, %v728_v28  ;;  %v1048_v16 = vadd.f32 %v8250_v57, %v760_v13  ;;  %v757_v0 = vmul.f32 %v11762_v8, %v8214_v5 }
 0x114   : > { %v727_v48 = vmul.f32 %v11763_v47, %v8248_v41  ;;  %4235 = vmatpush1.bf16.msra.mxu1 %v7630_v55  ;;  %v1302_v26 = vmax.f32 %v1046_v49, 0.0  ;;  %v1013_v4 = vadd.f32 %v8134_v60, %v725_v21  ;;  %v759_v51 = vmul.f32 %v11763_v47, %v8214_v5  ;;  %6174 = vperm.xlu1 %7722, %v8450_v17  }
 0x115   : > { %v662_v12 = vmul.f32 %v11760_v30, %v8271_v59  ;;  %v1272_v63 = vmax.f32 %v1016_v62, 0.0  ;;  %v1304_v54 = vmax.f32 %v1048_v16, 0.0  ;;  %v1045_v37 = vadd.f32 %v8250_v57, %v757_v0  ;;  %7723 = vset.pattern.permute.xlu0 %v7848_v19  ;;  %7340 = vmatmul.mubr.msk.bf16.gmra.mxu0 %vm3645_vm3, %v8462_v36 }
 0x116   : > { %v1015_v2 = vadd.f32 %v8134_v60, %v727_v48  ;;  %v7597_v32 = vpack.c.bf16 %v1302_v26, %v1270_v56  ;;  %v1269_v20 = vmax.f32 %v1013_v4, 0.0  ;;  %v1047_v22 = vadd.f32 %v8250_v57, %v759_v51  ;;  %6178 = vperm.xlu0 %7723, %v8635_v3   ;;  %4205 = vmatprep.mubr.bf16.mxu0 %v11737_v46 }
 0x117   : > { %v694_v24 = vmul.f32 %v11760_v30, %v8268_v61  ;;  %v7599_v17 = vpack.c.bf16 %v1304_v54, %v1272_v63  ;;  %7343 = vmatmul.mubr.msk.bf16.gmra.mxu1 %vm3645_vm3, %v8462_v36  ;;  %v1301_v23 = vmax.f32 %v1045_v37, 0.0  ;;  %v950_v42 = vadd.f32 %v8296_v10, %v662_v12 }
 0x118   : > { %v1271_v58 = vmax.f32 %v1015_v2, 0.0  ;;  %4183 = vmatprep.subr.bf16.mxu0 %v7597_v32  ;;  %v1303_v53 = vmax.f32 %v1047_v22, 0.0  ;;  %v664_v35 = vmul.f32 %v11761_v52, %v8271_v59  ;;  %v696_v3 = vmul.f32 %v11761_v52, %v8268_v61  ;;  %4258 = vmatprep.mubr.bf16.mxu1 %v11737_v46  ;;  %v2287_v32 = vld [vmem:[%s7928_s10 + $0x50] sm:$0x77] }
 0x119   : > { %v982_v38 = vadd.f32 %v8320_v50, %v694_v24  ;;  %4236 = vmatprep.subr.bf16.mxu1 %v7599_v17  ;;  %v7596_v36 = vpack.c.bf16 %v1301_v23, %v1269_v20  ;;  %v1206_v29 = vmax.f32 %v950_v42, 0.0  ;;  %v661_v33 = vmul.f32 %v11762_v8, %v8271_v59  ;;  %6182 = vperm.xlu1 %7722, %v8499_v43  }
 0x11a   : > { %v693_v14 = vmul.f32 %v11762_v8, %v8268_v61  ;;  %v7598_v18 = vpack.c.bf16 %v1303_v53, %v1271_v58  ;;  %v952_v25 = vadd.f32 %v8296_v10, %v664_v35  ;;  %v984_v39 = vadd.f32 %v8320_v50, %v696_v3  ;;  %v2288_v53 = vld [vmem:[%s7928_s10 + $0x58] sm:$0x77] }
 0x11b   : > { %v1238_v1 = vmax.f32 %v982_v38, 0.0  ;;  %4184 = vmatpush1.bf16.msra.mxu0 %v7596_v36  ;;  %v949_v15 = vadd.f32 %v8296_v10, %v661_v33  ;;  %v663_v28 = vmul.f32 %v11763_v47, %v8271_v59  ;;  %v695_v13 = vmul.f32 %v11763_v47, %v8268_v61 }
 0x11c   : > { %v981_v6 = vadd.f32 %v8320_v50, %v693_v14  ;;  %4237 = vmatpush1.bf16.msra.mxu1 %v7598_v18  ;;  %v1208_v43 = vmax.f32 %v952_v25, 0.0  ;;  %v1240_v49 = vmax.f32 %v984_v39, 0.0  ;;  %v598_v56 = vmul.f32 %v11760_v30, %v8286_v34  ;;  %v11764_v18 = vld [vmem:[#allocation3_spill] sm:$0xff] }
 0x11d   : > { %v7565_v55 = vpack.c.bf16 %v1238_v1, %v1206_v29  ;;  %v1205_v21 = vmax.f32 %v949_v15, 0.0  ;;  %v951_v62 = vadd.f32 %v8296_v10, %v663_v28  ;;  %v983_v16 = vadd.f32 %v8320_v50, %v695_v13  ;;  %6186 = vperm.xlu1 %7722, %v8602_v11  }
 0x11e   : > { %v1237_v19 = vmax.f32 %v981_v6, 0.0  ;;  %v7567_v0 = vpack.c.bf16 %v1240_v49, %v1208_v43  ;;  %v630_v48 = vmul.f32 %v11760_v30, %v8339_v40  ;;  %v886_v26 = vadd.f32 %v8314_v44, %v598_v56  ;;  %v11765_v49 = vld [vmem:[#allocation33_spill] sm:$0xff] }
 0x11f   : > { %4185 = vmatprep.subr.bf16.mxu0 %v7565_v55  ;;  %v600_v4 = vmul.f32 %v11761_v52, %v8286_v34  ;;  %v1207_v12 = vmax.f32 %v951_v62, 0.0  ;;  %v1239_v63 = vmax.f32 %v983_v16, 0.0  ;;  %v632_v54 = vmul.f32 %v11761_v52, %v8339_v40  ;;  %v11766_v62 = vld [vmem:[#allocation9_spill] sm:$0xff] }
 0x120   : > { %v7564_v51 = vpack.c.bf16 %v1237_v19, %v1205_v21  ;;  %4238 = vmatprep.subr.bf16.mxu1 %v7567_v0  ;;  %v918_v11 = vadd.f32 %v8367_v31, %v630_v48  ;;  %v1142_v37 = vmax.f32 %v886_v26, 0.0  ;;  %v597_v30 = vmul.f32 %v11762_v8, %v8286_v34  ;;  %v7815_v19 = vld [vmem:[%s7975_s18 + $0x10] sm:$0xff] }
 0x121   : > { %v888_v2 = vadd.f32 %v8314_v44, %v600_v4  ;;  %v7566_v20 = vpack.c.bf16 %v1239_v63, %v1207_v12  ;;  %v920_v22 = vadd.f32 %v8367_v31, %v632_v54  ;;  %v629_v24 = vmul.f32 %v11762_v8, %v8339_v40  ;;  %v2298_v8 = vld [vmem:[%s11606_s2 + $0x28] sm:$0xff] }
 0x122   : > { %4186 = vmatpush1.bf16.msra.mxu0 %v7564_v51  ;;  %v599_v52 = vmul.f32 %v11763_v47, %v8286_v34  ;;  %v1174_v17 = vmax.f32 %v918_v11, 0.0  ;;  %v885_v58 = vadd.f32 %v8314_v44, %v597_v30  ;;  %v631_v42 = vmul.f32 %v11763_v47, %v8339_v40 }
 0x123   : > { %v1144_v23 = vmax.f32 %v888_v2, 0.0  ;;  %4239 = vmatpush1.bf16.msra.mxu1 %v7566_v20  ;;  %v1176_v38 = vmax.f32 %v920_v22, 0.0  ;;  %v917_v35 = vadd.f32 %v8367_v31, %v629_v24  ;;  %v2327_v36 = vcombine.high %v2287_v32, %v2287_v32 }
 0x124   : > { %v887_v3 = vadd.f32 %v8314_v44, %v599_v52  ;;  %v7533_v29 = vpack.c.bf16 %v1174_v17, %v1142_v37  ;;  %v1141_v33 = vmax.f32 %v885_v58, 0.0  ;;  %v919_v14 = vadd.f32 %v8367_v31, %v631_v42  ;;  %v8926_v52 = vld [vmem:[%s11607_s3] sm:$0xff]  }
 0x125   : > { %v2449_v1 = vrot.slane %v2298_v8, %v11764_v18  ;;  %v7535_v47 = vpack.c.bf16 %v1176_v38, %v1144_v23  ;;  %v1173_v25 = vmax.f32 %v917_v35, 0.0  ;;  %v2328_v15 = vcombine.high %v2288_v53, %v2288_v53 }
 0x126   : > { %v1143_v39 = vmax.f32 %v887_v3, 0.0  ;;  %4187 = vmatprep.subr.bf16.mxu0 %v7533_v29  ;;  %v1175_v6 = vmax.f32 %v919_v14, 0.0  ;;  %v2442_v13 = vcombine.high %v2298_v8, %v2298_v8  ;;  %v794_v56 = vmul.f32 %v11765_v49, %v8183_v7 }
 0x127   : > { %v2457_v28 = vcombine.high %v2449_v1, %v2449_v1  ;;  %v2513_v55 = vrot.slane %v2449_v1, 5  ;;  %4240 = vmatprep.subr.bf16.mxu1 %v7535_v47  ;;  %v7532_v43 = vpack.c.bf16 %v1173_v25, %v1141_v33  ;;  %v826_v21 = vmul.f32 %v11765_v49, %v8220_v9  ;;  %v11767_v33 = vld [vmem:[#allocation11_spill] sm:$0xff] }
 0x128   : > { %v8910_v16 = vrot.slane %v7815_v19, %v11766_v62  ;;  %v7534_v0 = vpack.c.bf16 %v1175_v6, %v1143_v39  ;;  %v2456_v26 = vrot.slane %v2442_v13, %v11764_v18  ;;  %v1082_v12 = vadd.f32 %v8125_v45, %v794_v56 }
 0x129   : > { %v2514_v48 = vrot.slane %v2457_v28, 5  ;;  %v2578_v4 = vsel %vm2557_vm0, %v2287_v32, %v2513_v55  ;;  %4188 = vmatpush1.bf16.msra.mxu0 %v7532_v43  ;;  %v1114_v63 = vadd.f32 %v8164_v27, %v826_v21  ;;  %v8941_v14 = vrot.slane %v7815_v19, %v11767_v33 }
 0x12a   : > { %v2611_v51 = vsel %vm2590_vm1, %v2578_v4, 0.0  ;;  %v796_v54 = vmul.f32 %v8910_v16, %v8183_v7  ;;  %4241 = vmatpush1.bf16.msra.mxu1 %v7534_v0  ;;  %v2458_v37 = vcombine.high %v2456_v26, %v2456_v26  ;;  %v2515_v30 = vrot.slane %v2456_v26, 5 }
 0x12b   : > { %v2579_v11 = vsel %vm2557_vm0, %v2327_v36, %v2514_v48  ;;  %v7664_v2 = vpack.c.bf16 %v2611_v51, %v2611_v51  ;;  %v1338_v22 = vmax.f32 %v1082_v12, 0.0  ;;  %v1370_v32 = vmax.f32 %v1114_v63, 0.0 }
 0x12c   : > { %v2612_v20 = vsel %vm2590_vm1, %v2579_v11, 0.0  ;;  %v828_v24 = vmul.f32 %v8910_v16, %v8220_v9  ;;  %7345 = vmatmul.mubr.msk.bf16.vlgmr.msra.gmra.mxu0 %vm3645_vm3, %v8926_v52  ;;  %v2516_v23 = vrot.slane %v2458_v37, 5  ;;  %v2580_v42 = vsel %vm2557_vm0, %v2288_v53, %v2515_v30  ;;  %v11768_v53 = vld [vmem:[#allocation12_spill] sm:$0xff] }
 0x12d   : > { %v7665_v17 = vpack.c.bf16 %v2612_v20, %v2612_v20  ;;  %v3714_v58 = vsel %vm3652_vm2, %v7664_v2, 0  ;;  %7348 = vmatmul.mubr.msk.bf16.vlgmr.msra.gmra.mxu1 %vm3645_vm3, %v8926_v52  ;;  %v2613_v38 = vsel %vm2590_vm1, %v2580_v42, 0.0  ;;  %v7633_v35 = vpack.c.bf16 %v1370_v32, %v1338_v22  ;;  %4215 = vmatprep.mubr.bf16.mxu0 %v11737_v46  ;;  %v8976_v20 = vld [vmem:[%s11607_s3 + $0x8] sm:$0xff]  }
 0x12e   : > { %v1084_v3 = vadd.f32 %v8125_v45, %v796_v54  ;;  %v1116_v8 = vadd.f32 %v8164_v27, %v828_v24  ;;  %v2581_v36 = vsel %vm2557_vm0, %v2328_v15, %v2516_v23  ;;  %v7666_v29 = vpack.c.bf16 %v2613_v38, %v2613_v38  ;;  %4268 = vmatprep.mubr.bf16.mxu1 %v11737_v46 }
 0x12f   : > { %7350 = vmatprep.subr.msk.bf16.mxu0 %vm3652_vm2, %v7665_v17  ;;  %v8944_v1 = vrot.slane %v7815_v19, %v11768_v53  ;;  %v2614_v47 = vsel %vm2590_vm1, %v2581_v36, 0.0  ;;  %v730_v6 = vmul.f32 %v11765_v49, %v8248_v41  ;;  %v793_v13 = vmul.f32 %v8941_v14, %v8183_v7 }
 0x130   : > { %4286 = vmatpush1.bf16.msra.mxu0 %v3714_v58  ;;  %v1340_v25 = vmax.f32 %v1084_v3, 0.0  ;;  %v1372_v39 = vmax.f32 %v1116_v8, 0.0  ;;  %v7667_v28 = vpack.c.bf16 %v2614_v47, %v2614_v47  ;;  %v3720_v15 = vsel %vm3652_vm2, %v7666_v29, 0 }
 0x131   : > { %4287 = vmatprep.subr.bf16.mxu0 %v7633_v35  ;;  %v825_v55 = vmul.f32 %v8941_v14, %v8220_v9  ;;  %v795_v56 = vmul.f32 %v8944_v1, %v8183_v7  ;;  %v827_v21 = vmul.f32 %v8944_v1, %v8220_v9  ;;  %v762_v19 = vmul.f32 %v11765_v49, %v8214_v5 }
 0x132   : > { %v7635_v43 = vpack.c.bf16 %v1372_v39, %v1340_v25  ;;  %7353 = vmatprep.subr.msk.bf16.mxu1 %vm3652_vm2, %v7667_v28  ;;  %v1081_v0 = vadd.f32 %v8125_v45, %v793_v13  ;;  %v1018_v26 = vadd.f32 %v8134_v60, %v730_v6  ;;  %v732_v4 = vmul.f32 %v8910_v16, %v8248_v41  ;;  %v6605_v6 = vld [vmem:[%s11609_s5] sm:$0x1] }
 0x133   : > { %v1113_v48 = vadd.f32 %v8164_v27, %v825_v55  ;;  %4339 = vmatpush1.bf16.msra.mxu1 %v3720_v15  ;;  %v1083_v51 = vadd.f32 %v8125_v45, %v795_v56  ;;  %v1115_v12 = vadd.f32 %v8164_v27, %v827_v21  ;;  %v1050_v63 = vadd.f32 %v8250_v57, %v762_v19 }
 0x134   : > { %v764_v54 = vmul.f32 %v8910_v16, %v8214_v5  ;;  %4340 = vmatprep.subr.bf16.mxu1 %v7635_v43  ;;  %v1337_v11 = vmax.f32 %v1081_v0, 0.0  ;;  %v1274_v2 = vmax.f32 %v1018_v26, 0.0  ;;  %v1020_v30 = vadd.f32 %v8134_v60, %v732_v4  ;;  %7346 = vmatmul.mubr.msk.bf16.gmra.mxu0 %vm3645_vm3, %v8976_v20 }
 0x135   : > { %v1369_v37 = vmax.f32 %v1113_v48, 0.0  ;;  %v1339_v22 = vmax.f32 %v1083_v51, 0.0  ;;  %v1371_v32 = vmax.f32 %v1115_v12, 0.0  ;;  %v1306_v24 = vmax.f32 %v1050_v63, 0.0  ;;  %7349 = vmatmul.mubr.msk.bf16.gmra.mxu1 %vm3645_vm3, %v8976_v20  ;;  %4311 = vmatprep.mubr.bf16.mxu0 %v11737_v46 }
 0x136   : > { %v1052_v17 = vadd.f32 %v8250_v57, %v764_v54  ;;  %v1276_v58 = vmax.f32 %v1020_v30, 0.0  ;;  %v729_v42 = vmul.f32 %v8941_v14, %v8248_v41  ;;  %v761_v38 = vmul.f32 %v8941_v14, %v8214_v5  ;;  %4364 = vmatprep.mubr.bf16.mxu1 %v11737_v46 }
 0x137   : > { %v7632_v23 = vpack.c.bf16 %v1369_v37, %v1337_v11  ;;  %v7634_v35 = vpack.c.bf16 %v1371_v32, %v1339_v22  ;;  %v7601_v3 = vpack.c.bf16 %v1306_v24, %v1274_v2  ;;  %v731_v36 = vmul.f32 %v8944_v1, %v8248_v41 }
 0x138   : > { %v1308_v8 = vmax.f32 %v1052_v17, 0.0  ;;  %v1017_v29 = vadd.f32 %v8134_v60, %v729_v42  ;;  %v1049_v47 = vadd.f32 %v8250_v57, %v761_v38  ;;  %v763_v25 = vmul.f32 %v8944_v1, %v8214_v5 }
 0x139   : > { %4288 = vmatpush1.bf16.msra.mxu0 %v7632_v23  ;;  %v666_v39 = vmul.f32 %v11765_v49, %v8271_v59  ;;  %4341 = vmatpush1.bf16.msra.mxu1 %v7634_v35  ;;  %v1019_v15 = vadd.f32 %v8134_v60, %v731_v36  ;;  %v698_v13 = vmul.f32 %v11765_v49, %v8268_v61  ;;  %v7849_v19 = vmov 3  }
 0x13a   : > { %4289 = vmatprep.subr.bf16.mxu0 %v7601_v3  ;;  %v7603_v28 = vpack.c.bf16 %v1308_v8, %v1276_v58  ;;  %v1273_v55 = vmax.f32 %v1017_v29, 0.0  ;;  %v1305_v43 = vmax.f32 %v1049_v47, 0.0  ;;  %v1051_v56 = vadd.f32 %v8250_v57, %v763_v25  ;;  %7724 = vset.pattern.permute.xlu0 %v7849_v19 }
 0x13b   : > { %v954_v21 = vadd.f32 %v8296_v10, %v666_v39  ;;  %v1275_v0 = vmax.f32 %v1019_v15, 0.0  ;;  %v986_v48 = vadd.f32 %v8320_v50, %v698_v13  ;;  %v668_v26 = vmul.f32 %v8910_v16, %v8271_v59  ;;  %6608 = vperm.xlu0 %7724, %v6605_v6  }
 0x13c   : > { %4342 = vmatprep.subr.bf16.mxu1 %v7603_v28  ;;  %v700_v4 = vmul.f32 %v8910_v16, %v8268_v61  ;;  %v7600_v51 = vpack.c.bf16 %v1305_v43, %v1273_v55  ;;  %v1307_v12 = vmax.f32 %v1051_v56, 0.0  ;;  %v665_v54 = vmul.f32 %v8941_v14, %v8271_v59 }
 0x13d   : > { %v1210_v63 = vmax.f32 %v954_v21, 0.0  ;;  %v1242_v11 = vmax.f32 %v986_v48, 0.0  ;;  %v956_v37 = vadd.f32 %v8296_v10, %v668_v26  ;;  %v697_v30 = vmul.f32 %v8941_v14, %v8268_v61  ;;  %v2289_v21 = vld [vmem:[%s7928_s10 + $0x60] sm:$0x77] }
 0x13e   : > { %v988_v2 = vadd.f32 %v8320_v50, %v700_v4  ;;  %4290 = vmatpush1.bf16.msra.mxu0 %v7600_v51  ;;  %v7602_v22 = vpack.c.bf16 %v1307_v12, %v1275_v0  ;;  %v953_v32 = vadd.f32 %v8296_v10, %v665_v54  ;;  %v667_v24 = vmul.f32 %v8944_v1, %v8271_v59 }
 0x13f   : > { %v699_v17 = vmul.f32 %v8944_v1, %v8268_v61  ;;  %v7569_v23 = vpack.c.bf16 %v1242_v11, %v1210_v63  ;;  %v1212_v58 = vmax.f32 %v956_v37, 0.0  ;;  %v985_v38 = vadd.f32 %v8320_v50, %v697_v30  ;;  %v2290_v63 = vld [vmem:[%s7928_s10 + $0x68] sm:$0x77]  ;;  %v9052_v30 = vld [vmem:[%s7975_s18 + $0x18] sm:$0xff] }
 0x140   : > { %v1244_v42 = vmax.f32 %v988_v2, 0.0  ;;  %4343 = vmatpush1.bf16.msra.mxu1 %v7602_v22  ;;  %v1209_v35 = vmax.f32 %v953_v32, 0.0  ;;  %v955_v3 = vadd.f32 %v8296_v10, %v667_v24  ;;  %v602_v36 = vmul.f32 %v11765_v49, %v8286_v34 }
 0x141   : > { %v987_v8 = vadd.f32 %v8320_v50, %v699_v17  ;;  %4291 = vmatprep.subr.bf16.mxu0 %v7569_v23  ;;  %v1241_v47 = vmax.f32 %v985_v38, 0.0  ;;  %v634_v25 = vmul.f32 %v11765_v49, %v8339_v40  ;;  %v604_v39 = vmul.f32 %v8910_v16, %v8286_v34 }
 0x142   : > { %v7571_v29 = vpack.c.bf16 %v1244_v42, %v1212_v58  ;;  %v1211_v6 = vmax.f32 %v955_v3, 0.0  ;;  %v890_v15 = vadd.f32 %v8314_v44, %v602_v36  ;;  %v636_v13 = vmul.f32 %v8910_v16, %v8339_v40 }
 0x143   : > { %v1243_v28 = vmax.f32 %v987_v8, 0.0  ;;  %v7568_v55 = vpack.c.bf16 %v1241_v47, %v1209_v35  ;;  %v922_v43 = vadd.f32 %v8367_v31, %v634_v25  ;;  %v892_v56 = vadd.f32 %v8314_v44, %v604_v39  ;;  %v11769_v47 = vld [vmem:[#allocation4_spill] sm:$0xff]  ;;  %v11770_v39 = vld [vmem:[#allocation5_spill] sm:$0xff] }
 0x144   : > { %4344 = vmatprep.subr.bf16.mxu1 %v7571_v29  ;;  %v601_v49 = vmul.f32 %v8941_v14, %v8286_v34  ;;  %v1146_v0 = vmax.f32 %v890_v15, 0.0  ;;  %v924_v48 = vadd.f32 %v8367_v31, %v636_v13  ;;  %v633_v26 = vmul.f32 %v8941_v14, %v8339_v40  ;;  %v2299_v14 = vld [vmem:[%s11606_s2 + $0x30] sm:$0xff] }
 0x145   : > { %v7570_v19 = vpack.c.bf16 %v1243_v28, %v1211_v6  ;;  %4292 = vmatpush1.bf16.msra.mxu0 %v7568_v55  ;;  %v1178_v16 = vmax.f32 %v922_v43, 0.0  ;;  %v1148_v4 = vmax.f32 %v892_v56, 0.0  ;;  %v603_v12 = vmul.f32 %v8944_v1, %v8286_v34  ;;  %v11771_v55 = vld [vmem:[#allocation6_spill] sm:$0xff] }
 0x146   : > { %v889_v51 = vadd.f32 %v8314_v44, %v601_v49  ;;  %v1180_v54 = vmax.f32 %v924_v48, 0.0  ;;  %v921_v11 = vadd.f32 %v8367_v31, %v633_v26  ;;  %v635_v37 = vmul.f32 %v8944_v1, %v8339_v40 }
 0x147   : > { %4345 = vmatpush1.bf16.msra.mxu1 %v7570_v19  ;;  %v2329_v2 = vcombine.high %v2289_v21, %v2289_v21  ;;  %v7537_v22 = vpack.c.bf16 %v1178_v16, %v1146_v0  ;;  %v891_v24 = vadd.f32 %v8314_v44, %v603_v12  ;;  %v2466_v17 = vrot.slane %v2299_v14, %v11764_v18 }
 0x148   : > { %v1145_v32 = vmax.f32 %v889_v51, 0.0  ;;  %v7539_v23 = vpack.c.bf16 %v1180_v54, %v1148_v4  ;;  %v1177_v58 = vmax.f32 %v921_v11, 0.0  ;;  %v923_v42 = vadd.f32 %v8367_v31, %v635_v37 }
 0x149   : > { %v2330_v38 = vcombine.high %v2290_v63, %v2290_v63  ;;  %4293 = vmatprep.subr.bf16.mxu0 %v7537_v22  ;;  %v1147_v1 = vmax.f32 %v891_v24, 0.0  ;;  %v2474_v35 = vcombine.high %v2466_v17, %v2466_v17  ;;  %v2459_v3 = vcombine.high %v2299_v14, %v2299_v14 }
 0x14a   : > { %v2517_v8 = vrot.slane %v2466_v17, 5  ;;  %4346 = vmatprep.subr.bf16.mxu1 %v7539_v23  ;;  %v7536_v36 = vpack.c.bf16 %v1177_v58, %v1145_v32  ;;  %v1179_v29 = vmax.f32 %v923_v42, 0.0  ;;  %v9059_v25 = vrot.slane %v9052_v30, %v11769_v47 }
 0x14b   : > { %v9063_v6 = vrot.slane %v9052_v30, %v11770_v39  ;;  %v2518_v28 = vrot.slane %v2474_v35, 5  ;;  %v2473_v15 = vrot.slane %v2459_v3, %v11764_v18  ;;  %v9069_v43 = vrot.slane %v9052_v30, %v11771_v55 }
 0x14c   : > { %v2582_v13 = vsel %vm2557_vm0, %v2289_v21, %v2517_v8  ;;  %4294 = vmatpush1.bf16.msra.mxu0 %v7536_v36  ;;  %v7538_v56 = vpack.c.bf16 %v1179_v29, %v1147_v1  ;;  %v798_v19 = vmul.f32 %v9059_v25, %v8183_v7  ;;  %v830_v0 = vmul.f32 %v9059_v25, %v8220_v9 }
 0x14d   : > { %v2615_v49 = vsel %vm2590_vm1, %v2582_v13, 0.0  ;;  %v2583_v48 = vsel %vm2557_vm0, %v2329_v2, %v2518_v28  ;;  %v2475_v26 = vcombine.high %v2473_v15, %v2473_v15  ;;  %v2519_v4 = vrot.slane %v2473_v15, 5  ;;  %v11772_v28 = vld [vmem:[#allocation7_spill] sm:$0xff] }
 0x14e   : > { %v7668_v16 = vpack.c.bf16 %v2615_v49, %v2615_v49  ;;  %4347 = vmatpush1.bf16.msra.mxu1 %v7538_v56  ;;  %v2616_v21 = vsel %vm2590_vm1, %v2583_v48, 0.0  ;;  %v1086_v51 = vadd.f32 %v8125_v45, %v798_v19  ;;  %v1118_v12 = vadd.f32 %v8164_v27, %v830_v0 }
 0x14f   : > { %v800_v54 = vmul.f32 %v9063_v6, %v8183_v7  ;;  %7351 = vmatmul.mubr.msk.bf16.vlgmr.msra.gmra.mxu0 %vm3645_vm3, %v8926_v52  ;;  %v7669_v11 = vpack.c.bf16 %v2616_v21, %v2616_v21  ;;  %v2520_v37 = vrot.slane %v2475_v26, 5  ;;  %v2584_v2 = vsel %vm2557_vm0, %v2290_v63, %v2519_v4 }
 0x150   : > { %v3726_v14 = vsel %vm3652_vm2, %v7668_v16, 0  ;;  %v2617_v22 = vsel %vm2590_vm1, %v2584_v2, 0.0  ;;  %v1342_v32 = vmax.f32 %v1086_v51, 0.0  ;;  %v1374_v24 = vmax.f32 %v1118_v12, 0.0  ;;  %4321 = vmatprep.mubr.bf16.mxu0 %v11737_v46 }
 0x151   : > { %v832_v17 = vmul.f32 %v9063_v6, %v8220_v9  ;;  %7354 = vmatmul.mubr.msk.bf16.vlgmr.msra.gmra.mxu1 %vm3645_vm3, %v8926_v52  ;;  %7356 = vmatprep.subr.msk.bf16.mxu0 %vm3652_vm2, %v7669_v11  ;;  %v2585_v23 = vsel %vm2557_vm0, %v2330_v38, %v2520_v37  ;;  %v7670_v58 = vpack.c.bf16 %v2617_v22, %v2617_v22 }
 0x152   : > { %v1088_v42 = vadd.f32 %v8125_v45, %v800_v54  ;;  %v2618_v63 = vsel %vm2590_vm1, %v2585_v23, 0.0  ;;  %4392 = vmatpush1.bf16.msra.mxu0 %v3726_v14  ;;  %v7637_v1 = vpack.c.bf16 %v1374_v24, %v1342_v32  ;;  %v797_v3 = vmul.f32 %v9069_v43, %v8183_v7  ;;  %4374 = vmatprep.mubr.bf16.mxu1 %v11737_v46 }
 0x153   : > { %v1120_v35 = vadd.f32 %v8164_v27, %v832_v17  ;;  %v7671_v8 = vpack.c.bf16 %v2618_v63, %v2618_v63  ;;  %v3732_v36 = vsel %vm3652_vm2, %v7670_v58, 0  ;;  %v829_v38 = vmul.f32 %v9069_v43, %v8220_v9 }
 0x154   : > { %v1344_v29 = vmax.f32 %v1088_v42, 0.0  ;;  %4393 = vmatprep.subr.bf16.mxu0 %v7637_v1  ;;  %v1085_v39 = vadd.f32 %v8125_v45, %v797_v3  ;;  %v9106_v15 = vrot.slane %v9052_v30, %v11772_v28  ;;  %v734_v13 = vmul.f32 %v9059_v25, %v8248_v41 }
 0x155   : > { %v1376_v47 = vmax.f32 %v1120_v35, 0.0  ;;  %7359 = vmatprep.subr.msk.bf16.mxu1 %vm3652_vm2, %v7671_v8  ;;  %v1117_v55 = vadd.f32 %v8164_v27, %v829_v38  ;;  %v766_v56 = vmul.f32 %v9059_v25, %v8214_v5  ;;  %v736_v49 = vmul.f32 %v9063_v6, %v8248_v41 }
 0x156   : > { %v768_v19 = vmul.f32 %v9063_v6, %v8214_v5  ;;  %4445 = vmatpush1.bf16.msra.mxu1 %v3732_v36  ;;  %v1341_v48 = vmax.f32 %v1085_v39, 0.0  ;;  %v799_v26 = vmul.f32 %v9106_v15, %v8183_v7  ;;  %v831_v16 = vmul.f32 %v9106_v15, %v8220_v9 }
 0x157   : > { %v7639_v0 = vpack.c.bf16 %v1376_v47, %v1344_v29  ;;  %v1373_v4 = vmax.f32 %v1117_v55, 0.0  ;;  %v1022_v21 = vadd.f32 %v8134_v60, %v734_v13  ;;  %v1054_v51 = vadd.f32 %v8250_v57, %v766_v56  ;;  %7352 = vmatmul.mubr.msk.bf16.gmra.mxu0 %vm3645_vm3, %v8976_v20 }
 0x158   : > { %v1024_v12 = vadd.f32 %v8134_v60, %v736_v49  ;;  %v1087_v54 = vadd.f32 %v8125_v45, %v799_v26  ;;  %v1119_v11 = vadd.f32 %v8164_v27, %v831_v16  ;;  %v1056_v37 = vadd.f32 %v8250_v57, %v768_v19  ;;  %4417 = vmatprep.mubr.bf16.mxu0 %v11737_v46 }
 0x159   : > { %4446 = vmatprep.subr.bf16.mxu1 %v7639_v0  ;;  %v733_v14 = vmul.f32 %v9069_v43, %v8248_v41  ;;  %v7636_v2 = vpack.c.bf16 %v1373_v4, %v1341_v48  ;;  %v1278_v22 = vmax.f32 %v1022_v21, 0.0  ;;  %v1310_v32 = vmax.f32 %v1054_v51, 0.0  ;;  %7355 = vmatmul.mubr.msk.bf16.gmra.mxu1 %vm3645_vm3, %v8976_v20 }
 0x15a   : > { %v1280_v24 = vmax.f32 %v1024_v12, 0.0  ;;  %v1343_v17 = vmax.f32 %v1087_v54, 0.0  ;;  %v1375_v23 = vmax.f32 %v1119_v11, 0.0  ;;  %v1312_v58 = vmax.f32 %v1056_v37, 0.0  ;;  %4470 = vmatprep.mubr.bf16.mxu1 %v11737_v46 }
 0x15b   : > { %v765_v42 = vmul.f32 %v9069_v43, %v8214_v5  ;;  %4394 = vmatpush1.bf16.msra.mxu0 %v7636_v2  ;;  %v7605_v63 = vpack.c.bf16 %v1310_v32, %v1278_v22  ;;  %v1021_v1 = vadd.f32 %v8134_v60, %v733_v14  ;;  %v735_v35 = vmul.f32 %v9106_v15, %v8248_v41 }
 0x15c   : > { %v767_v3 = vmul.f32 %v9106_v15, %v8214_v5  ;;  %v7638_v8 = vpack.c.bf16 %v1375_v23, %v1343_v17  ;;  %v7607_v36 = vpack.c.bf16 %v1312_v58, %v1280_v24  ;;  %v670_v38 = vmul.f32 %v9059_v25, %v8271_v59 }
 0x15d   : > { %v1053_v29 = vadd.f32 %v8250_v57, %v765_v42  ;;  %4395 = vmatprep.subr.bf16.mxu0 %v7605_v63  ;;  %v1277_v47 = vmax.f32 %v1021_v1, 0.0  ;;  %v1023_v39 = vadd.f32 %v8134_v60, %v735_v35  ;;  %v702_v13 = vmul.f32 %v9059_v25, %v8268_v61 }
 0x15e   : > { %v1055_v28 = vadd.f32 %v8250_v57, %v767_v3  ;;  %4447 = vmatpush1.bf16.msra.mxu1 %v7638_v8  ;;  %v958_v56 = vadd.f32 %v8296_v10, %v670_v38  ;;  %v672_v49 = vmul.f32 %v9063_v6, %v8271_v59  ;;  %v704_v19 = vmul.f32 %v9063_v6, %v8268_v61 }
 0x15f   : > { %v1309_v55 = vmax.f32 %v1053_v29, 0.0  ;;  %4448 = vmatprep.subr.bf16.mxu1 %v7607_v36  ;;  %v1279_v0 = vmax.f32 %v1023_v39, 0.0  ;;  %v990_v26 = vadd.f32 %v8320_v50, %v702_v13  ;;  %v669_v16 = vmul.f32 %v9069_v43, %v8271_v59 }
 0x160   : > { %v1311_v48 = vmax.f32 %v1055_v28, 0.0  ;;  %v1214_v21 = vmax.f32 %v958_v56, 0.0  ;;  %v960_v51 = vadd.f32 %v8296_v10, %v672_v49  ;;  %v992_v12 = vadd.f32 %v8320_v50, %v704_v19  ;;  %v2291_v19 = vld [vmem:[%s7928_s10 + $0x70] sm:$0x77] }
 0x161   : > { %v7604_v4 = vpack.c.bf16 %v1309_v55, %v1277_v47  ;;  %v1246_v11 = vmax.f32 %v990_v26, 0.0  ;;  %v701_v37 = vmul.f32 %v9069_v43, %v8268_v61  ;;  %v957_v14 = vadd.f32 %v8296_v10, %v669_v16 }
 0x162   : > { %v7606_v54 = vpack.c.bf16 %v1311_v48, %v1279_v0  ;;  %v1216_v2 = vmax.f32 %v960_v51, 0.0  ;;  %v1248_v22 = vmax.f32 %v992_v12, 0.0  ;;  %v671_v32 = vmul.f32 %v9106_v15, %v8271_v59  ;;  %v2300_v12 = vld [vmem:[%s11606_s2 + $0x38] sm:$0xff] }
 0x163   : > { %4396 = vmatpush1.bf16.msra.mxu0 %v7604_v4  ;;  %v703_v24 = vmul.f32 %v9106_v15, %v8268_v61  ;;  %v7573_v17 = vpack.c.bf16 %v1246_v11, %v1214_v21  ;;  %v989_v23 = vadd.f32 %v8320_v50, %v701_v37  ;;  %v1213_v58 = vmax.f32 %v957_v14, 0.0 }
 0x164   : > { %4449 = vmatpush1.bf16.msra.mxu1 %v7606_v54  ;;  %v606_v42 = vmul.f32 %v9059_v25, %v8286_v34  ;;  %v7575_v63 = vpack.c.bf16 %v1248_v22, %v1216_v2  ;;  %v959_v1 = vadd.f32 %v8296_v10, %v671_v32  ;;  %v638_v3 = vmul.f32 %v9059_v25, %v8339_v40  ;;  %v2292_v54 = vld [vmem:[%s7928_s10 + $0x78] sm:$0x77] }
 0x165   : > { %v991_v35 = vadd.f32 %v8320_v50, %v703_v24  ;;  %4397 = vmatprep.subr.bf16.mxu0 %v7573_v17  ;;  %v1245_v8 = vmax.f32 %v989_v23, 0.0  ;;  %v608_v29 = vmul.f32 %v9063_v6, %v8286_v34  ;;  %v640_v38 = vmul.f32 %v9063_v6, %v8339_v40 }
 0x166   : > { %v894_v36 = vadd.f32 %v8314_v44, %v606_v42  ;;  %4450 = vmatprep.subr.bf16.mxu1 %v7575_v63  ;;  %v1215_v47 = vmax.f32 %v959_v1, 0.0  ;;  %v926_v28 = vadd.f32 %v8367_v31, %v638_v3  ;;  %v605_v13 = vmul.f32 %v9069_v43, %v8286_v34 }
 0x167   : > { %v1247_v39 = vmax.f32 %v991_v35, 0.0  ;;  %v7572_v25 = vpack.c.bf16 %v1245_v8, %v1213_v58  ;;  %v896_v56 = vadd.f32 %v8314_v44, %v608_v29  ;;  %v928_v49 = vadd.f32 %v8367_v31, %v640_v38  ;;  %v11773_v58 = vld [vmem:[#allocation8_spill] sm:$0xff] }
 0x168   : > { %v1150_v55 = vmax.f32 %v894_v36, 0.0  ;;  %v1182_v48 = vmax.f32 %v926_v28, 0.0  ;;  %v637_v6 = vmul.f32 %v9069_v43, %v8339_v40  ;;  %v893_v26 = vadd.f32 %v8314_v44, %v605_v13 }
 0x169   : > { %v7574_v0 = vpack.c.bf16 %v1247_v39, %v1215_v47  ;;  %4398 = vmatpush1.bf16.msra.mxu0 %v7572_v25  ;;  %v1152_v16 = vmax.f32 %v896_v56, 0.0  ;;  %v1184_v4 = vmax.f32 %v928_v49, 0.0  ;;  %v607_v21 = vmul.f32 %v9106_v15, %v8286_v34 }
 0x16a   : > { %v639_v51 = vmul.f32 %v9106_v15, %v8339_v40  ;;  %v7541_v11 = vpack.c.bf16 %v1182_v48, %v1150_v55  ;;  %v925_v43 = vadd.f32 %v8367_v31, %v637_v6  ;;  %v1149_v37 = vmax.f32 %v893_v26, 0.0 }
 0x16b   : > { %4451 = vmatpush1.bf16.msra.mxu1 %v7574_v0  ;;  %v2331_v14 = vcombine.high %v2291_v19, %v2291_v19  ;;  %v7543_v2 = vpack.c.bf16 %v1184_v4, %v1152_v16  ;;  %v895_v22 = vadd.f32 %v8314_v44, %v607_v21  ;;  %v2483_v24 = vrot.slane %v2300_v12, %v11764_v18 }
 0x16c   : > { %v927_v32 = vadd.f32 %v8367_v31, %v639_v51  ;;  %4399 = vmatprep.subr.bf16.mxu0 %v7541_v11  ;;  %v1181_v15 = vmax.f32 %v925_v43, 0.0  ;;  %v2332_v17 = vcombine.high %v2292_v54, %v2292_v54  ;;  %v2476_v23 = vcombine.high %v2300_v12, %v2300_v12 }
 0x16d   : > { %v9202_v42 = vrot.slane %v9052_v30, %v11773_v58  ;;  %4452 = vmatprep.subr.bf16.mxu1 %v7543_v2  ;;  %v1151_v63 = vmax.f32 %v895_v22, 0.0  ;;  %v2491_v35 = vcombine.high %v2483_v24, %v2483_v24  ;;  %v2521_v3 = vrot.slane %v2483_v24, 5 }
 0x16e   : > { %v1183_v1 = vmax.f32 %v927_v32, 0.0  ;;  %v7540_v8 = vpack.c.bf16 %v1181_v15, %v1149_v37  ;;  %v2490_v36 = vrot.slane %v2476_v23, %v11764_v18  ;;  %v9212_v13 = vrot.slane %v9052_v30, %v11766_v62 }
 0x16f   : > { %v802_v29 = vmul.f32 %v9202_v42, %v8183_v7  ;;  %v834_v38 = vmul.f32 %v9202_v42, %v8220_v9  ;;  %v2522_v39 = vrot.slane %v2491_v35, 5  ;;  %v2586_v28 = vsel %vm2557_vm0, %v2291_v19, %v2521_v3 }
 0x170   : > { %v7542_v47 = vpack.c.bf16 %v1183_v1, %v1151_v63  ;;  %4400 = vmatpush1.bf16.msra.mxu0 %v7540_v8  ;;  %v2492_v25 = vcombine.high %v2490_v36, %v2490_v36  ;;  %v2619_v55 = vsel %vm2590_vm1, %v2586_v28, 0.0  ;;  %v2523_v56 = vrot.slane %v2490_v36, 5 }
 0x171   : > { %v1090_v18 = vadd.f32 %v8125_v45, %v802_v29  ;;  %v2587_v49 = vsel %vm2557_vm0, %v2331_v14, %v2522_v39  ;;  %v7672_v0 = vpack.c.bf16 %v2619_v55, %v2619_v55  ;;  %v1122_v48 = vadd.f32 %v8164_v27, %v834_v38 }
 0x172   : > { %4453 = vmatpush1.bf16.msra.mxu1 %v7542_v47  ;;  %v804_v19 = vmul.f32 %v9212_v13, %v8183_v7  ;;  %v2620_v6 = vsel %vm2590_vm1, %v2587_v49, 0.0  ;;  %v2524_v62 = vrot.slane %v2492_v25, 5  ;;  %v2588_v26 = vsel %vm2557_vm0, %v2292_v54, %v2523_v56 }
 0x173   : > { %v1346_v16 = vmax.f32 %v1090_v18, 0.0  ;;  %7357 = vmatmul.mubr.msk.bf16.vlgmr.msra.gmra.mxu0 %vm3645_vm3, %v8926_v52  ;;  %v7673_v4 = vpack.c.bf16 %v2620_v6, %v2620_v6  ;;  %v3738_v21 = vsel %vm3652_vm2, %v7672_v0, 0  ;;  %v2621_v51 = vsel %vm2590_vm1, %v2588_v26, 0.0 }
 0x174   : > { %v1378_v12 = vmax.f32 %v1122_v48, 0.0  ;;  %v2589_v11 = vsel %vm2557_vm0, %v2332_v17, %v2524_v62  ;;  %v7674_v43 = vpack.c.bf16 %v2621_v51, %v2621_v51  ;;  %v836_v37 = vmul.f32 %v9212_v13, %v8220_v9  ;;  %4427 = vmatprep.mubr.bf16.mxu0 %v11737_v46 }
 0x175   : > { %7360 = vmatmul.mubr.msk.bf16.vlgmr.msra.gmra.mxu1 %vm3645_vm3, %v8926_v52  ;;  %v1092_v54 = vadd.f32 %v8125_v45, %v804_v19  ;;  %7362 = vmatprep.subr.msk.bf16.mxu0 %vm3652_vm2, %v7673_v4  ;;  %v2622_v14 = vsel %vm2590_vm1, %v2589_v11, 0.0  ;;  %v9236_v22 = vrot.slane %v9052_v30, %v11767_v33  ;;  %v9240_v52 = vrot.slane %v9052_v30, %v11768_v53 }
 0x176   : > { %v7641_v2 = vpack.c.bf16 %v1378_v12, %v1346_v16  ;;  %v7675_v32 = vpack.c.bf16 %v2622_v14, %v2622_v14  ;;  %4498 = vmatpush1.bf16.msra.mxu0 %v3738_v21  ;;  %v3744_v24 = vsel %vm3652_vm2, %v7674_v43, 0  ;;  %v1124_v15 = vadd.f32 %v8164_v27, %v836_v37  ;;  %4480 = vmatprep.mubr.bf16.mxu1 %v11737_v46 }
 0x177   : > { %v1348_v17 = vmax.f32 %v1092_v54, 0.0  ;;  %v801_v33 = vmul.f32 %v9236_v22, %v8183_v7  ;;  %v833_v23 = vmul.f32 %v9236_v22, %v8220_v9  ;;  %v803_v53 = vmul.f32 %v9240_v52, %v8183_v7 }
 0x178   : > { %4499 = vmatprep.subr.bf16.mxu0 %v7641_v2  ;;  %v835_v30 = vmul.f32 %v9240_v52, %v8220_v9  ;;  %7365 = vmatprep.subr.msk.bf16.mxu1 %vm3652_vm2, %v7675_v32  ;;  %v1380_v58 = vmax.f32 %v1124_v15, 0.0  ;;  %v738_v63 = vmul.f32 %v9202_v42, %v8248_v41  ;;  %v770_v1 = vmul.f32 %v9202_v42, %v8214_v5 }
 0x179   : > { %v740_v35 = vmul.f32 %v9212_v13, %v8248_v41  ;;  %4551 = vmatpush1.bf16.msra.mxu1 %v3744_v24  ;;  %v1089_v3 = vadd.f32 %v8125_v45, %v801_v33  ;;  %v1121_v7 = vadd.f32 %v8164_v27, %v833_v23  ;;  %v1091_v8 = vadd.f32 %v8125_v45, %v803_v53 }
 0x17a   : > { %v1123_v9 = vadd.f32 %v8164_v27, %v835_v30  ;;  %v7643_v36 = vpack.c.bf16 %v1380_v58, %v1348_v17  ;;  %v1026_v29 = vadd.f32 %v8134_v60, %v738_v63  ;;  %v1058_v38 = vadd.f32 %v8250_v57, %v770_v1 }
 0x17b   : > { %v772_v47 = vmul.f32 %v9212_v13, %v8214_v5  ;;  %v1345_v39 = vmax.f32 %v1089_v3, 0.0  ;;  %v1377_v28 = vmax.f32 %v1121_v7, 0.0  ;;  %v1347_v25 = vmax.f32 %v1091_v8, 0.0  ;;  %7358 = vmatmul.mubr.msk.bf16.gmra.mxu0 %vm3645_vm3, %v8976_v20 }
 0x17c   : > { %v1379_v55 = vmax.f32 %v1123_v9, 0.0  ;;  %4552 = vmatprep.subr.bf16.mxu1 %v7643_v36  ;;  %v1282_v56 = vmax.f32 %v1026_v29, 0.0  ;;  %v1314_v45 = vmax.f32 %v1058_v38, 0.0  ;;  %v1028_v27 = vadd.f32 %v8134_v60, %v740_v35  ;;  %4523 = vmatprep.mubr.bf16.mxu0 %v11737_v46 }
 0x17d   : > { %v1060_v18 = vadd.f32 %v8250_v57, %v772_v47  ;;  %7361 = vmatmul.mubr.msk.bf16.gmra.mxu1 %vm3645_vm3, %v8976_v20  ;;  %v7640_v49 = vpack.c.bf16 %v1377_v28, %v1345_v39  ;;  %v737_v48 = vmul.f32 %v9236_v22, %v8248_v41  ;;  %v769_v19 = vmul.f32 %v9236_v22, %v8214_v5 }
 0x17e   : > { %v7642_v0 = vpack.c.bf16 %v1379_v55, %v1347_v25  ;;  %v7609_v6 = vpack.c.bf16 %v1314_v45, %v1282_v56  ;;  %v1284_v62 = vmax.f32 %v1028_v27, 0.0  ;;  %v739_v16 = vmul.f32 %v9240_v52, %v8248_v41  ;;  %4576 = vmatprep.mubr.bf16.mxu1 %v11737_v46 }
 0x17f   : > { %v1316_v26 = vmax.f32 %v1060_v18, 0.0  ;;  %4500 = vmatpush1.bf16.msra.mxu0 %v7640_v49  ;;  %v1025_v20 = vadd.f32 %v8134_v60, %v737_v48  ;;  %v1057_v4 = vadd.f32 %v8250_v57, %v769_v19  ;;  %v771_v21 = vmul.f32 %v9240_v52, %v8214_v5  ;;  %v9295_v2 = vpop.f32.mrf.mxu0  ;;  %v9297_v5 = vpop.f32.mrf.mxu1 }
 0x180   : > { %4553 = vmatpush1.bf16.msra.mxu1 %v7642_v0  ;;  %4501 = vmatprep.subr.bf16.mxu0 %v7609_v6  ;;  %v1027_v12 = vadd.f32 %v8134_v60, %v739_v16  ;;  %v674_v11 = vmul.f32 %v9202_v42, %v8271_v59  ;;  %v706_v41 = vmul.f32 %v9202_v42, %v8268_v61 }
 0x181   : > { %v7611_v51 = vpack.c.bf16 %v1316_v26, %v1284_v62  ;;  %v1281_v43 = vmax.f32 %v1025_v20, 0.0  ;;  %v1313_v37 = vmax.f32 %v1057_v4, 0.0  ;;  %v1059_v54 = vadd.f32 %v8250_v57, %v771_v21  ;;  %v9306_v53 = vpop.f32.mrf.mxu0  ;;  %v9308_v30 = vpop.f32.mrf.mxu1 }
 0x182   : > { %v676_v14 = vmul.f32 %v9212_v13, %v8271_v59  ;;  %v1283_v32 = vmax.f32 %v1027_v12, 0.0  ;;  %v962_v60 = vadd.f32 %v8296_v10, %v674_v11  ;;  %v994_v24 = vadd.f32 %v8320_v50, %v706_v41 }
 0x183   : > { %4554 = vmatprep.subr.bf16.mxu1 %v7611_v51  ;;  %v708_v15 = vmul.f32 %v9212_v13, %v8268_v61  ;;  %v7608_v17 = vpack.c.bf16 %v1313_v37, %v1281_v43  ;;  %v1315_v33 = vmax.f32 %v1059_v54, 0.0  ;;  %v673_v23 = vmul.f32 %v9236_v22, %v8271_v59  ;;  %v9316_v36 = vpop.f32.mrf.mxu0  ;;  %v9318_v29 = vpop.f32.mrf.mxu1 }
 0x184   : > { %v964_v57 = vadd.f32 %v8296_v10, %v676_v14  ;;  %v1218_v58 = vmax.f32 %v962_v60, 0.0  ;;  %v1250_v63 = vmax.f32 %v994_v24, 0.0  ;;  %v705_v35 = vmul.f32 %v9236_v22, %v8268_v61 }
 0x185   : > { %v996_v1 = vadd.f32 %v8320_v50, %v708_v15  ;;  %4502 = vmatpush1.bf16.msra.mxu0 %v7608_v17  ;;  %v7610_v3 = vpack.c.bf16 %v1315_v33, %v1283_v32  ;;  %v961_v8 = vadd.f32 %v8296_v10, %v673_v23  ;;  %v675_v9 = vmul.f32 %v9240_v52, %v8271_v59  ;;  %v9328_v45 = vpop.f32.mrf.mxu0  ;;  %v9330_v27 = vpop.f32.mrf.mxu1 }
 0x186   : > { %v1220_v7 = vmax.f32 %v964_v57, 0.0  ;;  %v7577_v38 = vpack.c.bf16 %v1250_v63, %v1218_v58  ;;  %v993_v39 = vadd.f32 %v8320_v50, %v705_v35  ;;  %v707_v28 = vmul.f32 %v9240_v52, %v8268_v61 }
 0x187   : > { %v1252_v47 = vmax.f32 %v996_v1, 0.0  ;;  %4555 = vmatpush1.bf16.msra.mxu1 %v7610_v3  ;;  %v1217_v25 = vmax.f32 %v961_v8, 0.0  ;;  %v963_v55 = vadd.f32 %v8296_v10, %v675_v9  ;;  %v610_v56 = vmul.f32 %v9202_v42, %v8286_v34  ;;  %v9339_v6 = vpop.f32.mrf.mxu0  ;;  %v9344_v20 = vpop.f32.mrf.mxu1 }
 0x188   : > { %v642_v59 = vmul.f32 %v9202_v42, %v8339_v40  ;;  %4503 = vmatprep.subr.bf16.mxu0 %v7577_v38  ;;  %v1249_v49 = vmax.f32 %v993_v39, 0.0  ;;  %v995_v0 = vadd.f32 %v8320_v50, %v707_v28  ;;  %v612_v61 = vmul.f32 %v9212_v13, %v8286_v34 }
 0x189   : > { %v7579_v18 = vpack.c.bf16 %v1252_v47, %v1220_v7  ;;  %v1219_v48 = vmax.f32 %v963_v55, 0.0  ;;  %v898_v10 = vadd.f32 %v8314_v44, %v610_v56  ;;  %v644_v42 = vmul.f32 %v9212_v13, %v8339_v40  ;;  %v9355_v60 = vpop.f32.mrf.mxu0 }
 0x18a   : > { %v930_v19 = vadd.f32 %v8367_v31, %v642_v59  ;;  %v7576_v62 = vpack.c.bf16 %v1249_v49, %v1217_v25  ;;  %v1251_v26 = vmax.f32 %v995_v0, 0.0  ;;  %v900_v16 = vadd.f32 %v8314_v44, %v612_v61 }
 0x18b   : > { %4556 = vmatprep.subr.bf16.mxu1 %v7579_v18  ;;  %v609_v50 = vmul.f32 %v9236_v22, %v8286_v34  ;;  %v1154_v4 = vmax.f32 %v898_v10, 0.0  ;;  %v932_v51 = vadd.f32 %v8367_v31, %v644_v42  ;;  %v641_v12 = vmul.f32 %v9236_v22, %v8339_v40  ;;  %v9377_v7 = vpop.f32.mrf.mxu0 }
 0x18c   : > { %v1186_v21 = vmax.f32 %v930_v19, 0.0  ;;  %4504 = vmatpush1.bf16.msra.mxu0 %v7576_v62  ;;  %v7578_v13 = vpack.c.bf16 %v1251_v26, %v1219_v48  ;;  %v1156_v11 = vmax.f32 %v900_v16, 0.0  ;;  %v611_v43 = vmul.f32 %v9240_v52, %v8286_v34  ;;  %v9362_v34 = vpop.f32.mrf.mxu1  ;;  %v7818_v62 = vld [vmem:[%s11607_s3] sm:$0xff]  }
 0x18d   : > { %v897_v41 = vadd.f32 %v8314_v44, %v609_v50  ;;  %v1188_v54 = vmax.f32 %v932_v51, 0.0  ;;  %v929_v14 = vadd.f32 %v8367_v31, %v641_v12  ;;  %v643_v32 = vmul.f32 %v9240_v52, %v8339_v40  ;;  %v9399_v42 = vpop.f32.mrf.mxu0 }
 0x18e   : > { %v7545_v37 = vpack.c.bf16 %v1186_v21, %v1154_v4  ;;  %4557 = vmatpush1.bf16.msra.mxu1 %v7578_v13  ;;  %v899_v22 = vadd.f32 %v8314_v44, %v611_v43  ;;  %v4917_v15 = vmul.f32 %v9295_v2, %v9295_v2  ;;  %v4919_v17 = vmul.f32 %v9297_v5, %v9297_v5  ;;  %v9385_v39 = vpop.f32.mrf.mxu1 }
 0x18f   : > { %v1153_v24 = vmax.f32 %v897_v41, 0.0  ;;  %v7547_v33 = vpack.c.bf16 %v1188_v54, %v1156_v11  ;;  %v1185_v57 = vmax.f32 %v929_v14, 0.0  ;;  %v931_v23 = vadd.f32 %v8367_v31, %v643_v32 }
 0x190   : > { %4505 = vmatprep.subr.bf16.mxu0 %v7545_v37  ;;  %v4918_v40 = vmul.f32 %v9306_v53, %v9306_v53  ;;  %v1155_v52 = vmax.f32 %v899_v22, 0.0  ;;  %v4920_v44 = vmul.f32 %v9308_v30, %v9308_v30  ;;  %v4597_v58 = vadd.f32 %v9316_v36, %v9295_v2  ;;  %v9408_v21 = vpop.f32.mrf.mxu1 }
 0x191   : > { %v4949_v63 = vmul.f32 %v9316_v36, %v9316_v36  ;;  %4558 = vmatprep.subr.bf16.mxu1 %v7547_v33  ;;  %v7544_v1 = vpack.c.bf16 %v1185_v57, %v1153_v24  ;;  %v1187_v35 = vmax.f32 %v931_v23, 0.0  ;;  %v4615_v3 = vadd.f32 %v9318_v29, %v9297_v5 }
 0x192   : > { %v4951_v31 = vmul.f32 %v9318_v29, %v9318_v29  ;;  %v4606_v9 = vadd.f32 %v9328_v45, %v9306_v53  ;;  %v4950_v38 = vmul.f32 %v9328_v45, %v9328_v45  ;;  %v4624_v47 = vadd.f32 %v9330_v27, %v9308_v30 }
 0x193   : > { %v5045_v8 = vadd.f32 %v4949_v63, %v4917_v15  ;;  %4506 = vmatpush1.bf16.msra.mxu0 %v7544_v1  ;;  %v7546_v28 = vpack.c.bf16 %v1187_v35, %v1155_v52  ;;  %v4952_v55 = vmul.f32 %v9330_v27, %v9330_v27  ;;  %v4598_v56 = vadd.f32 %v4597_v58, %v9339_v6 }
 0x194   : > { %v5063_v25 = vadd.f32 %v4951_v31, %v4919_v17  ;;  %v5054_v59 = vadd.f32 %v4950_v38, %v4918_v40  ;;  %v4981_v18 = vmul.f32 %v9339_v6, %v9339_v6  ;;  %v4616_v49 = vadd.f32 %v4615_v3, %v9344_v20 }
 0x195   : > { %v4983_v0 = vmul.f32 %v9344_v20, %v9344_v20  ;;  %4559 = vmatpush1.bf16.msra.mxu1 %v7546_v28  ;;  %v5072_v61 = vadd.f32 %v4952_v55, %v4920_v44  ;;  %v4607_v48 = vadd.f32 %v4606_v9, %v9355_v60  ;;  %v4982_v10 = vmul.f32 %v9355_v60, %v9355_v60  ;;  %v9422_v15 = vpop.f32.mrf.mxu0  ;;  %v7819_v28 = vld [vmem:[%s11607_s3 + $0x8] sm:$0xff]  }
 0x196   : > { %v4625_v19 = vadd.f32 %v4624_v47, %v9362_v34  ;;  %7363 = vmatmul.mubr.msk.bf16.vlgmr.msra.gmra.mxu0 %vm3645_vm3, %v7818_v62  ;;  %v5046_v26 = vadd.f32 %v5045_v8, %v4981_v18  ;;  %v4984_v50 = vmul.f32 %v9362_v34, %v9362_v34  ;;  %v4599_v4 = vadd.f32 %v4598_v56, %v9377_v7  ;;  %v9426_v40 = vpop.f32.mrf.mxu1 }
 0x197   : > { %v5064_v16 = vadd.f32 %v5063_v25, %v4983_v0  ;;  %4533 = vmatprep.mubr.bf16.mxu0 %v11737_v46  ;;  %v5055_v51 = vadd.f32 %v5054_v59, %v4982_v10  ;;  %v5013_v12 = vmul.f32 %v9377_v7, %v9377_v7  ;;  %v4617_v13 = vadd.f32 %v4616_v49, %v9385_v39  ;;  %v9428_v47 = vpop.f32.mrf.mxu0 }
 0x198   : > { %v5015_v11 = vmul.f32 %v9385_v39, %v9385_v39  ;;  %7366 = vmatmul.mubr.msk.bf16.vlgmr.msra.gmra.mxu1 %vm3645_vm3, %v7818_v62  ;;  %v5073_v41 = vadd.f32 %v5072_v61, %v4984_v50  ;;  %v4600_v43 = vrot.slane %v4599_v4, 4  ;;  %v4608_v37 = vadd.f32 %v4607_v48, %v9399_v42  ;;  %v9434_v18 = vpop.f32.mrf.mxu1 }
 0x199   : > { %v5014_v54 = vmul.f32 %v9399_v42, %v9399_v42  ;;  %4586 = vmatprep.mubr.bf16.mxu1 %v11737_v46  ;;  %v5047_v14 = vadd.f32 %v5046_v26, %v5013_v12  ;;  %v4618_v32 = vrot.slane %v4617_v13, 4  ;;  %v4626_v22 = vadd.f32 %v4625_v19, %v9408_v21  ;;  %v9437_v12 = vpop.f32.mrf.mxu0 }
 0x19a   : > { %v5065_v24 = vadd.f32 %v5064_v16, %v5015_v11  ;;  %v4601_v17 = vadd.f32 %v4600_v43, %v4599_v4  ;;  %v4609_v33 = vrot.slane %v4608_v37, 4  ;;  %v5016_v23 = vmul.f32 %v9408_v21, %v9408_v21 }
 0x19b   : > { %v5056_v57 = vadd.f32 %v5055_v51, %v5014_v54  ;;  %v5048_v52 = vrot.slane %v5047_v14, 4  ;;  %v4619_v44 = vadd.f32 %v4618_v32, %v4617_v13  ;;  %v4627_v63 = vrot.slane %v4626_v22, 4 }
 0x19c   : > { %v5066_v58 = vrot.slane %v5065_v24, 4  ;;  %v4602_v46 = vrot.slane %v4601_v17, 2  ;;  %v4610_v1 = vadd.f32 %v4609_v33, %v4608_v37  ;;  %v5074_v3 = vadd.f32 %v5073_v41, %v5016_v23  ;;  %v9439_v37 = vpop.f32.mrf.mxu1 }
 0x19d   : > { %v5057_v35 = vrot.slane %v5056_v57, 4  ;;  %v5049_v31 = vadd.f32 %v5048_v52, %v5047_v14  ;;  %v4620_v8 = vrot.slane %v4619_v44, 2  ;;  %v4628_v38 = vadd.f32 %v4627_v63, %v4626_v22  ;;  %v9445_v63 = vpop.f32.mrf.mxu0 }
 0x19e   : > { %v5067_v9 = vadd.f32 %v5066_v58, %v5065_v24  ;;  %7364 = vmatmul.mubr.msk.bf16.gmra.mxu0 %vm3645_vm3, %v7819_v28  ;;  %v4603_v25 = vadd.f32 %v4602_v46, %v4601_v17  ;;  %v4611_v55 = vrot.slane %v4610_v1, 2  ;;  %v5075_v59 = vrot.slane %v5074_v3, 4 }
 0x19f   : > { %v5058_v56 = vadd.f32 %v5057_v35, %v5056_v57  ;;  %v5050_v49 = vrot.slane %v5049_v31, 2  ;;  %v4621_v0 = vadd.f32 %v4620_v8, %v4619_v44  ;;  %v4629_v48 = vrot.slane %v4628_v38, 2 }
 0x1a0   : > { %v5068_v61 = vrot.slane %v5067_v9, 2  ;;  %7367 = vmatmul.mubr.msk.bf16.gmra.mxu1 %vm3645_vm3, %v7819_v28  ;;  %v4604_v10 = vrot.slane %v4603_v25, 1  ;;  %v4612_v19 = vadd.f32 %v4611_v55, %v4610_v1  ;;  %v5076_v26 = vadd.f32 %v5075_v59, %v5074_v3 }
 0x1a1   : > { %v5059_v62 = vrot.slane %v5058_v56, 2  ;;  %v5051_v16 = vadd.f32 %v5050_v49, %v5049_v31  ;;  %v4622_v50 = vrot.slane %v4621_v0, 1  ;;  %v4630_v51 = vadd.f32 %v4629_v48, %v4628_v38  ;;  %v9455_v31 = vpop.f32.mrf.mxu1 }
 0x1a2   : > { %v5069_v4 = vadd.f32 %v5068_v61, %v5067_v9  ;;  %v4605_v13 = vadd.f32 %v4604_v10, %v4603_v25  ;;  %v4613_v11 = vrot.slane %v4612_v19, 1  ;;  %v5077_v43 = vrot.slane %v5076_v26, 2  ;;  %v9471_v10 = vpop.f32.mrf.mxu0 }
 0x1a3   : > { %v5060_v41 = vadd.f32 %v5059_v62, %v5058_v56  ;;  %v5052_v54 = vrot.slane %v5051_v16, 1  ;;  %v4623_v14 = vadd.f32 %v4622_v50, %v4621_v0  ;;  %v4631_v24 = vrot.slane %v4630_v51, 1  ;;  %v9479_v50 = vpop.f32.mrf.mxu1 }
 0x1a4   : > { %v5070_v32 = vrot.slane %v5069_v4, 1  ;;  %v9441_v22 = vmul.f32 0.03125, %v4605_v13  ;;  %v4614_v17 = vadd.f32 %v4613_v11, %v4612_v19  ;;  %v5078_v57 = vadd.f32 %v5077_v43, %v5076_v26 }
 0x1a5   : > { %v5061_v33 = vrot.slane %v5060_v41, 1  ;;  %v5053_v23 = vadd.f32 %v5052_v54, %v5051_v16  ;;  %v9443_v52 = vmul.f32 0.03125, %v4623_v14  ;;  %v4632_v58 = vadd.f32 %v4631_v24, %v4630_v51 }
 0x1a6   : > { %v5071_v44 = vadd.f32 %v5070_v32, %v5069_v4  ;;  %v5365_v46 = vmul.f32 %v9441_v22, %v9441_v22  ;;  %v5429_v1 = vsub.f32 %v9295_v2, %v9441_v22  ;;  %v5461_v35 = vsub.f32 %v9316_v36, %v9441_v22 }
 0x1a7   : > { %v5493_v3 = vsub.f32 %v9339_v6, %v9441_v22  ;;  %v5333_v8 = vmul.f32 0.03125, %v5053_v23  ;;  %v5525_v9 = vsub.f32 %v9377_v7, %v9441_v22  ;;  %v5367_v28 = vmul.f32 %v9443_v52, %v9443_v52 }
 0x1a8   : > { %v5335_v38 = vmul.f32 0.03125, %v5071_v44  ;;  %v9469_v61 = vmul.f32 0.03125, %v4614_v17  ;;  %v5062_v48 = vadd.f32 %v5061_v33, %v5060_v41  ;;  %v9473_v19 = vmul.f32 0.03125, %v4632_v58  ;;  %v9493_v33 = vpop.f32.mrf.mxu0 }
 0x1a9   : > { %v5397_v49 = vsub.f32 %v5333_v8, %v5365_v46  ;;  %v5079_v62 = vrot.slane %v5078_v57, 1  ;;  %v4921_v26 = vmul.f32 %v9422_v15, %v9422_v15  ;;  %v4923_v16 = vmul.f32 %v9426_v40, %v9426_v40  ;;  %v9501_v46 = vpop.f32.mrf.mxu1 }
 0x1aa   : > { %v5399_v0 = vsub.f32 %v5335_v38, %v5367_v28  ;;  %v5334_v13 = vmul.f32 0.03125, %v5062_v48  ;;  %v5366_v11 = vmul.f32 %v9469_v61, %v9469_v61  ;;  %v5368_v17 = vmul.f32 %v9473_v19, %v9473_v19 }
 0x1ab   : > { %v5557_v4 = vadd.f32 1e-05, %v5397_v49  ;;  %v5080_v24 = vadd.f32 %v5079_v62, %v5078_v57  ;;  %v4922_v28 = vmul.f32 %v9428_v47, %v9428_v47  ;;  %v4924_v49 = vmul.f32 %v9434_v18, %v9434_v18 }
 0x1ac   : > { %v5559_v51 = vadd.f32 1e-05, %v5399_v0  ;;  %v5398_v32 = vsub.f32 %v5334_v13, %v5366_v11  ;;  %v4633_v0 = vadd.f32 %v9437_v12, %v9422_v15  ;;  %v4953_v48 = vmul.f32 %v9437_v12, %v9437_v12  ;;  %v9519_v11 = vpop.f32.mrf.mxu0 }
 0x1ad   : > { %7751 = vrsqrt.f32 %v5557_v4  ;;  %v5336_v38 = vmul.f32 0.03125, %v5080_v24  ;;  %v4651_v62 = vadd.f32 %v9439_v37, %v9426_v40  ;;  %v4642_v13 = vadd.f32 %v9445_v63, %v9428_v47 }
 0x1ae   : > { %7753 = vrsqrt.f32 %v5559_v51  ;;  %v5558_v8 = vadd.f32 1e-05, %v5398_v32  ;;  %v4955_v51 = vmul.f32 %v9439_v37, %v9439_v37  ;;  %v5081_v32 = vadd.f32 %v4953_v48, %v4921_v26 }
 0x1af   : > { %v5400_v4 = vsub.f32 %v5336_v38, %v5368_v17  ;;  %v4954_v24 = vmul.f32 %v9445_v63, %v9445_v63  ;;  %v4660_v57 = vadd.f32 %v9455_v31, %v9434_v18  ;;  %v4956_v58 = vmul.f32 %v9455_v31, %v9455_v31 }
 0x1b0   : > { %7755 = vrsqrt.f32 %v5558_v8  ;;  %v9527_v8 = vpop.f32.mrf.mxu1  ;;  %v5099_v38 = vadd.f32 %v4955_v51, %v4923_v16  ;;  %v4634_v44 = vadd.f32 %v4633_v0, %v9471_v10  ;;  %v4985_v23 = vmul.f32 %v9471_v10, %v9471_v10  ;;  %v9538_v16 = vpop.f32.mrf.mxu0 }
 0x1b1   : > { %v5560_v17 = vadd.f32 1e-05, %v5400_v4  ;;  %v5090_v14 = vadd.f32 %v4954_v24, %v4922_v28  ;;  %v5108_v26 = vadd.f32 %v4956_v58, %v4924_v49  ;;  %v4652_v48 = vadd.f32 %v4651_v62, %v9479_v50  ;;  %v9540_v0 = vpop.permute.xlu1 %5755 }
 0x1b2   : > { %v4987_v54 = vmul.f32 %v9479_v50, %v9479_v50  ;;  %v5082_v43 = vadd.f32 %v5081_v32, %v4985_v23  ;;  %v4643_v41 = vadd.f32 %v4642_v13, %v9493_v33  ;;  %v4986_v4 = vmul.f32 %v9493_v33, %v9493_v33  ;;  %v9546_v62 = vpop.f32.mrf.mxu1 }
 0x1b3   : > { %7757 = vrsqrt.f32 %v5560_v17  ;;  %v4661_v28 = vadd.f32 %v4660_v57, %v9501_v46  ;;  %v4988_v58 = vmul.f32 %v9501_v46, %v9501_v46  ;;  %v4635_v49 = vadd.f32 %v4634_v44, %v9519_v11 }
 0x1b4   : > { %v5100_v51 = vadd.f32 %v5099_v38, %v4987_v54  ;;  %v5091_v23 = vadd.f32 %v5090_v14, %v4986_v4  ;;  %v5017_v13 = vmul.f32 %v9519_v11, %v9519_v11  ;;  %v4653_v32 = vadd.f32 %v4652_v48, %v9527_v8 }
 0x1b5   : > { %v5019_v24 = vmul.f32 %v9527_v8, %v9527_v8  ;;  %v9553_v17 = vadd.f32 %v5108_v26, %v4988_v58  ;;  %v4636_v54 = vrot.slane %v4635_v49, 4  ;;  %v4644_v57 = vadd.f32 %v4643_v41, %v9538_v16  ;;  %v9595_v7 = vpop.permute.xlu1 %5765 }
 0x1b6   : > { %v5018_v38 = vmul.f32 %v9538_v16, %v9538_v16  ;;  %v5083_v44 = vadd.f32 %v5082_v43, %v5017_v13  ;;  %v4654_v59 = vrot.slane %v4653_v32, 4  ;;  %v9559_v14 = vadd.f32 %v4661_v28, %v9546_v62 }
 0x1b7   : > { %v5101_v56 = vadd.f32 %v5100_v51, %v5019_v24  ;;  %v4637_v55 = vadd.f32 %v4636_v54, %v4635_v49  ;;  %v4645_v48 = vrot.slane %v4644_v57, 4  ;;  %v5020_v26 = vmul.f32 %v9546_v62, %v9546_v62 }
 0x1b8   : > { %v5092_v25 = vadd.f32 %v5091_v23, %v5018_v38  ;;  %v11774_v49 = vsub.f32 %v9297_v5, %v9443_v52  ;;  %v11775_v2 = vsub.f32 %v9318_v29, %v9443_v52  ;;  %v11776_v36 = vsub.f32 %v9344_v20, %v9443_v52 }
 0x1b9   : > { %v11777_v6 = vsub.f32 %v9385_v39, %v9443_v52  ;;  %v4638_v29 = vrot.slane %v4637_v55, 2  ;;  %v4655_v39 = vadd.f32 %v4654_v59, %v4653_v32  ;;  %v5102_v52 = vrot.slane %v5101_v56, 4 }
 0x1ba   : > { %v7752_v4 = vpop.eup %7751  ;;  %v11780_v54 = vsub.f32 %v9306_v53, %v9469_v61 }
 0x1bb   : > { %v7754_v58 = vpop.eup %7753  ;;  %v5621_v41 = vmul.f32 %v7752_v4, %v5429_v1  ;;  %v9569_v43 = vmul.f32 %v7752_v4, %v5461_v35  ;;  %v5685_v51 = vmul.f32 %v7752_v4, %v5493_v3  ;;  %v9577_v28 = vmul.f32 %v7752_v4, %v5525_v9 }
 0x1bc   : > { %v5623_v23 = vmul.f32 %v7754_v58, %v11774_v49  ;;  %v9585_v1 = vmul.f32 %v7754_v58, %v11775_v2  ;;  %v5687_v35 = vmul.f32 %v7754_v58, %v11776_v36  ;;  %v9593_v3 = vmul.f32 %v7754_v58, %v11777_v6 }
 0x1bd   : > { %v9598_v22 = vmul.f32 %v9540_v0, %v5621_v41  ;;  %v9601_v5 = vmul.f32 %v9595_v7, %v5685_v51  ;;  %v5084_v9 = vrot.slane %v5083_v44, 4  ;;  %v7756_v13 = vpop.eup %7755  ;;  %v11781_v4 = vsub.f32 %v9328_v45, %v9469_v61 }
 0x1be   : > { %v9604_v24 = vmul.f32 %v9540_v0, %v5623_v23  ;;  %v9607_v20 = vmul.f32 %v9595_v7, %v5687_v35  ;;  %v5622_v38 = vmul.f32 %v7756_v13, %v11780_v54  ;;  %v11782_v41 = vsub.f32 %v9355_v60, %v9469_v61 }
 0x1bf   : > { %11778 = vst [vmem:[#allocation15_spill] sm:$0xff] %v9601_v5  ;;  %v9615_v58 = vmul.f32 %v7756_v13, %v11781_v4  ;;  %v11783_v49 = vsub.f32 %v9399_v42, %v9469_v61  ;;  %v4639_v59 = vadd.f32 %v4638_v29, %v4637_v55  ;;  %v5085_v32 = vadd.f32 %v5084_v9, %v5083_v44 }
 0x1c0   : > { %11779 = vst [vmem:[#allocation16_spill] sm:$0xff] %v9607_v20  ;;  %v5686_v51 = vmul.f32 %v7756_v13, %v11782_v41  ;;  %v4656_v2 = vrot.slane %v4655_v39, 2  ;;  %v5103_v36 = vadd.f32 %v5102_v52, %v5101_v56  ;;  %v5774_v53 = vmul.f32 %v9540_v0, %v5622_v38  ;;  %v7758_v54 = vpop.eup %7757 }
 0x1c1   : > { %v9623_v23 = vmul.f32 %v7756_v13, %v11783_v49  ;;  %v4646_v45 = vadd.f32 %v4645_v48, %v4644_v57  ;;  %v5093_v6 = vrot.slane %v5092_v25, 4  ;;  %v4640_v4 = vrot.slane %v4639_v59, 1 }
 0x1c2   : > { %v9627_v35 = vmul.f32 %v9595_v7, %v5686_v51  ;;  %v5086_v60 = vrot.slane %v5085_v32, 2  ;;  %v4657_v41 = vadd.f32 %v4656_v2, %v4655_v39  ;;  %v5104_v20 = vrot.slane %v5103_v36, 2 }
 0x1c3   : > { %v11785_v42 = vsub.f32 %v9308_v30, %v9473_v19  ;;  %v11786_v55 = vsub.f32 %v9330_v27, %v9473_v19  ;;  %v11787_v44 = vsub.f32 %v9362_v34, %v9473_v19  ;;  %v11788_v57 = vsub.f32 %v9408_v21, %v9473_v19 }
 0x1c4   : > { %11784 = vst [vmem:[#allocation18_spill] sm:$0xff] %v9627_v35  ;;  %v4641_v9 = vadd.f32 %v4640_v4, %v4639_v59  ;;  %v5087_v13 = vadd.f32 %v5086_v60, %v5085_v32  ;;  %v4658_v39 = vrot.slane %v4657_v41, 1  ;;  %v5105_v52 = vadd.f32 %v5104_v20, %v5103_v36 }
 0x1c5   : > { %v5624_v61 = vmul.f32 %v7758_v54, %v11785_v42  ;;  %v9635_v56 = vmul.f32 %v7758_v54, %v11786_v55  ;;  %v5688_v29 = vmul.f32 %v7758_v54, %v11787_v44  ;;  %v9643_v48 = vmul.f32 %v7758_v54, %v11788_v57  ;;  %v9651_v55 = vpop.f32.mrf.mxu0 }
 0x1c6   : > { %v4647_v27 = vrot.slane %v4646_v45, 2  ;;  %v5094_v51 = vadd.f32 %v5093_v6, %v5092_v25  ;;  %v9649_v49 = vmul.f32 0.03125, %v4641_v9  ;;  %v5088_v34 = vrot.slane %v5087_v13, 1 }
 0x1c7   : > { %v5776_v30 = vmul.f32 %v9540_v0, %v5624_v61  ;;  %v9647_v38 = vmul.f32 %v9595_v7, %v5688_v29  ;;  %v4659_v2 = vadd.f32 %v4658_v39, %v4657_v41  ;;  %v5106_v42 = vrot.slane %v5105_v52, 1  ;;  %v9670_v29 = vpop.f32.mrf.mxu0 }
 0x1c8   : > { %v4648_v21 = vadd.f32 %v4647_v27, %v4646_v45  ;;  %v5095_v19 = vrot.slane %v5094_v51, 2  ;;  %v4663_v59 = vrot.slane %v9559_v14, 4  ;;  %v5110_v20 = vadd.f32 %v9553_v17, %v5020_v26  ;;  %v9667_v17 = vpop.f32.mrf.mxu1 }
 0x1c9   : > { %11789 = vst [vmem:[#allocation13_spill] sm:$0xff] %v9647_v38  ;;  %v5089_v32 = vadd.f32 %v5088_v34, %v5087_v13  ;;  %v5369_v36 = vmul.f32 %v9649_v49, %v9649_v49  ;;  %v9665_v4 = vmul.f32 0.03125, %v4659_v2  ;;  %v5107_v60 = vadd.f32 %v5106_v42, %v5105_v52 }
 0x1ca   : > { %v4649_v41 = vrot.slane %v4648_v21, 1  ;;  %v5096_v61 = vadd.f32 %v5095_v19, %v5094_v51  ;;  %v4664_v44 = vadd.f32 %v4663_v59, %v9559_v14  ;;  %v5111_v19 = vrot.slane %v5110_v20, 4  ;;  %v9682_v59 = vpop.permute.xlu1 %5902  ;;  %v9695_v51 = vpop.f32.mrf.mxu0 }
 0x1cb   : > { %v5337_v26 = vmul.f32 0.03125, %v5089_v32  ;;  %v5339_v57 = vmul.f32 0.03125, %v5107_v60  ;;  %v5371_v9 = vmul.f32 %v9665_v4, %v9665_v4  ;;  %v9684_v32 = vpop.f32.mrf.mxu1 }
 0x1cc   : > { %v4650_v14 = vadd.f32 %v4649_v41, %v4648_v21  ;;  %v5097_v2 = vrot.slane %v5096_v61, 1  ;;  %v4665_v42 = vrot.slane %v4664_v44, 2  ;;  %11790 = vst [vmem:[#allocation14_spill] sm:$0xff] %v9684_v32 }
 0x1cd   : > { %v5401_v52 = vsub.f32 %v5337_v26, %v5369_v36  ;;  %v5403_v34 = vsub.f32 %v5339_v57, %v5371_v9  ;;  %v9690_v36 = vadd.f32 %v9682_v59, %v9598_v22  ;;  %v9693_v26 = vadd.f32 %v9682_v59, %v5774_v53  ;;  %v9724_v53 = vpop.permute.xlu0 %5760 }
 0x1ce   : > { %v9686_v13 = vmul.f32 0.03125, %v4650_v14  ;;  %v5098_v41 = vadd.f32 %v5097_v2, %v5096_v61  ;;  %v4666_v57 = vadd.f32 %v4665_v42, %v4664_v44  ;;  %v5112_v9 = vadd.f32 %v5111_v19, %v5110_v20  ;;  %v9707_v44 = vpop.f32.mrf.mxu1  ;;  %v9716_v19 = vpop.f32.mrf.mxu0 }
 0x1cf   : > { %v5561_v60 = vadd.f32 1e-05, %v5401_v52  ;;  %11791 = vst [vmem:[#allocation17_spill] sm:$0xff] %v9690_v36  ;;  %11792 = vst [vmem:[#allocation20_spill] sm:$0xff] %v9693_v26  ;;  %v5563_v21 = vadd.f32 1e-05, %v5403_v34  ;;  %v9711_v2 = vadd.f32 %v9682_v59, %v9604_v24  ;;  %v9714_v42 = vadd.f32 %v9682_v59, %v5776_v30 }
 0x1d0   : > { %v5370_v27 = vmul.f32 %v9686_v13, %v9686_v13  ;;  %v5338_v14 = vmul.f32 0.03125, %v5098_v41  ;;  %v4667_v20 = vrot.slane %v4666_v57, 1  ;;  %v5113_v34 = vrot.slane %v5112_v9, 2  ;;  %v9736_v54 = vpop.f32.mrf.mxu1 }
 0x1d1   : > { %7759 = vrsqrt.f32 %v5561_v60  ;;  %11793 = vst [vmem:[#allocation19_spill] sm:$0xff] %v9711_v2  ;;  %11794 = vst [vmem:[#allocation23_spill] sm:$0xff] %v9714_v42  ;;  %v4927_v41 = vmul.f32 %v9667_v17, %v9667_v17  ;;  %v4926_v61 = vmul.f32 %v9670_v29, %v9670_v29  ;;  %v4928_v30 = vmul.f32 %v9684_v32, %v9684_v32  ;;  %v9770_v38 = vpop.permute.xlu0 %5906 }
 0x1d2   : > { %7761 = vrsqrt.f32 %v5563_v21  ;;  %v5402_v60 = vsub.f32 %v5338_v14, %v5370_v27  ;;  %v4925_v21 = vmul.f32 %v9651_v55, %v9651_v55  ;;  %v4668_v22 = vadd.f32 %v4667_v20, %v4666_v57  ;;  %11795 = vst [vmem:[#allocation24_spill] sm:$0xff] %v9736_v54  ;;  %v9762_v36 = vpop.f32.mrf.mxu1 }
 0x1d3   : > { %v5114_v24 = vadd.f32 %v5113_v34, %v5112_v9  ;;  %v5805_v52 = vmul.f32 %v9724_v53, %v9569_v43  ;;  %v5806_v14 = vmul.f32 %v9724_v53, %v9615_v58  ;;  %v5807_v39 = vmul.f32 %v9724_v53, %v9585_v1  ;;  %v9744_v34 = vpop.f32.mrf.mxu0 }
 0x1d4   : > { %v5562_v27 = vadd.f32 1e-05, %v5402_v60  ;;  %v5808_v45 = vmul.f32 %v9724_v53, %v9635_v56  ;;  %v9738_v57 = vmul.f32 0.03125, %v4668_v22  ;;  %v4669_v20 = vadd.f32 %v9695_v51, %v9651_v55 }
 0x1d5   : > { %v5115_v9 = vrot.slane %v5114_v24, 1  ;;  %v4957_v43 = vmul.f32 %v9695_v51, %v9695_v51  ;;  %v4687_v1 = vadd.f32 %v9707_v44, %v9667_v17  ;;  %v4959_v58 = vmul.f32 %v9707_v44, %v9707_v44 }
 0x1d6   : > { %7763 = vrsqrt.f32 %v5562_v27  ;;  %v4678_v56 = vadd.f32 %v9716_v19, %v9670_v29  ;;  %v5372_v60 = vmul.f32 %v9738_v57, %v9738_v57  ;;  %v4696_v6 = vadd.f32 %v9736_v54, %v9684_v32  ;;  %v9772_v27 = vpop.f32.mrf.mxu0 }
 0x1d7   : > { %v5116_v22 = vadd.f32 %v5115_v9, %v5114_v24  ;;  %v5117_v2 = vadd.f32 %v4957_v43, %v4925_v21  ;;  %v5135_v26 = vadd.f32 %v4959_v58, %v4927_v41  ;;  %v4958_v9 = vmul.f32 %v9716_v19, %v9716_v19 }
 0x1d8   : > { %v4960_v25 = vmul.f32 %v9736_v54, %v9736_v54  ;;  %v9775_v42 = vadd.f32 %v9770_v38, %v5805_v52  ;;  %v9778_v21 = vadd.f32 %v9770_v38, %v5806_v14  ;;  %v9781_v41 = vadd.f32 %v9770_v38, %v5807_v39 }
 0x1d9   : > { %v5340_v24 = vmul.f32 0.03125, %v5116_v22  ;;  %v9784_v43 = vadd.f32 %v9770_v38, %v5808_v45  ;;  %v5126_v22 = vadd.f32 %v4958_v9, %v4926_v61  ;;  %v4670_v5 = vadd.f32 %v4669_v20, %v9744_v34 }
 0x1da   : > { %11796 = vst [vmem:[#allocation25_spill] sm:$0xff] %v9775_v42  ;;  %11797 = vst [vmem:[#allocation21_spill] sm:$0xff] %v9778_v21  ;;  %v5144_v35 = vadd.f32 %v4960_v25, %v4928_v30  ;;  %v4989_v32 = vmul.f32 %v9744_v34, %v9744_v34  ;;  %v4688_v52 = vadd.f32 %v4687_v1, %v9762_v36 }
 0x1db   : > { %11798 = vst [vmem:[#allocation22_spill] sm:$0xff] %v9781_v41  ;;  %11799 = vst [vmem:[#allocation27_spill] sm:$0xff] %v9784_v43  ;;  %v5404_v58 = vsub.f32 %v5340_v24, %v5372_v60  ;;  %v4991_v14 = vmul.f32 %v9762_v36, %v9762_v36  ;;  %v4679_v39 = vadd.f32 %v4678_v56, %v9772_v27  ;;  %v9793_v41 = vpop.f32.mrf.mxu1 }
 0x1dc   : > { %v11800_v61 = vsub.f32 %v9422_v15, %v9649_v49  ;;  %v11801_v30 = vsub.f32 %v9437_v12, %v9649_v49  ;;  %v11802_v60 = vsub.f32 %v9471_v10, %v9649_v49  ;;  %v11803_v24 = vsub.f32 %v9519_v11, %v9649_v49 }
 0x1dd   : > { %v11804_v56 = vsub.f32 %v9426_v40, %v9665_v4  ;;  %v11805_v15 = vsub.f32 %v9439_v37, %v9665_v4  ;;  %v11806_v12 = vsub.f32 %v9479_v50, %v9665_v4  ;;  %v11807_v10 = vsub.f32 %v9527_v8, %v9665_v4  ;;  %v9835_v8 = vpop.f32.mrf.mxu1 }
 0x1de   : > { %v7760_v54 = vpop.eup %7759  ;;  %v5564_v40 = vadd.f32 1e-05, %v5404_v58 }
 0x1df   : > { %v7762_v45 = vpop.eup %7761  ;;  %v5625_v25 = vmul.f32 %v7760_v54, %v11800_v61  ;;  %v5657_v20 = vmul.f32 %v7760_v54, %v11801_v30  ;;  %v5689_v1 = vmul.f32 %v7760_v54, %v11802_v60  ;;  %v9807_v9 = vmul.f32 %v7760_v54, %v11803_v24 }
 0x1e0   : > { %v5627_v43 = vmul.f32 %v7762_v45, %v11804_v56  ;;  %v5659_v61 = vmul.f32 %v7762_v45, %v11805_v15  ;;  %v5691_v30 = vmul.f32 %v7762_v45, %v11806_v12  ;;  %v9821_v60 = vmul.f32 %v7762_v45, %v11807_v10  ;;  %v9833_v15 = vpop.f32.mrf.mxu0 }
 0x1e1   : > { %v5777_v11 = vmul.f32 %v9540_v0, %v5625_v25  ;;  %v9825_v49 = vmul.f32 %v9595_v7, %v5689_v1  ;;  %v5809_v54 = vmul.f32 %v9724_v53, %v5657_v20  ;;  %v5118_v56 = vadd.f32 %v5117_v2, %v4989_v32 }
 0x1e2   : > { %v5779_v37 = vmul.f32 %v9540_v0, %v5627_v43  ;;  %v9830_v24 = vmul.f32 %v9595_v7, %v5691_v30  ;;  %v5811_v50 = vmul.f32 %v9724_v53, %v5659_v61  ;;  %7765 = vrsqrt.f32 %v5564_v40 }
 0x1e3   : > { %v9838_v4 = vadd.f32 %v9682_v59, %v5777_v11  ;;  %v9841_v58 = vadd.f32 %v9770_v38, %v5809_v54  ;;  %v5136_v45 = vadd.f32 %v5135_v26, %v4991_v14  ;;  %v4990_v32 = vmul.f32 %v9772_v27, %v9772_v27  ;;  %v7764_v20 = vpop.eup %7763 }
 0x1e4   : > { %11808 = vst [vmem:[#allocation28_spill] sm:$0xff] %v9830_v24  ;;  %v9844_v43 = vadd.f32 %v9682_v59, %v5779_v37  ;;  %v9847_v25 = vadd.f32 %v9770_v38, %v5811_v50  ;;  %v4697_v2 = vadd.f32 %v4696_v6, %v9793_v41  ;;  %v4992_v1 = vmul.f32 %v9793_v41, %v9793_v41  ;;  %v9872_v37 = vpop.f32.mrf.mxu0 }
 0x1e5   : > { %11809 = vst [vmem:[#allocation29_spill] sm:$0xff] %v9838_v4  ;;  %11810 = vst [vmem:[#allocation26_spill] sm:$0xff] %v9841_v58  ;;  %v4671_v61 = vadd.f32 %v4670_v5, %v9833_v15  ;;  %v5021_v26 = vmul.f32 %v9833_v15, %v9833_v15  ;;  %v4689_v14 = vadd.f32 %v4688_v52, %v9835_v8 }
 0x1e6   : > { %11811 = vst [vmem:[#allocation30_spill] sm:$0xff] %v9844_v43  ;;  %11812 = vst [vmem:[#allocation31_spill] sm:$0xff] %v9847_v25  ;;  %v11813_v12 = vsub.f32 %v9428_v47, %v9686_v13  ;;  %v11814_v10 = vsub.f32 %v9445_v63, %v9686_v13  ;;  %v11815_v6 = vsub.f32 %v9493_v33, %v9686_v13 }
 0x1e7   : > { %v11816_v5 = vsub.f32 %v9538_v16, %v9686_v13  ;;  %v5127_v52 = vadd.f32 %v5126_v22, %v4990_v32  ;;  %v5145_v50 = vadd.f32 %v5144_v35, %v4992_v1  ;;  %v4672_v25 = vrot.slane %v4671_v61, 4 }
 0x1e8   : > { %v5626_v30 = vmul.f32 %v7764_v20, %v11813_v12  ;;  %v5658_v11 = vmul.f32 %v7764_v20, %v11814_v10  ;;  %v5690_v40 = vmul.f32 %v7764_v20, %v11815_v6  ;;  %v5119_v47 = vadd.f32 %v5118_v56, %v5021_v26 }
 0x1e9   : > { %v9870_v54 = vmul.f32 %v7764_v20, %v11816_v5  ;;  %v4690_v33 = vrot.slane %v4689_v14, 4  ;;  %v4673_v6 = vadd.f32 %v4672_v25, %v4671_v61  ;;  %v5023_v16 = vmul.f32 %v9835_v8, %v9835_v8  ;;  %v9882_v20 = vpop.f32.mrf.mxu1  ;;  %v9895_v5 = vpop.permute.xlu1 %5770 }
 0x1ea   : > { %v5778_v12 = vmul.f32 %v9540_v0, %v5626_v30  ;;  %v9876_v63 = vmul.f32 %v9595_v7, %v5690_v40  ;;  %v5810_v10 = vmul.f32 %v9724_v53, %v5658_v11  ;;  %v5120_v58 = vrot.slane %v5119_v47, 4 }
 0x1eb   : > { %v4680_v13 = vadd.f32 %v4679_v39, %v9872_v37  ;;  %v4691_v56 = vadd.f32 %v4690_v33, %v4689_v14  ;;  %v5022_v32 = vmul.f32 %v9872_v37, %v9872_v37  ;;  %v4674_v1 = vrot.slane %v4673_v6, 2 }
 0x1ec   : > { %v9885_v35 = vadd.f32 %v9682_v59, %v5778_v12  ;;  %v9888_v22 = vadd.f32 %v9770_v38, %v5810_v10  ;;  %v5121_v25 = vadd.f32 %v5120_v58, %v5119_v47  ;;  %v5137_v61 = vadd.f32 %v5136_v45, %v5023_v16 }
 0x1ed   : > { %v4681_v26 = vrot.slane %v4680_v13, 4  ;;  %v4692_v30 = vrot.slane %v4691_v56, 2  ;;  %v5128_v11 = vadd.f32 %v5127_v52, %v5022_v32  ;;  %v4698_v39 = vadd.f32 %v4697_v2, %v9882_v20 }
 0x1ee   : > { %11817 = vst [vmem:[#allocation32_spill] sm:$0xff] %v9885_v35  ;;  %11818 = vst [vmem:[#allocation3_spill] sm:$0xff] %v9888_v22  ;;  %v5024_v40 = vmul.f32 %v9882_v20, %v9882_v20  ;;  %v4675_v12 = vadd.f32 %v4674_v1, %v4673_v6  ;;  %v5122_v10 = vrot.slane %v5121_v25, 2  ;;  %v5138_v22 = vrot.slane %v5137_v61, 4 }
 0x1ef   : > { %v4682_v14 = vadd.f32 %v4681_v26, %v4680_v13  ;;  %v4693_v33 = vadd.f32 %v4692_v30, %v4691_v56  ;;  %v5129_v21 = vrot.slane %v5128_v11, 4  ;;  %v4699_v42 = vrot.slane %v4698_v39, 4  ;;  %v7766_v52 = vpop.eup %7765 }
 0x1f0   : > { %v5146_v43 = vadd.f32 %v5145_v50, %v5024_v40  ;;  %v4676_v58 = vrot.slane %v4675_v12, 1  ;;  %v5123_v45 = vadd.f32 %v5122_v10, %v5121_v25  ;;  %v5139_v47 = vadd.f32 %v5138_v22, %v5137_v61 }
 0x1f1   : > { %v4683_v16 = vrot.slane %v4682_v14, 2  ;;  %v4694_v32 = vrot.slane %v4693_v33, 1  ;;  %v5130_v2 = vadd.f32 %v5129_v21, %v5128_v11  ;;  %v4700_v35 = vadd.f32 %v4699_v42, %v4698_v39 }
 0x1f2   : > { %v5147_v4 = vrot.slane %v5146_v43, 4  ;;  %v11819_v24 = vsub.f32 %v9434_v18, %v9738_v57  ;;  %v11820_v13 = vsub.f32 %v9455_v31, %v9738_v57  ;;  %v11821_v50 = vsub.f32 %v9501_v46, %v9738_v57  ;;  %v9915_v31 = vpop.permute.xlu1 %5910 }
 0x1f3   : > { %v11822_v22 = vsub.f32 %v9546_v62, %v9738_v57  ;;  %v4677_v21 = vadd.f32 %v4676_v58, %v4675_v12  ;;  %v5124_v42 = vrot.slane %v5123_v45, 1  ;;  %v4695_v61 = vadd.f32 %v4694_v32, %v4693_v33 }
 0x1f4   : > { %v5628_v6 = vmul.f32 %v7766_v52, %v11819_v24  ;;  %v5660_v56 = vmul.f32 %v7766_v52, %v11820_v13  ;;  %v5692_v1 = vmul.f32 %v7766_v52, %v11821_v50  ;;  %v5140_v26 = vrot.slane %v5139_v47, 2 }
 0x1f5   : > { %v9909_v25 = vmul.f32 %v7766_v52, %v11822_v22  ;;  %v4684_v46 = vadd.f32 %v4683_v16, %v4682_v14  ;;  %v9918_v11 = vmul.f32 0.03125, %v4677_v21  ;;  %v5125_v39 = vadd.f32 %v5124_v42, %v5123_v45  ;;  %v10009_v16 = vpop.f32.mrf.mxu1 }
 0x1f6   : > { %v5780_v18 = vmul.f32 %v9540_v0, %v5628_v6  ;;  %v9913_v24 = vmul.f32 %v9595_v7, %v5692_v1  ;;  %v5812_v30 = vmul.f32 %v9724_v53, %v5660_v56  ;;  %v9920_v62 = vmul.f32 0.03125, %v4695_v61  ;;  %v9946_v22 = vpop.permute.xlu1 %6174 }
 0x1f7   : > { %v5141_v57 = vadd.f32 %v5140_v26, %v5139_v47  ;;  %v4685_v10 = vrot.slane %v4684_v46, 1  ;;  %v5131_v33 = vrot.slane %v5130_v2, 2  ;;  %v5341_v58 = vmul.f32 0.03125, %v5125_v39 }
 0x1f8   : > { %v9923_v40 = vadd.f32 %v9682_v59, %v5780_v18  ;;  %v9926_v12 = vadd.f32 %v9770_v38, %v5812_v30  ;;  %v5373_v52 = vmul.f32 %v9918_v11, %v9918_v11  ;;  %v5437_v14 = vsub.f32 %v9651_v55, %v9918_v11 }
 0x1f9   : > { %v5469_v45 = vsub.f32 %v9695_v51, %v9918_v11  ;;  %v5501_v47 = vsub.f32 %v9744_v34, %v9918_v11  ;;  %v5142_v32 = vrot.slane %v5141_v57, 1  ;;  %v5375_v6 = vmul.f32 %v9920_v62, %v9920_v62 }
 0x1fa   : > { %v5405_v13 = vsub.f32 %v5341_v58, %v5373_v52  ;;  %v4686_v61 = vadd.f32 %v4685_v10, %v4684_v46  ;;  %v5132_v26 = vadd.f32 %v5131_v33, %v5130_v2  ;;  %v4701_v30 = vrot.slane %v4700_v35, 2 }
 0x1fb   : > { %v5143_v21 = vadd.f32 %v5142_v32, %v5141_v57  ;;  %v5148_v39 = vadd.f32 %v5147_v4, %v5146_v43  ;;  %v5869_v58 = vmul.f32 %v9895_v5, %v9577_v28  ;;  %v5870_v1 = vmul.f32 %v9895_v5, %v9623_v23 }
 0x1fc   : > { %v5565_v18 = vadd.f32 1e-05, %v5405_v13  ;;  %v9952_v56 = vmul.f32 0.03125, %v4686_v61  ;;  %v5133_v50 = vrot.slane %v5132_v26, 1  ;;  %v4702_v57 = vadd.f32 %v4701_v30, %v4700_v35  ;;  %v9968_v13 = vpop.permute.xlu1 %6182 }
 0x1fd   : > { %v5343_v52 = vmul.f32 0.03125, %v5143_v21  ;;  %v5149_v32 = vrot.slane %v5148_v39, 2  ;;  %v5871_v46 = vmul.f32 %v9895_v5, %v9593_v3  ;;  %11823 = vst [vmem:[#allocation33_spill] sm:$0xff] %v9968_v13  ;;  %v9970_v3 = vpop.permute.xlu0 %5914  ;;  %v5872_v61 = vmul.f32 %v9895_v5, %v9643_v48 }
 0x1fe   : > { %7767 = vrsqrt.f32 %v5565_v18  ;;  %v5134_v10 = vadd.f32 %v5133_v50, %v5132_v26  ;;  %v5374_v4 = vmul.f32 %v9952_v56, %v9952_v56  ;;  %v4703_v33 = vrot.slane %v4702_v57, 1 }
 0x1ff   : > { %v5407_v2 = vsub.f32 %v5343_v52, %v5375_v6  ;;  %v5150_v21 = vadd.f32 %v5149_v32, %v5148_v39  ;;  %v5873_v18 = vmul.f32 %v9895_v5, %v9807_v9  ;;  %v5874_v30 = vmul.f32 %v9895_v5, %v9870_v54 }
 0x200   : > { %v5342_v50 = vmul.f32 0.03125, %v5134_v10  ;;  %v4704_v26 = vadd.f32 %v4703_v33, %v4702_v57  ;;  %v5875_v52 = vmul.f32 %v9895_v5, %v9821_v60  ;;  %v6013_v48 = vadd.f32 %v9970_v3, %v5869_v58  ;;  %v11824_v33 = vld [vmem:[#allocation14_spill] sm:$0xff] }
 0x201   : > { %v5567_v6 = vadd.f32 1e-05, %v5407_v2  ;;  %v5151_v23 = vrot.slane %v5150_v21, 1  ;;  %v5876_v2 = vmul.f32 %v9895_v5, %v9909_v25  ;;  %v6014_v57 = vadd.f32 %v9970_v3, %v5870_v1  ;;  %v10004_v25 = vpop.f32.mrf.mxu0 }
 0x202   : > { %v5406_v35 = vsub.f32 %v5342_v50, %v5374_v4  ;;  %v9982_v39 = vmul.f32 0.03125, %v4704_v26  ;;  %v6015_v9 = vadd.f32 %v9970_v3, %v5871_v46  ;;  %v6016_v54 = vadd.f32 %v9970_v3, %v5872_v61 }
 0x203   : > { %7769 = vrsqrt.f32 %v5567_v6  ;;  %v5152_v10 = vadd.f32 %v5151_v23, %v5150_v21  ;;  %v6017_v60 = vadd.f32 %v9970_v3, %v5873_v18  ;;  %v11825_v6 = vld [vmem:[#allocation24_spill] sm:$0xff]  ;;  %v9999_v23 = vpop.permute.xlu1 %6186  ;;  %v6019_v21 = vadd.f32 %v9970_v3, %v5875_v52 }
 0x204   : > { %v5566_v32 = vadd.f32 1e-05, %v5406_v35  ;;  %v5376_v4 = vmul.f32 %v9982_v39, %v9982_v39  ;;  %11826 = vst [vmem:[#allocation9_spill] sm:$0xff] %v9999_v23  ;;  %v6018_v35 = vadd.f32 %v9970_v3, %v5874_v30  ;;  %v6020_v61 = vadd.f32 %v9970_v3, %v5876_v2 }
 0x205   : > { %v5344_v58 = vmul.f32 0.03125, %v5152_v10  ;;  %v6141_v26 = vmax.f32 %v6013_v48, 0.0  ;;  %v6142_v18 = vmax.f32 %v6014_v57, 0.0  ;;  %v6143_v43 = vmax.f32 %v6015_v9, 0.0 }
 0x206   : > { %7771 = vrsqrt.f32 %v5566_v32  ;;  %v6144_v1 = vmax.f32 %v6016_v54, 0.0  ;;  %v6145_v32 = vmax.f32 %v6017_v60, 0.0  ;;  %v6146_v10 = vmax.f32 %v6018_v35, 0.0 }
 0x207   : > { %v5408_v50 = vsub.f32 %v5344_v58, %v5376_v4  ;;  %v6147_v28 = vmax.f32 %v6019_v21, 0.0  ;;  %v6148_v42 = vmax.f32 %v6020_v61, 0.0  ;;  %v10007_v46 = vmul.f32 %v9999_v23, %v6141_v26 }
 0x208   : > { %v10012_v2 = vmul.f32 %v9999_v23, %v6142_v18  ;;  %v10015_v48 = vmul.f32 %v9999_v23, %v6143_v43  ;;  %v10018_v57 = vmul.f32 %v9999_v23, %v6144_v1  ;;  %v11831_v4 = vsub.f32 %v9833_v15, %v9918_v11  ;;  %v10047_v11 = vpop.f32.mrf.mxu1 }
 0x209   : > { %11827 = vst [vmem:[#allocation11_spill] sm:$0xff] %v10007_v46  ;;  %v5568_v52 = vadd.f32 1e-05, %v5408_v50  ;;  %v10032_v50 = vpop.f32.mrf.mxu0  ;;  %v10035_v1 = vmul.f32 %v9999_v23, %v6145_v32  ;;  %v10038_v55 = vmul.f32 %v9999_v23, %v6146_v10  ;;  %v10041_v51 = vmul.f32 %v9999_v23, %v6147_v28 }
 0x20a   : > { %11828 = vst [vmem:[#allocation12_spill] sm:$0xff] %v10012_v2  ;;  %11829 = vst [vmem:[#allocation4_spill] sm:$0xff] %v10015_v48  ;;  %v10054_v58 = vmul.f32 %v10004_v25, %v10004_v25  ;;  %v10058_v28 = vmul.f32 %v10009_v16, %v10009_v16  ;;  %v10062_v35 = vmul.f32 %v10032_v50, %v10032_v50 }
 0x20b   : > { %v7768_v30 = vpop.eup %7767  ;;  %11830 = vst [vmem:[#allocation5_spill] sm:$0xff] %v10018_v57  ;;  %7773 = vrsqrt.f32 %v5568_v52  ;;  %11832 = vst [vmem:[#allocation6_spill] sm:$0xff] %v10035_v1  ;;  %v11837_v32 = vsub.f32 %v9667_v17, %v9920_v62 }
 0x20c   : > { %v5629_v9 = vmul.f32 %v7768_v30, %v5437_v14  ;;  %v5661_v54 = vmul.f32 %v7768_v30, %v5469_v45  ;;  %v5693_v60 = vmul.f32 %v7768_v30, %v5501_v47  ;;  %v5725_v43 = vmul.f32 %v7768_v30, %v11831_v4  ;;  %11833 = vst [vmem:[#allocation7_spill] sm:$0xff] %v10038_v55 }
 0x20d   : > { %11834 = vst [vmem:[#allocation8_spill] sm:$0xff] %v10041_v51  ;;  %v10050_v47 = vmul.f32 %v9999_v23, %v6148_v42  ;;  %v11838_v30 = vsub.f32 %v9707_v44, %v9920_v62 }
 0x20e   : > { %v5781_v14 = vmul.f32 %v9540_v0, %v5629_v9  ;;  %v5813_v34 = vmul.f32 %v9724_v53, %v5661_v54  ;;  %v5845_v45 = vmul.f32 %v9595_v7, %v5693_v60  ;;  %v5877_v15 = vmul.f32 %v9895_v5, %v5725_v43  ;;  %v10082_v43 = vpop.f32.mrf.mxu0 }
 0x20f   : > { %11835 = vst [vmem:[#allocation14_spill] sm:$0xff] %v10050_v47  ;;  %v11839_v9 = vsub.f32 %v9762_v36, %v9920_v62  ;;  %v11840_v60 = vsub.f32 %v9835_v8, %v9920_v62 }
 0x210   : > { %v7770_v21 = vpop.eup %7769  ;;  %v5925_v61 = vadd.f32 %v9682_v59, %v5781_v14  ;;  %v10066_v26 = vadd.f32 %v9770_v38, %v5813_v34  ;;  %v5989_v42 = vadd.f32 %v9915_v31, %v5845_v45  ;;  %v6021_v18 = vadd.f32 %v9970_v3, %v5877_v15  ;;  %v10085_v15 = vpop.f32.mrf.mxu1 }
 0x211   : > { %v5631_v10 = vmul.f32 %v7770_v21, %v11837_v32  ;;  %v5663_v52 = vmul.f32 %v7770_v21, %v11838_v30  ;;  %v5695_v54 = vmul.f32 %v7770_v21, %v11839_v9  ;;  %v5727_v4 = vmul.f32 %v7770_v21, %v11840_v60 }
 0x212   : > { %11836 = vst [vmem:[#allocation24_spill] sm:$0xff] %v10066_v26  ;;  %v6053_v14 = vmax.f32 %v5925_v61, 0.0  ;;  %v6117_v45 = vmax.f32 %v5989_v42, 0.0  ;;  %v6149_v17 = vmax.f32 %v6021_v18, 0.0  ;;  %v10102_v61 = vmul.f32 %v10047_v11, %v10047_v11  ;;  %v10124_v34 = vpop.f32.mrf.mxu1 }
 0x213   : > { %v5783_v44 = vmul.f32 %v9540_v0, %v5631_v10  ;;  %v5815_v32 = vmul.f32 %v9724_v53, %v5663_v52  ;;  %v5847_v36 = vmul.f32 %v9595_v7, %v5695_v54  ;;  %v5879_v30 = vmul.f32 %v9895_v5, %v5727_v4  ;;  %v7772_v9 = vpop.eup %7771  ;;  %v10110_v54 = vpop.f32.mrf.mxu0 }
 0x214   : > { %v10092_v8 = vmul.f32 %v9946_v22, %v6053_v14  ;;  %v10095_v62 = vmul.f32 %v9968_v13, %v6117_v45  ;;  %v10098_v21 = vmul.f32 %v9999_v23, %v6149_v17  ;;  %v11845_v60 = vsub.f32 %v9670_v29, %v9952_v56 }
 0x215   : > { %v5927_v42 = vadd.f32 %v9682_v59, %v5783_v44  ;;  %v10106_v18 = vadd.f32 %v9770_v38, %v5815_v32  ;;  %v5991_v10 = vadd.f32 %v9915_v31, %v5847_v36  ;;  %v6023_v52 = vadd.f32 %v9970_v3, %v5879_v30 }
 0x216   : > { %11841 = vst [vmem:[#allocation34_spill] sm:$0xff] %v10092_v8  ;;  %11842 = vst [vmem:[#allocation35_spill] sm:$0xff] %v10095_v62  ;;  %v5630_v4 = vmul.f32 %v7772_v9, %v11845_v60  ;;  %v11846_v14 = vsub.f32 %v9716_v19, %v9952_v56  ;;  %v11847_v17 = vsub.f32 %v9772_v27, %v9952_v56 }
 0x217   : > { %11843 = vst [vmem:[#allocation36_spill] sm:$0xff] %v10098_v21  ;;  %11844 = vst [vmem:[#allocation37_spill] sm:$0xff] %v10106_v18  ;;  %v11848_v32 = vsub.f32 %v9872_v37, %v9952_v56  ;;  %v6055_v30 = vmax.f32 %v5927_v42, 0.0  ;;  %v6119_v62 = vmax.f32 %v5991_v10, 0.0  ;;  %v6151_v29 = vmax.f32 %v6023_v52, 0.0  ;;  %v10142_v42 = vpop.f32.mrf.mxu0 }
 0x218   : > { %v5662_v45 = vmul.f32 %v7772_v9, %v11846_v14  ;;  %v5694_v44 = vmul.f32 %v7772_v9, %v11847_v17  ;;  %v5782_v60 = vmul.f32 %v9540_v0, %v5630_v4  ;;  %v7774_v10 = vpop.eup %7773 }
 0x219   : > { %v5726_v36 = vmul.f32 %v7772_v9, %v11848_v32  ;;  %v10132_v17 = vmul.f32 %v9946_v22, %v6055_v30  ;;  %v10135_v37 = vmul.f32 %v9968_v13, %v6119_v62  ;;  %v10138_v56 = vmul.f32 %v9999_v23, %v6151_v29  ;;  %v10150_v62 = vpop.f32.mrf.mxu1  ;;  %v10169_v8 = vpop.f32.mrf.mxu0 }
 0x21a   : > { %v5814_v19 = vmul.f32 %v9724_v53, %v5662_v45  ;;  %v5846_v14 = vmul.f32 %v9595_v7, %v5694_v44  ;;  %v4705_v9 = vadd.f32 %v10082_v43, %v10004_v25  ;;  %v5926_v52 = vadd.f32 %v9682_v59, %v5782_v60 }
 0x21b   : > { %v5878_v27 = vmul.f32 %v9895_v5, %v5726_v36  ;;  %11849 = vst [vmem:[#allocation38_spill] sm:$0xff] %v10132_v17  ;;  %11850 = vst [vmem:[#allocation39_spill] sm:$0xff] %v10135_v37  ;;  %v11853_v32 = vsub.f32 %v11824_v33, %v9982_v39  ;;  %v11854_v30 = vsub.f32 %v11825_v6, %v9982_v39 }
 0x21c   : > { %11851 = vst [vmem:[#allocation40_spill] sm:$0xff] %v10138_v56  ;;  %v10146_v4 = vadd.f32 %v9770_v38, %v5814_v19  ;;  %v5990_v45 = vadd.f32 %v9915_v31, %v5846_v14  ;;  %v11855_v60 = vsub.f32 %v9793_v41, %v9982_v39  ;;  %v11856_v19 = vsub.f32 %v9882_v20, %v9982_v39 }
 0x21d   : > { %v6022_v44 = vadd.f32 %v9970_v3, %v5878_v27  ;;  %v5632_v36 = vmul.f32 %v7774_v10, %v11853_v32  ;;  %v5664_v29 = vmul.f32 %v7774_v10, %v11854_v30  ;;  %v6054_v56 = vmax.f32 %v5926_v52, 0.0  ;;  %v10182_v52 = vpop.f32.mrf.mxu1 }
 0x21e   : > { %11852 = vst [vmem:[#allocation41_spill] sm:$0xff] %v10146_v4  ;;  %v5696_v21 = vmul.f32 %v7774_v10, %v11855_v60  ;;  %v5728_v14 = vmul.f32 %v7774_v10, %v11856_v19  ;;  %v6118_v37 = vmax.f32 %v5990_v45, 0.0  ;;  %v4961_v10 = vmul.f32 %v10082_v43, %v10082_v43 }
 0x21f   : > { %v6150_v17 = vmax.f32 %v6022_v44, 0.0  ;;  %v5784_v33 = vmul.f32 %v9540_v0, %v5632_v36  ;;  %v5816_v32 = vmul.f32 %v9724_v53, %v5664_v29  ;;  %v10172_v41 = vmul.f32 %v9946_v22, %v6054_v56  ;;  %v10207_v27 = vpop.f32.mrf.mxu1 }
 0x220   : > { %v5848_v6 = vmul.f32 %v9595_v7, %v5696_v21  ;;  %v5880_v30 = vmul.f32 %v9895_v5, %v5728_v14  ;;  %v10175_v20 = vmul.f32 %v9968_v13, %v6118_v37  ;;  %v5153_v37 = vadd.f32 %v4961_v10, %v10054_v58 }
 0x221   : > { %11857 = vst [vmem:[#allocation42_spill] sm:$0xff] %v10172_v41  ;;  %v10178_v39 = vmul.f32 %v9999_v23, %v6150_v17  ;;  %v5928_v21 = vadd.f32 %v9682_v59, %v5784_v33  ;;  %v10186_v45 = vadd.f32 %v9770_v38, %v5816_v32  ;;  %v4723_v17 = vadd.f32 %v10085_v15, %v10009_v16  ;;  %v10198_v32 = vpop.f32.mrf.mxu0 }
 0x222   : > { %11858 = vst [vmem:[#allocation43_spill] sm:$0xff] %v10175_v20  ;;  %v5992_v44 = vadd.f32 %v9915_v31, %v5848_v6  ;;  %v6024_v56 = vadd.f32 %v9970_v3, %v5880_v30  ;;  %v4963_v36 = vmul.f32 %v10085_v15, %v10085_v15  ;;  %v4714_v29 = vadd.f32 %v10110_v54, %v10032_v50 }
 0x223   : > { %11859 = vst [vmem:[#allocation44_spill] sm:$0xff] %v10178_v39  ;;  %11860 = vst [vmem:[#allocation45_spill] sm:$0xff] %v10186_v45  ;;  %v6056_v60 = vmax.f32 %v5928_v21, 0.0  ;;  %v4962_v58 = vmul.f32 %v10110_v54, %v10110_v54  ;;  %v4732_v30 = vadd.f32 %v10124_v34, %v10047_v11  ;;  %v4964_v10 = vmul.f32 %v10124_v34, %v10124_v34 }
 0x224   : > { %v6120_v14 = vmax.f32 %v5992_v44, 0.0  ;;  %v6152_v33 = vmax.f32 %v6024_v56, 0.0  ;;  %v5171_v6 = vadd.f32 %v4963_v36, %v10058_v28  ;;  %v4706_v28 = vadd.f32 %v4705_v9, %v10142_v42  ;;  %v10230_v9 = vpop.f32.mrf.mxu0 }
 0x225   : > { %v10210_v21 = vmul.f32 %v9946_v22, %v6056_v60  ;;  %v5162_v36 = vadd.f32 %v4962_v58, %v10062_v35  ;;  %v5180_v19 = vadd.f32 %v4964_v10, %v10102_v61  ;;  %v4993_v39 = vmul.f32 %v10142_v42, %v10142_v42  ;;  %v10237_v10 = vpop.f32.mrf.mxu1 }
 0x226   : > { %v10213_v44 = vmul.f32 %v9968_v13, %v6120_v14  ;;  %v10216_v56 = vmul.f32 %v9999_v23, %v6152_v33  ;;  %v4724_v20 = vadd.f32 %v4723_v17, %v10150_v62  ;;  %v4995_v60 = vmul.f32 %v10150_v62, %v10150_v62 }
 0x227   : > { %11861 = vst [vmem:[#allocation46_spill] sm:$0xff] %v10210_v21  ;;  %v4715_v14 = vadd.f32 %v4714_v29, %v10169_v8  ;;  %v4994_v33 = vmul.f32 %v10169_v8, %v10169_v8  ;;  %v5154_v35 = vadd.f32 %v5153_v37, %v4993_v39  ;;  %v4996_v61 = vmul.f32 %v10182_v52, %v10182_v52 }
 0x228   : > { %11862 = vst [vmem:[#allocation47_spill] sm:$0xff] %v10213_v44  ;;  %11863 = vst [vmem:[#allocation48_spill] sm:$0xff] %v10216_v56  ;;  %v4733_v56 = vadd.f32 %v4732_v30, %v10182_v52  ;;  %v4707_v58 = vadd.f32 %v4706_v28, %v10198_v32  ;;  %v5025_v17 = vmul.f32 %v10198_v32, %v10198_v32 }
 0x229   : > { %v5172_v44 = vadd.f32 %v5171_v6, %v4995_v60  ;;  %v5163_v29 = vadd.f32 %v5162_v36, %v4994_v33  ;;  %v4725_v21 = vadd.f32 %v4724_v20, %v10207_v27  ;;  %v5027_v30 = vmul.f32 %v10207_v27, %v10207_v27 }
 0x22a   : > { %v5181_v41 = vadd.f32 %v5180_v19, %v4996_v61  ;;  %v4708_v47 = vrot.slane %v4707_v58, 4  ;;  %v5155_v39 = vadd.f32 %v5154_v35, %v5025_v17  ;;  %v4716_v37 = vadd.f32 %v4715_v14, %v10230_v9 }
 0x22b   : > { %v4726_v51 = vrot.slane %v4725_v21, 4  ;;  %v5173_v55 = vadd.f32 %v5172_v44, %v5027_v30  ;;  %v5026_v28 = vmul.f32 %v10230_v9, %v10230_v9  ;;  %v4734_v1 = vadd.f32 %v4733_v56, %v10237_v10 }
 0x22c   : > { %v4709_v57 = vadd.f32 %v4708_v47, %v4707_v58  ;;  %v5156_v6 = vrot.slane %v5155_v39, 4  ;;  %v4717_v36 = vrot.slane %v4716_v37, 4  ;;  %v5028_v20 = vmul.f32 %v10237_v10, %v10237_v10 }
 0x22d   : > { %v4727_v60 = vadd.f32 %v4726_v51, %v4725_v21  ;;  %v5174_v33 = vrot.slane %v5173_v55, 4  ;;  %v5164_v19 = vadd.f32 %v5163_v29, %v5026_v28  ;;  %v4735_v61 = vrot.slane %v4734_v1, 4 }
 0x22e   : > { %v4710_v35 = vrot.slane %v4709_v57, 2  ;;  %v5157_v17 = vadd.f32 %v5156_v6, %v5155_v39  ;;  %v4718_v14 = vadd.f32 %v4717_v36, %v4716_v37  ;;  %v5182_v48 = vadd.f32 %v5181_v41, %v5028_v20 }
 0x22f   : > { %v4728_v44 = vrot.slane %v4727_v60, 2  ;;  %v5175_v30 = vadd.f32 %v5174_v33, %v5173_v55  ;;  %v5165_v2 = vrot.slane %v5164_v19, 4  ;;  %v4736_v46 = vadd.f32 %v4735_v61, %v4734_v1 }
 0x230   : > { %v4711_v45 = vadd.f32 %v4710_v35, %v4709_v57  ;;  %v5158_v56 = vrot.slane %v5157_v17, 2  ;;  %v4719_v47 = vrot.slane %v4718_v14, 2  ;;  %v5183_v58 = vrot.slane %v5182_v48, 4 }
 0x231   : > { %v4729_v18 = vadd.f32 %v4728_v44, %v4727_v60  ;;  %v5176_v4 = vrot.slane %v5175_v30, 2  ;;  %v5166_v26 = vadd.f32 %v5165_v2, %v5164_v19  ;;  %v4737_v23 = vrot.slane %v4736_v46, 2 }
 0x232   : > { %v4712_v51 = vrot.slane %v4711_v45, 1  ;;  %v5159_v21 = vadd.f32 %v5158_v56, %v5157_v17  ;;  %v4720_v29 = vadd.f32 %v4719_v47, %v4718_v14  ;;  %v5184_v28 = vadd.f32 %v5183_v58, %v5182_v48  ;;  %v11877_v58 = vld [vmem:[#allocation21_spill] sm:$0xff] }
 0x233   : > { %v4730_v13 = vrot.slane %v4729_v18, 1  ;;  %v5177_v39 = vadd.f32 %v5176_v4, %v5175_v30  ;;  %v5167_v37 = vrot.slane %v5166_v26, 2  ;;  %v4738_v41 = vadd.f32 %v4737_v23, %v4736_v46  ;;  %v11881_v23 = vld [vmem:[#allocation3_spill] sm:$0xff] }
 0x234   : > { %v4713_v6 = vadd.f32 %v4712_v51, %v4711_v45  ;;  %v5160_v55 = vrot.slane %v5159_v21, 1  ;;  %v4721_v36 = vrot.slane %v4720_v29, 1  ;;  %v5185_v1 = vrot.slane %v5184_v28, 2  ;;  %v11875_v51 = vld [vmem:[#allocation30_spill] sm:$0xff] }
 0x235   : > { %v4731_v57 = vadd.f32 %v4730_v13, %v4729_v18  ;;  %v5178_v20 = vrot.slane %v5177_v39, 1  ;;  %v5168_v33 = vadd.f32 %v5167_v37, %v5166_v26  ;;  %v4739_v61 = vrot.slane %v4738_v41, 1 }
 0x236   : > { %v10248_v60 = vmul.f32 0.03125, %v4713_v6  ;;  %v5161_v2 = vadd.f32 %v5160_v55, %v5159_v21  ;;  %v4722_v19 = vadd.f32 %v4721_v36, %v4720_v29  ;;  %v5186_v35 = vadd.f32 %v5185_v1, %v5184_v28  ;;  %v11864_v55 = vld [vmem:[#allocation15_spill] sm:$0xff]  ;;  %v11874_v29 = vld [vmem:[#allocation32_spill] sm:$0xff] }
 0x237   : > { %v10250_v17 = vmul.f32 0.03125, %v4731_v57  ;;  %v5179_v48 = vadd.f32 %v5178_v20, %v5177_v39  ;;  %v5169_v14 = vrot.slane %v5168_v33, 1  ;;  %v4740_v4 = vadd.f32 %v4739_v61, %v4738_v41 }
 0x238   : > { %v5345_v44 = vmul.f32 0.03125, %v5161_v2  ;;  %v5377_v46 = vmul.f32 %v10248_v60, %v10248_v60  ;;  %v10272_v28 = vmul.f32 0.03125, %v4722_v19  ;;  %v5187_v6 = vrot.slane %v5186_v35, 1  ;;  %v11872_v19 = vld [vmem:[#allocation23_spill] sm:$0xff] }
 0x239   : > { %v5347_v45 = vmul.f32 0.03125, %v5179_v48  ;;  %v5379_v30 = vmul.f32 %v10250_v17, %v10250_v17  ;;  %v5170_v39 = vadd.f32 %v5169_v14, %v5168_v33  ;;  %v10274_v41 = vmul.f32 0.03125, %v4740_v4 }
 0x23a   : > { %v5409_v56 = vsub.f32 %v5345_v44, %v5377_v46  ;;  %v10278_v36 = vadd.f32 %v9915_v31, %v11864_v55  ;;  %v5378_v20 = vmul.f32 %v10272_v28, %v10272_v28  ;;  %v5188_v14 = vadd.f32 %v5187_v6, %v5186_v35  ;;  %v11867_v55 = vld [vmem:[#allocation13_spill] sm:$0xff] }
 0x23b   : > { %v5411_v21 = vsub.f32 %v5347_v45, %v5379_v30  ;;  %v5346_v57 = vmul.f32 0.03125, %v5170_v39  ;;  %v5380_v4 = vmul.f32 %v10274_v41, %v10274_v41  ;;  %v11865_v39 = vld [vmem:[#allocation18_spill] sm:$0xff]  ;;  %v11870_v45 = vld [vmem:[#allocation20_spill] sm:$0xff]  ;;  %v6048_v2 = vmax.f32 %v11872_v19, 0.0 }
 0x23c   : > { %v5569_v37 = vadd.f32 1e-05, %v5409_v56  ;;  %v10302_v35 = vadd.f32 %v9915_v31, %v11865_v39  ;;  %v6046_v46 = vmax.f32 %v11870_v45, 0.0  ;;  %v11879_v45 = vld [vmem:[#allocation27_spill] sm:$0xff] }
 0x23d   : > { %v5571_v1 = vadd.f32 1e-05, %v5411_v21  ;;  %v5410_v48 = vsub.f32 %v5346_v57, %v5378_v20  ;;  %v5348_v21 = vmul.f32 0.03125, %v5188_v14  ;;  %v10314_v57 = vadd.f32 %v9915_v31, %v9825_v49  ;;  %v11871_v49 = vld [vmem:[#allocation19_spill] sm:$0xff] }
 0x23e   : > { %7775 = vrsqrt.f32 %v5569_v37  ;;  %v11866_v37 = vld [vmem:[#allocation16_spill] sm:$0xff]  ;;  %v10318_v20 = vadd.f32 %v9915_v31, %v9876_v63  ;;  %v6047_v44 = vmax.f32 %v11871_v49, 0.0  ;;  %v11873_v63 = vld [vmem:[#allocation29_spill] sm:$0xff]  ;;  %v11880_v49 = vld [vmem:[#allocation26_spill] sm:$0xff]  ;;  %v10362_v47 = vmul.f32 %v9946_v22, %v6048_v2 }
 0x23f   : > { %7777 = vrsqrt.f32 %v5571_v1  ;;  %v5570_v56 = vadd.f32 1e-05, %v5410_v48  ;;  %v10306_v6 = vadd.f32 %v9915_v31, %v11866_v37  ;;  %v10310_v1 = vadd.f32 %v9915_v31, %v11867_v55  ;;  %v11868_v48 = vld [vmem:[#allocation28_spill] sm:$0xff]  ;;  %v11869_v55 = vld [vmem:[#allocation17_spill] sm:$0xff] }
 0x240   : > { %v10322_v14 = vadd.f32 %v9915_v31, %v11868_v48  ;;  %v5412_v39 = vsub.f32 %v5348_v21, %v5380_v4  ;;  %v10326_v37 = vadd.f32 %v9915_v31, %v9913_v24  ;;  %v6045_v30 = vmax.f32 %v11869_v55, 0.0  ;;  %v11876_v21 = vld [vmem:[#allocation25_spill] sm:$0xff]  ;;  %v11878_v55 = vld [vmem:[#allocation22_spill] sm:$0xff]  ;;  %11884 = vst [vmem:[#allocation18_spill] sm:$0xff] %v10362_v47 }
 0x241   : > { %7779 = vrsqrt.f32 %v5570_v56  ;;  %v6049_v33 = vmax.f32 %v11873_v63, 0.0  ;;  %v6050_v48 = vmax.f32 %v11874_v29, 0.0  ;;  %v6051_v56 = vmax.f32 %v11875_v51, 0.0 }
 0x242   : > { %v5572_v61 = vadd.f32 1e-05, %v5412_v39  ;;  %v11882_v39 = vld [vmem:[#allocation31_spill] sm:$0xff]  ;;  %v10353_v13 = vmul.f32 %v9946_v22, %v6045_v30  ;;  %v10356_v29 = vmul.f32 %v9946_v22, %v6046_v46  ;;  %v10359_v4 = vmul.f32 %v9946_v22, %v6047_v44 }
 0x243   : > { %v10365_v18 = vmul.f32 %v9946_v22, %v6049_v33  ;;  %v10368_v19 = vmul.f32 %v9946_v22, %v6050_v48  ;;  %v10371_v63 = vmul.f32 %v9946_v22, %v6051_v56  ;;  %v11888_v46 = vsub.f32 %v10004_v25, %v10248_v60 }
 0x244   : > { %7781 = vrsqrt.f32 %v5572_v61  ;;  %11883 = vst [vmem:[#allocation15_spill] sm:$0xff] %v10359_v4  ;;  %v11889_v44 = vsub.f32 %v10082_v43, %v10248_v60  ;;  %v11890_v2 = vsub.f32 %v10142_v42, %v10248_v60  ;;  %v11891_v48 = vsub.f32 %v10198_v32, %v10248_v60 }
 0x245   : > { %11885 = vst [vmem:[#allocation16_spill] sm:$0xff] %v10365_v18  ;;  %11886 = vst [vmem:[#allocation13_spill] sm:$0xff] %v10368_v19  ;;  %v11892_v56 = vsub.f32 %v10009_v16, %v10250_v17  ;;  %v11893_v25 = vsub.f32 %v10085_v15, %v10250_v17  ;;  %v11894_v43 = vsub.f32 %v10150_v62, %v10250_v17 }
 0x246   : > { %11887 = vst [vmem:[#allocation28_spill] sm:$0xff] %v10371_v63  ;;  %v11895_v42 = vsub.f32 %v10207_v27, %v10250_v17 }
 0x24b   : > { %v7776_v24 = vpop.eup %7775 }
 0x24c   : > { %v7778_v30 = vpop.eup %7777  ;;  %v5633_v61 = vmul.f32 %v7776_v24, %v11888_v46  ;;  %v5665_v51 = vmul.f32 %v7776_v24, %v11889_v44  ;;  %v5697_v33 = vmul.f32 %v7776_v24, %v11890_v2  ;;  %v5729_v26 = vmul.f32 %v7776_v24, %v11891_v48 }
 0x24d   : > { %v5635_v63 = vmul.f32 %v7778_v30, %v11892_v56  ;;  %v5667_v46 = vmul.f32 %v7778_v30, %v11893_v25  ;;  %v5699_v44 = vmul.f32 %v7778_v30, %v11894_v43  ;;  %v5731_v2 = vmul.f32 %v7778_v30, %v11895_v42  ;;  %v10413_v42 = vpop.permute.xlu0 %6178 }
 0x24e   : > { %v5785_v19 = vmul.f32 %v9540_v0, %v5633_v61  ;;  %v5817_v32 = vmul.f32 %v9724_v53, %v5665_v51  ;;  %v5849_v60 = vmul.f32 %v9595_v7, %v5697_v33  ;;  %v5881_v16 = vmul.f32 %v9895_v5, %v5729_v26  ;;  %v7780_v56 = vpop.eup %7779 }
 0x24f   : > { %v5787_v24 = vmul.f32 %v9540_v0, %v5635_v63  ;;  %v5819_v15 = vmul.f32 %v9724_v53, %v5667_v46  ;;  %v5851_v48 = vmul.f32 %v9595_v7, %v5699_v44  ;;  %v5883_v62 = vmul.f32 %v9895_v5, %v5731_v2 }
 0x250   : > { %v5929_v27 = vadd.f32 %v9682_v59, %v5785_v19  ;;  %v5961_v17 = vadd.f32 %v9770_v38, %v5817_v32  ;;  %v5993_v61 = vadd.f32 %v9915_v31, %v5849_v60  ;;  %v6025_v51 = vadd.f32 %v9970_v3, %v5881_v16 }
 0x251   : > { %v5931_v30 = vadd.f32 %v9682_v59, %v5787_v24  ;;  %v5963_v26 = vadd.f32 %v9770_v38, %v5819_v15  ;;  %v5995_v63 = vadd.f32 %v9915_v31, %v5851_v48  ;;  %v6027_v33 = vadd.f32 %v9970_v3, %v5883_v62  ;;  %v7782_v18 = vpop.eup %7781  ;;  %v11896_v15 = vld [vmem:[#allocation33_spill] sm:$0xff] }
 0x252   : > { %v6057_v25 = vmax.f32 %v5929_v27, 0.0  ;;  %v6089_v46 = vmax.f32 %v5961_v17, 0.0  ;;  %v6121_v43 = vmax.f32 %v5993_v61, 0.0  ;;  %v6153_v44 = vmax.f32 %v6025_v51, 0.0  ;;  %v11897_v48 = vld [vmem:[#allocation9_spill] sm:$0xff] }
 0x253   : > { %v6059_v19 = vmax.f32 %v5931_v30, 0.0  ;;  %v6091_v2 = vmax.f32 %v5963_v26, 0.0  ;;  %v6123_v32 = vmax.f32 %v5995_v63, 0.0  ;;  %v6155_v60 = vmax.f32 %v6027_v33, 0.0 }
 0x254   : > { %v6201_v16 = vmul.f32 %v9946_v22, %v6057_v25  ;;  %v6233_v24 = vmul.f32 %v10413_v42, %v6089_v46  ;;  %v6265_v47 = vmul.f32 %v11896_v15, %v6121_v43  ;;  %v6297_v4 = vmul.f32 %v11897_v48, %v6153_v44 }
 0x255   : > { %v6203_v62 = vmul.f32 %v9946_v22, %v6059_v19  ;;  %v6235_v27 = vmul.f32 %v10413_v42, %v6091_v2  ;;  %v6267_v17 = vmul.f32 %v11896_v15, %v6123_v32  ;;  %v6299_v61 = vmul.f32 %v11897_v48, %v6155_v60 }
 0x256   : > { %v6425_v51 = vadd.f32 %v6233_v24, %v6201_v16  ;;  %v11898_v30 = vsub.f32 %v10032_v50, %v10272_v28  ;;  %v11899_v63 = vsub.f32 %v10110_v54, %v10272_v28  ;;  %v11900_v25 = vsub.f32 %v10169_v8, %v10272_v28 }
 0x257   : > { %v6443_v43 = vadd.f32 %v6235_v27, %v6203_v62  ;;  %v11901_v44 = vsub.f32 %v10230_v9, %v10272_v28  ;;  %v11902_v2 = vsub.f32 %v10047_v11, %v10274_v41  ;;  %v11903_v50 = vsub.f32 %v10124_v34, %v10274_v41 }
 0x258   : > { %v5634_v26 = vmul.f32 %v7780_v56, %v11898_v30  ;;  %v5666_v33 = vmul.f32 %v7780_v56, %v11899_v63  ;;  %v5698_v46 = vmul.f32 %v7780_v56, %v11900_v25  ;;  %v6426_v16 = vadd.f32 %v6425_v51, %v6265_v47 }
 0x259   : > { %v5730_v19 = vmul.f32 %v7780_v56, %v11901_v44  ;;  %v5636_v32 = vmul.f32 %v7782_v18, %v11902_v2  ;;  %v5668_v60 = vmul.f32 %v7782_v18, %v11903_v50  ;;  %v6444_v62 = vadd.f32 %v6443_v43, %v6267_v17 }
 0x25a   : > { %v5786_v54 = vmul.f32 %v9540_v0, %v5634_v26  ;;  %v5818_v24 = vmul.f32 %v9724_v53, %v5666_v33  ;;  %v5850_v8 = vmul.f32 %v9595_v7, %v5698_v46  ;;  %v11904_v9 = vsub.f32 %v10182_v52, %v10274_v41 }
 0x25b   : > { %v5882_v27 = vmul.f32 %v9895_v5, %v5730_v19  ;;  %v11905_v11 = vsub.f32 %v10237_v10, %v10274_v41  ;;  %v6427_v34 = vadd.f32 %v6426_v16, %v6297_v4  ;;  %v6445_v26 = vadd.f32 %v6444_v62, %v6299_v61 }
 0x25c   : > { %v5700_v28 = vmul.f32 %v7782_v18, %v11904_v9  ;;  %v5930_v47 = vadd.f32 %v9682_v59, %v5786_v54  ;;  %v5962_v51 = vadd.f32 %v9770_v38, %v5818_v24  ;;  %v5994_v30 = vadd.f32 %v9915_v31, %v5850_v8 }
 0x25d   : > { %v5732_v56 = vmul.f32 %v7782_v18, %v11905_v11  ;;  %v6026_v17 = vadd.f32 %v9970_v3, %v5882_v27  ;;  %v5788_v63 = vmul.f32 %v9540_v0, %v5636_v32  ;;  %v5820_v33 = vmul.f32 %v9724_v53, %v5668_v60 }
 0x25e   : > { %v6428_v52 = vrot.slane %v6427_v34, 4  ;;  %v6058_v25 = vmax.f32 %v5930_v47, 0.0  ;;  %v6090_v46 = vmax.f32 %v5962_v51, 0.0  ;;  %v6122_v43 = vmax.f32 %v5994_v30, 0.0 }
 0x25f   : > { %v6446_v10 = vrot.slane %v6445_v26, 4  ;;  %v6154_v18 = vmax.f32 %v6026_v17, 0.0  ;;  %v5852_v41 = vmul.f32 %v9595_v7, %v5700_v28  ;;  %v5884_v4 = vmul.f32 %v9895_v5, %v5732_v56 }
 0x260   : > { %v6429_v44 = vadd.f32 %v6428_v52, %v6427_v34  ;;  %v6202_v19 = vmul.f32 %v9946_v22, %v6058_v25  ;;  %v6234_v61 = vmul.f32 %v10413_v42, %v6090_v46  ;;  %v6266_v2 = vmul.f32 %v11896_v15, %v6122_v43 }
 0x261   : > { %v6447_v32 = vadd.f32 %v6446_v10, %v6445_v26  ;;  %v6298_v50 = vmul.f32 %v11897_v48, %v6154_v18  ;;  %v5932_v60 = vadd.f32 %v9682_v59, %v5788_v63  ;;  %v5964_v16 = vadd.f32 %v9770_v38, %v5820_v33 }
 0x262   : > { %v6430_v54 = vrot.slane %v6429_v44, 2  ;;  %v6434_v24 = vadd.f32 %v6234_v61, %v6202_v19  ;;  %v5996_v8 = vadd.f32 %v9915_v31, %v5852_v41  ;;  %v6028_v62 = vadd.f32 %v9970_v3, %v5884_v4 }
 0x263   : > { %v6448_v27 = vrot.slane %v6447_v32, 2  ;;  %v6060_v9 = vmax.f32 %v5932_v60, 0.0  ;;  %v6092_v28 = vmax.f32 %v5964_v16, 0.0  ;;  %v11906_v11 = vmax.f32 %v9923_v40, 0.0 }
 0x264   : > { %v6431_v34 = vadd.f32 %v6430_v54, %v6429_v44  ;;  %v6435_v47 = vadd.f32 %v6434_v24, %v6266_v2  ;;  %v6124_v51 = vmax.f32 %v5996_v8, 0.0  ;;  %v6156_v30 = vmax.f32 %v6028_v62, 0.0 }
 0x265   : > { %v10470_v56 = vmul.f32 %v9946_v22, %v11906_v11  ;;  %v6449_v26 = vadd.f32 %v6448_v27, %v6447_v32  ;;  %v6204_v17 = vmul.f32 %v9946_v22, %v6060_v9  ;;  %v6236_v63 = vmul.f32 %v10413_v42, %v6092_v28  ;;  %v11915_v9 = vld [vmem:[#allocation24_spill] sm:$0xff]  ;;  %v11917_v11 = vld [vmem:[#allocation41_spill] sm:$0xff] }
 0x266   : > { %v11907_v33 = vmax.f32 %v11876_v21, 0.0  ;;  %v6432_v25 = vrot.slane %v6431_v34, 1  ;;  %v6436_v46 = vadd.f32 %v6435_v47, %v6298_v50  ;;  %v6268_v40 = vmul.f32 %v11896_v15, %v6124_v51  ;;  %v11919_v51 = vld [vmem:[#allocation37_spill] sm:$0xff] }
 0x267   : > { %v6300_v43 = vmul.f32 %v11897_v48, %v6156_v30  ;;  %v6450_v10 = vrot.slane %v6449_v26, 1  ;;  %v6452_v18 = vadd.f32 %v6236_v63, %v6204_v17  ;;  %v11908_v41 = vmax.f32 %v11877_v58, 0.0 }
 0x268   : > { %v6221_v52 = vmul.f32 %v10413_v42, %v11907_v33  ;;  %v11909_v44 = vmax.f32 %v11878_v55, 0.0  ;;  %v10485_v61 = vadd.f32 %v6432_v25, %v6431_v34  ;;  %v6437_v21 = vrot.slane %v6436_v46, 4 }
 0x269   : > { %v6222_v4 = vmul.f32 %v10413_v42, %v11908_v41  ;;  %v11910_v2 = vmax.f32 %v11879_v45, 0.0  ;;  %v11911_v50 = vmax.f32 %v11880_v49, 0.0  ;;  %v10493_v16 = vadd.f32 %v6450_v10, %v6449_v26  ;;  %v11921_v26 = vld [vmem:[#allocation45_spill] sm:$0xff] }
 0x26a   : > { %v6223_v19 = vmul.f32 %v10413_v42, %v11909_v44  ;;  %v6453_v58 = vadd.f32 %v6452_v18, %v6268_v40  ;;  %v11912_v54 = vmax.f32 %v11881_v23, 0.0  ;;  %v11913_v24 = vmax.f32 %v11882_v39, 0.0 }
 0x26b   : > { %v6224_v32 = vmul.f32 %v10413_v42, %v11910_v2  ;;  %v6225_v60 = vmul.f32 %v10413_v42, %v11911_v50  ;;  %v6438_v62 = vadd.f32 %v6437_v21, %v6436_v46  ;;  %v11914_v45 = vmax.f32 %v9926_v12, 0.0 }
 0x26c   : > { %v6226_v55 = vmul.f32 %v10413_v42, %v11912_v54  ;;  %v6227_v8 = vmul.f32 %v10413_v42, %v11913_v24  ;;  %v11916_v49 = vmax.f32 %v11915_v9, 0.0  ;;  %v11918_v34 = vmax.f32 %v11917_v11, 0.0  ;;  %v11931_v9 = vld [vmem:[#allocation15_spill] sm:$0xff]  ;;  %v11932_v11 = vld [vmem:[#allocation18_spill] sm:$0xff] }
 0x26d   : > { %v6228_v27 = vmul.f32 %v10413_v42, %v11914_v45  ;;  %v6454_v47 = vadd.f32 %v6453_v58, %v6300_v43  ;;  %v11920_v39 = vmax.f32 %v11919_v51, 0.0  ;;  %v11922_v12 = vmax.f32 %v11921_v26, 0.0 }
 0x26e   : > { %v10507_v28 = vmul.f32 %v10413_v42, %v11916_v49  ;;  %v10512_v23 = vmul.f32 %v10413_v42, %v11918_v34  ;;  %v11923_v63 = vmax.f32 %v10278_v36, 0.0  ;;  %v6439_v25 = vrot.slane %v6438_v62, 2  ;;  %v11933_v34 = vld [vmem:[#allocation16_spill] sm:$0xff] }
 0x26f   : > { %v10517_v30 = vmul.f32 %v10413_v42, %v11920_v39  ;;  %v10522_v17 = vmul.f32 %v10413_v42, %v11922_v12  ;;  %v11924_v46 = vmax.f32 %v10302_v35, 0.0  ;;  %v11925_v43 = vmax.f32 %v10306_v6, 0.0  ;;  %v11934_v12 = vld [vmem:[#allocation13_spill] sm:$0xff] }
 0x270   : > { %v6253_v33 = vmul.f32 %v11896_v15, %v11923_v63  ;;  %v11926_v18 = vmax.f32 %v10310_v1, 0.0  ;;  %v6455_v44 = vrot.slane %v6454_v47, 4  ;;  %v11927_v21 = vmax.f32 %v10314_v57, 0.0 }
 0x271   : > { %v6254_v40 = vmul.f32 %v11896_v15, %v11924_v46  ;;  %v6255_v10 = vmul.f32 %v11896_v15, %v11925_v43  ;;  %v11928_v2 = vmax.f32 %v10318_v20, 0.0  ;;  %v11929_v35 = vmax.f32 %v10322_v14, 0.0 }
 0x272   : > { %v6256_v41 = vmul.f32 %v11896_v15, %v11926_v18  ;;  %v6257_v36 = vmul.f32 %v11896_v15, %v11927_v21  ;;  %v6440_v6 = vadd.f32 %v6439_v25, %v6438_v62  ;;  %v11930_v54 = vmax.f32 %v10326_v37, 0.0 }
 0x273   : > { %v6258_v50 = vmul.f32 %v11896_v15, %v11928_v2  ;;  %v6259_v58 = vmul.f32 %v11896_v15, %v11929_v35  ;;  %v6317_v24 = vadd.f32 %v6221_v52, %v10353_v13  ;;  %v6326_v45 = vadd.f32 %v6222_v4, %v10356_v29  ;;  %v11935_v13 = vld [vmem:[#allocation11_spill] sm:$0xff]  ;;  %v11936_v52 = vld [vmem:[#allocation12_spill] sm:$0xff] }
 0x274   : > { %v6260_v1 = vmul.f32 %v11896_v15, %v11930_v54  ;;  %v6456_v57 = vadd.f32 %v6455_v44, %v6454_v47  ;;  %v6335_v49 = vadd.f32 %v6223_v19, %v11931_v9  ;;  %v6344_v20 = vadd.f32 %v6224_v32, %v11932_v11  ;;  %v11937_v32 = vld [vmem:[#allocation4_spill] sm:$0xff]  ;;  %v11940_v2 = vld [vmem:[#allocation7_spill] sm:$0xff] }
 0x275   : > { %v6353_v51 = vadd.f32 %v6225_v60, %v11933_v34  ;;  %v6441_v39 = vrot.slane %v6440_v6, 1  ;;  %v6318_v14 = vadd.f32 %v6317_v24, %v6253_v33  ;;  %v6327_v26 = vadd.f32 %v6326_v45, %v6254_v40  ;;  %v11938_v60 = vld [vmem:[#allocation5_spill] sm:$0xff]  ;;  %v11939_v33 = vld [vmem:[#allocation6_spill] sm:$0xff] }
 0x276   : > { %v6362_v62 = vadd.f32 %v6226_v55, %v11934_v12  ;;  %v6457_v63 = vrot.slane %v6456_v57, 2  ;;  %v6336_v37 = vadd.f32 %v6335_v49, %v6255_v10  ;;  %v6345_v25 = vadd.f32 %v6344_v20, %v6256_v41  ;;  %v11941_v41 = vld [vmem:[#allocation28_spill] sm:$0xff] }
 0x277   : > { %v6354_v46 = vadd.f32 %v6353_v51, %v6257_v36  ;;  %v10554_v43 = vadd.f32 %v6441_v39, %v6440_v6  ;;  %v6319_v29 = vadd.f32 %v6318_v14, %v11935_v13  ;;  %v6328_v4 = vadd.f32 %v6327_v26, %v11936_v52  ;;  %v11942_v26 = vld [vmem:[#allocation8_spill] sm:$0xff] }
 0x278   : > { %v6363_v19 = vadd.f32 %v6362_v62, %v6258_v50  ;;  %v6458_v47 = vadd.f32 %v6457_v63, %v6456_v57  ;;  %v6337_v18 = vadd.f32 %v6336_v37, %v11937_v32  ;;  %v6346_v44 = vadd.f32 %v6345_v25, %v11938_v60 }
 0x279   : > { %v6355_v40 = vadd.f32 %v6354_v46, %v11939_v33  ;;  %v6320_v21 = vrot.slane %v6319_v29, 4  ;;  %v6329_v55 = vrot.slane %v6328_v4, 4  ;;  %v6371_v36 = vadd.f32 %v6227_v8, %v11941_v41 }
 0x27a   : > { %v6364_v10 = vadd.f32 %v6363_v19, %v11940_v2  ;;  %v6459_v35 = vrot.slane %v6458_v47, 1  ;;  %v6338_v6 = vrot.slane %v6337_v18, 4  ;;  %v6347_v54 = vrot.slane %v6346_v44, 4  ;;  %v10568_v2 = vpop.permute.xlu0 %6608 }
 0x27b   : > { %v6356_v24 = vrot.slane %v6355_v40, 4  ;;  %v6321_v45 = vadd.f32 %v6320_v21, %v6319_v29  ;;  %v6330_v9 = vadd.f32 %v6329_v55, %v6328_v4  ;;  %v6372_v57 = vadd.f32 %v6371_v36, %v6259_v58  ;;  %v11943_v21 = vld [vmem:[#allocation14_spill] sm:$0xff]  ;;  %v10570_v36 = vpop.f32.mrf.mxu0 }
 0x27c   : > { %v6365_v50 = vrot.slane %v6364_v10, 4  ;;  %v10563_v49 = vadd.f32 %v6459_v35, %v6458_v47  ;;  %v6339_v11 = vadd.f32 %v6338_v6, %v6337_v18  ;;  %v6348_v20 = vadd.f32 %v6347_v54, %v6346_v44 }
 0x27d   : > { %v6357_v34 = vadd.f32 %v6356_v24, %v6355_v40  ;;  %v6322_v51 = vrot.slane %v6321_v45, 2  ;;  %v6331_v39 = vrot.slane %v6330_v9, 2  ;;  %v6373_v12 = vadd.f32 %v6372_v57, %v11942_v26  ;;  %v11945_v57 = vld [vmem:[#allocation42_spill] sm:$0xff] }
 0x27e   : > { %v6366_v14 = vadd.f32 %v6365_v50, %v6364_v10  ;;  %v6340_v62 = vrot.slane %v6339_v11, 2  ;;  %v6349_v8 = vrot.slane %v6348_v20, 2  ;;  %v6380_v37 = vadd.f32 %v6228_v27, %v10470_v56 }
 0x27f   : > { %v6358_v63 = vrot.slane %v6357_v34, 2  ;;  %v6323_v25 = vadd.f32 %v6322_v51, %v6321_v45  ;;  %v6332_v46 = vadd.f32 %v6331_v39, %v6330_v9  ;;  %v6374_v29 = vrot.slane %v6373_v12, 4  ;;  %v11944_v9 = vld [vmem:[#allocation34_spill] sm:$0xff] }
 0x280   : > { %v6367_v13 = vrot.slane %v6366_v14, 2  ;;  %v6341_v58 = vadd.f32 %v6340_v62, %v6339_v11  ;;  %v6350_v52 = vadd.f32 %v6349_v8, %v6348_v20  ;;  %v6381_v19 = vadd.f32 %v6380_v37, %v6260_v1  ;;  %v10576_v20 = vpop.f32.mrf.mxu1  ;;  %v11946_v51 = vld [vmem:[#allocation38_spill] sm:$0xff]  ;;  %v11948_v8 = vld [vmem:[#allocation35_spill] sm:$0xff] }
 0x281   : > { %v6359_v4 = vadd.f32 %v6358_v63, %v6357_v34  ;;  %v6324_v47 = vrot.slane %v6323_v25, 1  ;;  %v6333_v32 = vrot.slane %v6332_v46, 1  ;;  %v6375_v60 = vadd.f32 %v6374_v29, %v6373_v12  ;;  %v11949_v37 = vld [vmem:[#allocation43_spill] sm:$0xff] }
 0x282   : > { %v6368_v18 = vadd.f32 %v6367_v13, %v6366_v14  ;;  %v6342_v44 = vrot.slane %v6341_v58, 1  ;;  %v6351_v33 = vrot.slane %v6350_v52, 1  ;;  %v6382_v55 = vadd.f32 %v6381_v19, %v11943_v21  ;;  %v11947_v14 = vld [vmem:[#allocation46_spill] sm:$0xff]  ;;  %v11950_v13 = vld [vmem:[#allocation39_spill] sm:$0xff]  ;;  %v11955_v21 = vld [vmem:[#allocation48_spill] sm:$0xff] }
 0x283   : > { %v6360_v40 = vrot.slane %v6359_v4, 1  ;;  %v6325_v56 = vadd.f32 %v6324_v47, %v6323_v25  ;;  %v6334_v27 = vadd.f32 %v6333_v32, %v6332_v46  ;;  %v6376_v41 = vrot.slane %v6375_v60, 2  ;;  %v10586_v46 = vpop.f32.mrf.mxu0  ;;  %v11953_v47 = vld [vmem:[#allocation44_spill] sm:$0xff] }
 0x284   : > { %v6369_v10 = vrot.slane %v6368_v18, 1  ;;  %v6343_v35 = vadd.f32 %v6342_v44, %v6341_v58  ;;  %v6352_v6 = vadd.f32 %v6351_v33, %v6350_v52  ;;  %v6383_v54 = vrot.slane %v6382_v55, 4  ;;  %v11951_v58 = vld [vmem:[#allocation47_spill] sm:$0xff]  ;;  %v11954_v33 = vld [vmem:[#allocation40_spill] sm:$0xff] }
 0x285   : > { %v6361_v1 = vadd.f32 %v6360_v40, %v6359_v4  ;;  %v6377_v45 = vadd.f32 %v6376_v41, %v6375_v60  ;;  %v6389_v50 = vadd.f32 %v10507_v28, %v11944_v9  ;;  %v6398_v11 = vadd.f32 %v10512_v23, %v11945_v57  ;;  %v10594_v60 = vpop.f32.mrf.mxu1 }
 0x286   : > { %v6370_v24 = vadd.f32 %v6369_v10, %v6368_v18  ;;  %v6384_v34 = vadd.f32 %v6383_v54, %v6382_v55  ;;  %v6407_v39 = vadd.f32 %v10517_v30, %v11946_v51  ;;  %v6416_v26 = vadd.f32 %v10522_v17, %v11947_v14  ;;  %v11952_v17 = vld [vmem:[#allocation36_spill] sm:$0xff]  ;;  %v10601_v54 = vpop.f32.mrf.mxu0 }
 0x287   : > { %v6611_v12 = vadd.f32 %v10568_v2, %v6325_v56  ;;  %v6378_v62 = vrot.slane %v6377_v45, 1  ;;  %v6390_v63 = vadd.f32 %v6389_v50, %v11948_v8  ;;  %v6399_v25 = vadd.f32 %v6398_v11, %v11949_v37  ;;  %v10609_v51 = vpop.f32.mrf.mxu1 }
 0x288   : > { %v6612_v28 = vadd.f32 %v10568_v2, %v6334_v27  ;;  %v6385_v23 = vrot.slane %v6384_v34, 2  ;;  %v6408_v29 = vadd.f32 %v6407_v39, %v11950_v13  ;;  %v6417_v52 = vadd.f32 %v6416_v26, %v11951_v58  ;;  %v10613_v37 = vpop.f32.mrf.mxu0  ;;  %v11956_v58 = vld [vmem:[#allocation10_spill] sm:$0xff] }
 0x289   : > { %v6613_v30 = vadd.f32 %v10568_v2, %v6343_v35  ;;  %v6379_v4 = vadd.f32 %v6378_v62, %v6377_v45  ;;  %v6391_v19 = vadd.f32 %v6390_v63, %v11952_v17  ;;  %v6400_v32 = vadd.f32 %v6399_v25, %v11953_v47  ;;  %v10618_v17 = vpop.f32.mrf.mxu1 }
 0x28a   : > { %v6614_v18 = vadd.f32 %v10568_v2, %v6352_v6  ;;  %v6386_v44 = vadd.f32 %v6385_v23, %v6384_v34  ;;  %v6409_v40 = vadd.f32 %v6408_v29, %v11954_v33  ;;  %v6418_v55 = vadd.f32 %v6417_v52, %v11955_v21 }
 0x28b   : > { %v6615_v56 = vadd.f32 %v10568_v2, %v6361_v1  ;;  %v6392_v27 = vrot.slane %v6391_v19, 4  ;;  %v6401_v10 = vrot.slane %v6400_v32, 4  ;;  %v6616_v41 = vadd.f32 %v10568_v2, %v6370_v24 }
 0x28c   : > { %v6617_v35 = vadd.f32 %v10568_v2, %v6379_v4  ;;  %v6387_v45 = vrot.slane %v6386_v44, 1  ;;  %v6410_v9 = vrot.slane %v6409_v40, 4  ;;  %v6419_v6 = vrot.slane %v6418_v55, 4 }
 0x28d   : > { %v6623_v50 = vadd.f32 %v10568_v2, %v10485_v61  ;;  %v6393_v57 = vadd.f32 %v6392_v27, %v6391_v19  ;;  %v6402_v11 = vadd.f32 %v6401_v10, %v6400_v32  ;;  %v6624_v34 = vadd.f32 %v10568_v2, %v10554_v43 }
 0x28e   : > { %v6625_v1 = vadd.f32 %v10568_v2, %v10493_v16  ;;  %v6388_v24 = vadd.f32 %v6387_v45, %v6386_v44  ;;  %v6411_v39 = vadd.f32 %v6410_v9, %v6409_v40  ;;  %v6420_v14 = vadd.f32 %v6419_v6, %v6418_v55  ;;  %v10621_v44 = vpop.f32.mrf.mxu0 }
 0x28f   : > { %v6626_v26 = vadd.f32 %v10568_v2, %v10563_v49  ;;  %v6394_v62 = vrot.slane %v6393_v57, 2  ;;  %v6403_v8 = vrot.slane %v6402_v11, 2  ;;  %v6675_v63 = vcombine.low %v6611_v12, %v6612_v28 }
 0x290   : > { %v6676_v61 = vcombine.low %v6613_v30, %v6614_v18  ;;  %v6412_v25 = vrot.slane %v6411_v39, 2  ;;  %v6421_v23 = vrot.slane %v6420_v14, 2  ;;  %v6618_v43 = vadd.f32 %v10568_v2, %v6388_v24  ;;  %v10635_v24 = vpop.f32.mrf.mxu0 }
 0x291   : > { %v6677_v13 = vcombine.low %v6615_v56, %v6616_v41  ;;  %v6395_v16 = vadd.f32 %v6394_v62, %v6393_v57  ;;  %v6404_v29 = vadd.f32 %v6403_v8, %v6402_v11  ;;  %v6685_v52 = vrot.slane %v6675_v63, %v11956_v58 }
 0x292   : > { %v6692_v4 = vrot.slane %v6676_v61, %v11956_v58  ;;  %v6413_v49 = vadd.f32 %v6412_v25, %v6411_v39  ;;  %v6422_v19 = vadd.f32 %v6421_v23, %v6420_v14  ;;  %v6678_v47 = vcombine.low %v6617_v35, %v6618_v43  ;;  %v10626_v35 = vpop.f32.mrf.mxu1 }
 0x293   : > { %v6699_v12 = vrot.slane %v6677_v13, %v11956_v58  ;;  %v6396_v28 = vrot.slane %v6395_v16, 1  ;;  %v6405_v30 = vrot.slane %v6404_v29, 1  ;;  %v6726_v18 = vcombine.low %v6623_v50, %v6624_v34 }
 0x294   : > { %v6707_v32 = vcombine.low %v6685_v52, %v6692_v4  ;;  %v6414_v33 = vrot.slane %v6413_v49, 1  ;;  %v6423_v40 = vrot.slane %v6422_v19, 1  ;;  %v6706_v21 = vrot.slane %v6678_v47, %v11956_v58  ;;  %v10653_v23 = vpop.f32.mrf.mxu1  ;;  %v10665_v47 = vpop.f32.mrf.mxu0 }
 0x295   : > { %v6727_v55 = vcombine.low %v6625_v1, %v6626_v26  ;;  %v6397_v56 = vadd.f32 %v6396_v28, %v6395_v16  ;;  %v6406_v27 = vadd.f32 %v6405_v30, %v6404_v29  ;;  %v6748_v41 = vrot.slane %v6726_v18, %v11956_v58 }
 0x296   : > { %v6715_v10 = vrot.slane %v6707_v32, %v11956_v58  ;;  %v6415_v45 = vadd.f32 %v6414_v33, %v6413_v49  ;;  %v6424_v9 = vadd.f32 %v6423_v40, %v6422_v19  ;;  %v6708_v6 = vcombine.low %v6699_v12, %v6706_v21 }
 0x297   : > { %v6755_v50 = vrot.slane %v6727_v55, %v11956_v58  ;;  %v6619_v57 = vadd.f32 %v10568_v2, %v6397_v56  ;;  %v6620_v11 = vadd.f32 %v10568_v2, %v6406_v27  ;;  %v4933_v34 = vmul.f32 %v10570_v36, %v10570_v36  ;;  %v10678_v55 = vpop.f32.mrf.mxu1 }
 0x298   : > { %v4935_v1 = vmul.f32 %v10576_v20, %v10576_v20  ;;  %v6621_v39 = vadd.f32 %v10568_v2, %v6415_v45  ;;  %v6622_v14 = vadd.f32 %v10568_v2, %v6424_v9  ;;  %v6722_v26 = vrot.slane %v6708_v6, %v11956_v58 }
 0x299   : > { %v6757_v62 = vcombine.low %v6748_v41, %v6755_v50  ;;  %v6724_v8 = vcombine.low %v6619_v57, %v6620_v11  ;;  %v4934_v63 = vmul.f32 %v10586_v46, %v10586_v46  ;;  %v4936_v61 = vmul.f32 %v10594_v60, %v10594_v60  ;;  %v10686_v57 = vpop.f32.mrf.mxu0 }
 0x29a   : > { %v4741_v25 = vadd.f32 %v10601_v54, %v10570_v36  ;;  %v6723_v43 = vcombine.low %v6715_v10, %v6722_v26  ;;  %v6725_v13 = vcombine.low %v6621_v39, %v6622_v14  ;;  %v4965_v29 = vmul.f32 %v10601_v54, %v10601_v54 }
 0x29b   : > { %v6771_v16 = vrot.slane %v6757_v62, %v11956_v58  ;;  %v6734_v52 = vrot.slane %v6724_v8, %v11956_v58  ;;  %v4759_v4 = vadd.f32 %v10609_v51, %v10576_v20  ;;  %v4967_v49 = vmul.f32 %v10609_v51, %v10609_v51 }
 0x29c   : > { %v4750_v19 = vadd.f32 %v10613_v37, %v10586_v46  ;;  %v6741_v12 = vrot.slane %v6725_v13, %v11956_v58  ;;  %6875 = vst [vmem:[%s10645_s16] sm:$0xff] %v6723_v43  ;;  %v5189_v28 = vadd.f32 %v4965_v29, %v4933_v34  ;;  %v4966_v30 = vmul.f32 %v10613_v37, %v10613_v37 }
 0x29d   : > { %v4768_v32 = vadd.f32 %v10618_v17, %v10594_v60  ;;  %v5207_v18 = vadd.f32 %v4967_v49, %v4935_v1  ;;  %v4968_v33 = vmul.f32 %v10618_v17, %v10618_v17  ;;  %v4742_v40 = vadd.f32 %v4741_v25, %v10621_v44 }
 0x29e   : > { %v4997_v21 = vmul.f32 %v10621_v44, %v10621_v44  ;;  %v6756_v56 = vcombine.low %v6734_v52, %v6741_v12  ;;  %v5198_v27 = vadd.f32 %v4966_v30, %v4934_v63  ;;  %v4760_v10 = vadd.f32 %v4759_v4, %v10626_v35  ;;  %v10696_v63 = vpop.f32.mrf.mxu1  ;;  %v10707_v30 = vpop.f32.mrf.mxu0 }
 0x29f   : > { %v4999_v41 = vmul.f32 %v10626_v35, %v10626_v35  ;;  %v5216_v45 = vadd.f32 %v4968_v33, %v4936_v61  ;;  %v4751_v6 = vadd.f32 %v4750_v19, %v10635_v24  ;;  %v4998_v50 = vmul.f32 %v10635_v24, %v10635_v24 }
 0x2a0   : > { %v5190_v9 = vadd.f32 %v5189_v28, %v4997_v21  ;;  %v6764_v11 = vrot.slane %v6756_v56, %v11956_v58  ;;  %v4769_v1 = vadd.f32 %v4768_v32, %v10653_v23  ;;  %v5000_v39 = vmul.f32 %v10653_v23, %v10653_v23 }
 0x2a1   : > { %v5208_v34 = vadd.f32 %v5207_v18, %v4999_v41  ;;  %v5199_v14 = vadd.f32 %v5198_v27, %v4998_v50  ;;  %v4743_v26 = vadd.f32 %v4742_v40, %v10665_v47  ;;  %v5029_v62 = vmul.f32 %v10665_v47, %v10665_v47  ;;  %v10709_v41 = vpop.f32.mrf.mxu1 }
 0x2a2   : > { %v4761_v8 = vadd.f32 %v4760_v10, %v10678_v55  ;;  %v6772_v61 = vcombine.low %v6764_v11, %v6771_v16  ;;  %v5217_v25 = vadd.f32 %v5216_v45, %v5000_v39  ;;  %v5031_v43 = vmul.f32 %v10678_v55, %v10678_v55  ;;  %11957 = vst [vmem:[#allocation17_spill] sm:$0xff] %v10709_v41 }
 0x2a3   : > { %v4752_v13 = vadd.f32 %v4751_v6, %v10686_v57  ;;  %v4744_v29 = vrot.slane %v4743_v26, 4  ;;  %v5191_v52 = vadd.f32 %v5190_v9, %v5029_v62  ;;  %v5030_v49 = vmul.f32 %v10686_v57, %v10686_v57  ;;  %v10711_v62 = vpop.f32.mrf.mxu0 }
 0x2a4   : > { %v4762_v4 = vrot.slane %v4761_v8, 4  ;;  %6876 = vst [vmem:[%s10645_s16 + $0x8] sm:$0xff] %v6772_v61  ;;  %v5209_v19 = vadd.f32 %v5208_v34, %v5031_v43  ;;  %v4770_v28 = vadd.f32 %v4769_v1, %v10696_v63  ;;  %v5032_v16 = vmul.f32 %v10696_v63, %v10696_v63  ;;  %11958 = vst [vmem:[#allocation20_spill] sm:$0xff] %v10711_v62 }
 0x2a5   : > { %v4753_v12 = vrot.slane %v4752_v13, 4  ;;  %v4745_v32 = vadd.f32 %v4744_v29, %v4743_v26  ;;  %v5192_v18 = vrot.slane %v5191_v52, 4  ;;  %v5200_v40 = vadd.f32 %v5199_v14, %v5030_v49 }
 0x2a6   : > { %v4763_v33 = vadd.f32 %v4762_v4, %v4761_v8  ;;  %v5210_v21 = vrot.slane %v5209_v19, 4  ;;  %v4771_v27 = vrot.slane %v4770_v28, 4  ;;  %v5218_v10 = vadd.f32 %v5217_v25, %v5032_v16  ;;  %v10713_v4 = vpop.f32.mrf.mxu1 }
 0x2a7   : > { %v4754_v56 = vadd.f32 %v4753_v12, %v4752_v13  ;;  %v4746_v45 = vrot.slane %v4745_v32, 2  ;;  %v5193_v9 = vadd.f32 %v5192_v18, %v5191_v52  ;;  %v5201_v50 = vrot.slane %v5200_v40, 4  ;;  %11959 = vst [vmem:[#allocation19_spill] sm:$0xff] %v10713_v4 }
 0x2a8   : > { %v4764_v6 = vrot.slane %v4763_v33, 2  ;;  %v5211_v11 = vadd.f32 %v5210_v21, %v5209_v19  ;;  %v4772_v1 = vadd.f32 %v4771_v27, %v4770_v28  ;;  %v5219_v39 = vrot.slane %v5218_v10, 4  ;;  %v10715_v27 = vpop.f32.mrf.mxu0 }
 0x2a9   : > { %v4755_v34 = vrot.slane %v4754_v56, 2  ;;  %v4747_v26 = vadd.f32 %v4746_v45, %v4745_v32  ;;  %v5194_v61 = vrot.slane %v5193_v9, 2  ;;  %v5202_v14 = vadd.f32 %v5201_v50, %v5200_v40  ;;  %11960 = vst [vmem:[#allocation23_spill] sm:$0xff] %v10715_v27 }
 0x2aa   : > { %v4765_v8 = vadd.f32 %v4764_v6, %v4763_v33  ;;  %v5212_v43 = vrot.slane %v5211_v11, 2  ;;  %v4773_v29 = vrot.slane %v4772_v1, 2  ;;  %v5220_v25 = vadd.f32 %v5219_v39, %v5218_v10  ;;  %v10717_v10 = vpop.f32.mrf.mxu1 }
 0x2ab   : > { %v4756_v13 = vadd.f32 %v4755_v34, %v4754_v56  ;;  %v4748_v49 = vrot.slane %v4747_v26, 1  ;;  %v5195_v52 = vadd.f32 %v5194_v61, %v5193_v9  ;;  %v5203_v16 = vrot.slane %v5202_v14, 2  ;;  %11961 = vst [vmem:[#allocation29_spill] sm:$0xff] %v10717_v10 }
 0x2ac   : > { %v4766_v12 = vrot.slane %v4765_v8, 1  ;;  %v5213_v19 = vadd.f32 %v5212_v43, %v5211_v11  ;;  %v4774_v28 = vadd.f32 %v4773_v29, %v4772_v1  ;;  %v5221_v21 = vrot.slane %v5220_v25, 2  ;;  %v10725_v29 = vpop.f32.mrf.mxu0 }
 0x2ad   : > { %v4757_v18 = vrot.slane %v4756_v13, 1  ;;  %v4749_v32 = vadd.f32 %v4748_v49, %v4747_v26  ;;  %v5196_v45 = vrot.slane %v5195_v52, 1  ;;  %v5204_v40 = vadd.f32 %v5203_v16, %v5202_v14  ;;  %11962 = vst [vmem:[#allocation32_spill] sm:$0xff] %v10725_v29 }
 0x2ae   : > { %v4767_v33 = vadd.f32 %v4766_v12, %v4765_v8  ;;  %v5214_v6 = vrot.slane %v5213_v19, 1  ;;  %v4775_v50 = vrot.slane %v4774_v28, 1  ;;  %v5222_v11 = vadd.f32 %v5221_v21, %v5220_v25  ;;  %v10731_v12 = vpop.f32.mrf.mxu1 }
 0x2af   : > { %v4758_v56 = vadd.f32 %v4757_v18, %v4756_v13  ;;  %v10719_v34 = vmul.f32 0.03125, %v4749_v32  ;;  %v5197_v9 = vadd.f32 %v5196_v45, %v5195_v52  ;;  %v5205_v43 = vrot.slane %v5204_v40, 1  ;;  %11963 = vst [vmem:[#allocation30_spill] sm:$0xff] %v10731_v12  ;;  %v10739_v45 = vpop.f32.mrf.mxu0 }
 0x2b0   : > { %v10721_v39 = vmul.f32 0.03125, %v4767_v33  ;;  %v5215_v61 = vadd.f32 %v5214_v6, %v5213_v19  ;;  %v4776_v49 = vadd.f32 %v4775_v50, %v4774_v28  ;;  %v5223_v16 = vrot.slane %v5222_v11, 1 }
 0x2b1   : > { %v10723_v1 = vmul.f32 0.03125, %v4758_v56  ;;  %v5349_v26 = vmul.f32 0.03125, %v5197_v9  ;;  %v5381_v8 = vmul.f32 %v10719_v34, %v10719_v34  ;;  %v5206_v21 = vadd.f32 %v5205_v43, %v5204_v40  ;;  %v10751_v43 = vpop.f32.mrf.mxu1 }
 0x2b2   : > { %v5351_v14 = vmul.f32 0.03125, %v5215_v61  ;;  %v5383_v13 = vmul.f32 %v10721_v39, %v10721_v39  ;;  %v10749_v61 = vmul.f32 0.03125, %v4776_v49  ;;  %v10761_v49 = vpop.f32.mrf.mxu0  ;;  %v4795_v50 = vadd.f32 %v10717_v10, %v10709_v41 }
 0x2b3   : > { %v5413_v52 = vsub.f32 %v5349_v26, %v5381_v8  ;;  %v5382_v32 = vmul.f32 %v10723_v1, %v10723_v1  ;;  %v5350_v40 = vmul.f32 0.03125, %v5206_v21  ;;  %v4971_v26 = vmul.f32 %v10717_v10, %v10717_v10 }
 0x2b4   : > { %v5415_v18 = vsub.f32 %v5351_v14, %v5383_v13  ;;  %v5224_v14 = vadd.f32 %v5223_v16, %v5222_v11  ;;  %v4777_v8 = vadd.f32 %v10715_v27, %v10707_v30  ;;  %v4786_v56 = vadd.f32 %v10725_v29, %v10711_v62 }
 0x2b5   : > { %v5573_v6 = vadd.f32 1e-05, %v5413_v52  ;;  %v5414_v13 = vsub.f32 %v5350_v40, %v5382_v32  ;;  %v4939_v40 = vmul.f32 %v10709_v41, %v10709_v41  ;;  %v10775_v52 = vpop.f32.mrf.mxu1  ;;  %v4940_v32 = vmul.f32 %v10713_v4, %v10713_v4 }
 0x2b6   : > { %v5575_v9 = vadd.f32 1e-05, %v5415_v18  ;;  %v5384_v18 = vmul.f32 %v10749_v61, %v10749_v61  ;;  %v5352_v11 = vmul.f32 0.03125, %v5224_v14  ;;  %v4969_v14 = vmul.f32 %v10715_v27, %v10715_v27 }
 0x2b7   : > { %7783 = vrsqrt.f32 %v5573_v6  ;;  %v5574_v16 = vadd.f32 1e-05, %v5414_v13  ;;  %v4938_v13 = vmul.f32 %v10711_v62, %v10711_v62  ;;  %v4804_v33 = vadd.f32 %v10731_v12, %v10713_v4 }
 0x2b8   : > { %7785 = vrsqrt.f32 %v5575_v9  ;;  %v4937_v9 = vmul.f32 %v10707_v30, %v10707_v30  ;;  %v5416_v21 = vsub.f32 %v5352_v11, %v5384_v18  ;;  %v4970_v18 = vmul.f32 %v10725_v29, %v10725_v29  ;;  %v10791_v11 = vpop.f32.mrf.mxu0 }
 0x2b9   : > { %7787 = vrsqrt.f32 %v5574_v16  ;;  %v4972_v28 = vmul.f32 %v10731_v12, %v10731_v12  ;;  %v5001_v19 = vmul.f32 %v10739_v45, %v10739_v45  ;;  %v10805_v16 = vpop.f32.mrf.mxu1  ;;  %v4778_v25 = vadd.f32 %v4777_v8, %v10739_v45 }
 0x2ba   : > { %v5576_v6 = vadd.f32 1e-05, %v5416_v21  ;;  %v5225_v21 = vadd.f32 %v4969_v14, %v4937_v9  ;;  %v4796_v58 = vadd.f32 %v4795_v50, %v10751_v43  ;;  %v5003_v10 = vmul.f32 %v10751_v43, %v10751_v43  ;;  %v10813_v12 = vpop.f32.mrf.mxu0 }
 0x2bb   : > { %v5243_v29 = vadd.f32 %v4971_v26, %v4939_v40  ;;  %v5234_v62 = vadd.f32 %v4970_v18, %v4938_v13  ;;  %v5002_v4 = vmul.f32 %v10761_v49, %v10761_v49  ;;  %11964 = vst [vmem:[#allocation25_spill] sm:$0xff] %v10813_v12  ;;  %v4787_v41 = vadd.f32 %v4786_v56, %v10761_v49 }
 0x2bc   : > { %7789 = vrsqrt.f32 %v5576_v6  ;;  %v10817_v27 = vadd.f32 %v4778_v25, %v10791_v11  ;;  %v5033_v8 = vmul.f32 %v10791_v11, %v10791_v11  ;;  %v10822_v50 = vadd.f32 %v4796_v58, %v10805_v16 }
 0x2bd   : > { %v10826_v6 = vadd.f32 %v4972_v28, %v4940_v32  ;;  %v5226_v9 = vadd.f32 %v5225_v21, %v5001_v19  ;;  %v10829_v40 = vadd.f32 %v4804_v33, %v10775_v52  ;;  %v10831_v14 = vadd.f32 %v5243_v29, %v5003_v10 }
 0x2be   : > { %v10833_v56 = vadd.f32 %v5234_v62, %v5002_v4  ;;  %v10837_v25 = vmul.f32 %v10805_v16, %v10805_v16  ;;  %v10840_v58 = vadd.f32 %v4787_v41, %v10813_v12  ;;  %v10848_v10 = vmul.f32 %v10813_v12, %v10813_v12 }
 0x2bf   : > { %v10843_v28 = vadd.f32 %v5226_v9, %v5033_v8  ;;  %v11965_v4 = vsub.f32 %v10570_v36, %v10719_v34  ;;  %v11966_v41 = vsub.f32 %v10601_v54, %v10719_v34  ;;  %v11967_v32 = vsub.f32 %v10621_v44, %v10719_v34 }
 0x2c0   : > { %v11968_v8 = vsub.f32 %v10665_v47, %v10719_v34  ;;  %v11969_v19 = vsub.f32 %v10576_v20, %v10721_v39  ;;  %v11970_v36 = vsub.f32 %v10609_v51, %v10721_v39  ;;  %v11971_v54 = vsub.f32 %v10626_v35, %v10721_v39 }
 0x2c1   : > { %v11972_v44 = vsub.f32 %v10678_v55, %v10721_v39 }
 0x2c4   : > { %v7784_v13 = vpop.eup %7783 }
 0x2c5   : > { %v7786_v62 = vpop.eup %7785  ;;  %v5637_v29 = vmul.f32 %v7784_v13, %v11965_v4  ;;  %v5669_v33 = vmul.f32 %v7784_v13, %v11966_v41  ;;  %v5701_v21 = vmul.f32 %v7784_v13, %v11967_v32  ;;  %v5733_v9 = vmul.f32 %v7784_v13, %v11968_v8 }
 0x2c6   : > { %v5639_v18 = vmul.f32 %v7786_v62, %v11969_v19  ;;  %v5671_v4 = vmul.f32 %v7786_v62, %v11970_v36  ;;  %v5703_v41 = vmul.f32 %v7786_v62, %v11971_v54  ;;  %v5735_v32 = vmul.f32 %v7786_v62, %v11972_v44 }
 0x2c7   : > { %v5789_v26 = vmul.f32 %v9540_v0, %v5637_v29  ;;  %v5821_v47 = vmul.f32 %v9724_v53, %v5669_v33  ;;  %v5853_v34 = vmul.f32 %v9595_v7, %v5701_v21  ;;  %v5885_v20 = vmul.f32 %v9895_v5, %v5733_v9  ;;  %v7788_v29 = vpop.eup %7787 }
 0x2c8   : > { %v5791_v13 = vmul.f32 %v9540_v0, %v5639_v18  ;;  %v5823_v51 = vmul.f32 %v9724_v53, %v5671_v4  ;;  %v5855_v19 = vmul.f32 %v9595_v7, %v5703_v41  ;;  %v5887_v35 = vmul.f32 %v9895_v5, %v5735_v32 }
 0x2c9   : > { %v5933_v8 = vadd.f32 %v9682_v59, %v5789_v26  ;;  %v5965_v55 = vadd.f32 %v9770_v38, %v5821_v47  ;;  %v5997_v39 = vadd.f32 %v9915_v31, %v5853_v34  ;;  %v6029_v62 = vadd.f32 %v9970_v3, %v5885_v20  ;;  %v7790_v34 = vpop.eup %7789 }
 0x2ca   : > { %v5935_v33 = vadd.f32 %v9682_v59, %v5791_v13  ;;  %v5967_v21 = vadd.f32 %v9770_v38, %v5823_v51  ;;  %v5999_v18 = vadd.f32 %v9915_v31, %v5855_v19  ;;  %v6031_v9 = vadd.f32 %v9970_v3, %v5887_v35 }
 0x2cb   : > { %v6061_v36 = vmax.f32 %v5933_v8, 0.0  ;;  %v6093_v4 = vmax.f32 %v5965_v55, 0.0  ;;  %v6125_v54 = vmax.f32 %v5997_v39, 0.0  ;;  %v6157_v41 = vmax.f32 %v6029_v62, 0.0 }
 0x2cc   : > { %v6063_v26 = vmax.f32 %v5935_v33, 0.0  ;;  %v6095_v44 = vmax.f32 %v5967_v21, 0.0  ;;  %v6127_v32 = vmax.f32 %v5999_v18, 0.0  ;;  %v6159_v47 = vmax.f32 %v6031_v9, 0.0 }
 0x2cd   : > { %v6205_v20 = vmul.f32 %v9946_v22, %v6061_v36  ;;  %v6237_v12 = vmul.f32 %v10413_v42, %v6093_v4  ;;  %v6269_v13 = vmul.f32 %v11896_v15, %v6125_v54  ;;  %v6301_v51 = vmul.f32 %v11897_v48, %v6157_v41 }
 0x2ce   : > { %v6207_v19 = vmul.f32 %v9946_v22, %v6063_v26  ;;  %v6239_v35 = vmul.f32 %v10413_v42, %v6095_v44  ;;  %v6271_v8 = vmul.f32 %v11896_v15, %v6127_v32  ;;  %v6303_v55 = vmul.f32 %v11897_v48, %v6159_v47 }
 0x2cf   : > { %v6461_v39 = vadd.f32 %v6237_v12, %v6205_v20  ;;  %v11973_v62 = vsub.f32 %v10586_v46, %v10723_v1  ;;  %v11974_v21 = vsub.f32 %v10613_v37, %v10723_v1  ;;  %v11975_v9 = vsub.f32 %v10635_v24, %v10723_v1 }
 0x2d0   : > { %v6479_v4 = vadd.f32 %v6239_v35, %v6207_v19  ;;  %v11976_v54 = vsub.f32 %v10686_v57, %v10723_v1  ;;  %v11977_v12 = vsub.f32 %v10594_v60, %v10749_v61  ;;  %v11978_v46 = vsub.f32 %v10618_v17, %v10749_v61 }
 0x2d1   : > { %v5638_v33 = vmul.f32 %v7788_v29, %v11973_v62  ;;  %v5670_v18 = vmul.f32 %v7788_v29, %v11974_v21  ;;  %v5702_v36 = vmul.f32 %v7788_v29, %v11975_v9  ;;  %v6462_v32 = vadd.f32 %v6461_v39, %v6269_v13 }
 0x2d2   : > { %v5734_v41 = vmul.f32 %v7788_v29, %v11976_v54  ;;  %v5640_v26 = vmul.f32 %v7790_v34, %v11977_v12  ;;  %v5672_v44 = vmul.f32 %v7790_v34, %v11978_v46  ;;  %v6480_v20 = vadd.f32 %v6479_v4, %v6271_v8 }
 0x2d3   : > { %v5790_v37 = vmul.f32 %v9540_v0, %v5638_v33  ;;  %v5822_v47 = vmul.f32 %v9724_v53, %v5670_v18  ;;  %v5854_v24 = vmul.f32 %v9595_v7, %v5702_v36  ;;  %v11979_v57 = vsub.f32 %v10653_v23, %v10749_v61 }
 0x2d4   : > { %v5886_v19 = vmul.f32 %v9895_v5, %v5734_v41  ;;  %v11980_v60 = vsub.f32 %v10696_v63, %v10749_v61  ;;  %v6463_v17 = vadd.f32 %v6462_v32, %v6301_v51  ;;  %v6481_v62 = vadd.f32 %v6480_v20, %v6303_v55 }
 0x2d5   : > { %v5704_v1 = vmul.f32 %v7790_v34, %v11979_v57  ;;  %v5934_v13 = vadd.f32 %v9682_v59, %v5790_v37  ;;  %v5966_v35 = vadd.f32 %v9770_v38, %v5822_v47  ;;  %v5998_v39 = vadd.f32 %v9915_v31, %v5854_v24 }
 0x2d6   : > { %v5736_v29 = vmul.f32 %v7790_v34, %v11980_v60  ;;  %v6030_v8 = vadd.f32 %v9970_v3, %v5886_v19  ;;  %v5792_v33 = vmul.f32 %v9540_v0, %v5640_v26  ;;  %v5824_v21 = vmul.f32 %v9724_v53, %v5672_v44 }
 0x2d7   : > { %v6464_v23 = vrot.slane %v6463_v17, 4  ;;  %v6062_v18 = vmax.f32 %v5934_v13, 0.0  ;;  %v6094_v9 = vmax.f32 %v5966_v35, 0.0  ;;  %v6126_v36 = vmax.f32 %v5998_v39, 0.0 }
 0x2d8   : > { %v6482_v63 = vrot.slane %v6481_v62, 4  ;;  %v5856_v61 = vmul.f32 %v9595_v7, %v5704_v1  ;;  %v5888_v34 = vmul.f32 %v9895_v5, %v5736_v29  ;;  %v5245_v51 = vadd.f32 %v10831_v14, %v10837_v25 }
 0x2d9   : > { %v6465_v4 = vadd.f32 %v6464_v23, %v6463_v17  ;;  %v6158_v55 = vmax.f32 %v6030_v8, 0.0  ;;  %v6206_v54 = vmul.f32 %v9946_v22, %v6062_v18  ;;  %v6238_v41 = vmul.f32 %v10413_v42, %v6094_v9  ;;  %v10949_v8 = vpop.f32.mrf.mxu1 }
 0x2da   : > { %v6483_v12 = vadd.f32 %v6482_v63, %v6481_v62  ;;  %v6270_v26 = vmul.f32 %v11896_v15, %v6126_v36  ;;  %v5936_v46 = vadd.f32 %v9682_v59, %v5792_v33  ;;  %v5968_v44 = vadd.f32 %v9770_v38, %v5824_v21 }
 0x2db   : > { %v6466_v32 = vrot.slane %v6465_v4, 2  ;;  %v6470_v37 = vadd.f32 %v6238_v41, %v6206_v54  ;;  %v6000_v47 = vadd.f32 %v9915_v31, %v5856_v61  ;;  %v6032_v24 = vadd.f32 %v9970_v3, %v5888_v34 }
 0x2dc   : > { %v6484_v14 = vrot.slane %v6483_v12, 2  ;;  %v6064_v25 = vmax.f32 %v5936_v46, 0.0  ;;  %v6096_v20 = vmax.f32 %v5968_v44, 0.0  ;;  %v11981_v19 = vrot.slane %v10817_v27, 4 }
 0x2dd   : > { %v6467_v1 = vadd.f32 %v6466_v32, %v6465_v4  ;;  %v6302_v60 = vmul.f32 %v11897_v48, %v6158_v55  ;;  %v6471_v29 = vadd.f32 %v6470_v37, %v6270_v26  ;;  %v6128_v17 = vmax.f32 %v6000_v47, 0.0 }
 0x2de   : > { %v4781_v57 = vadd.f32 %v11981_v19, %v10817_v27  ;;  %v6160_v13 = vmax.f32 %v6032_v24, 0.0  ;;  %v6208_v35 = vmul.f32 %v9946_v22, %v6064_v25  ;;  %v6240_v39 = vmul.f32 %v10413_v42, %v6096_v20 }
 0x2df   : > { %v6468_v33 = vrot.slane %v6467_v1, 1  ;;  %v6485_v21 = vadd.f32 %v6484_v14, %v6483_v12  ;;  %v6472_v23 = vadd.f32 %v6471_v29, %v6302_v60  ;;  %v4789_v18 = vrot.slane %v10840_v58, 4 }
 0x2e0   : > { %v4782_v62 = vrot.slane %v4781_v57, 2  ;;  %v6272_v27 = vmul.f32 %v11896_v15, %v6128_v17  ;;  %v6488_v9 = vadd.f32 %v6240_v39, %v6208_v35  ;;  %v5228_v63 = vrot.slane %v10843_v28, 4 }
 0x2e1   : > { %v6473_v61 = vrot.slane %v6472_v23, 4  ;;  %v11982_v34 = vrot.slane %v10822_v50, 4  ;;  %v5246_v55 = vrot.slane %v5245_v51, 4  ;;  %v4806_v54 = vadd.f32 %v10829_v40, %v10949_v8 }
 0x2e2   : > { %v4783_v36 = vadd.f32 %v4782_v62, %v4781_v57  ;;  %v6304_v41 = vmul.f32 %v11897_v48, %v6160_v13  ;;  %v6489_v12 = vadd.f32 %v6488_v9, %v6272_v27  ;;  %v5229_v46 = vadd.f32 %v5228_v63, %v10843_v28 }
 0x2e3   : > { %v4799_v4 = vadd.f32 %v11982_v34, %v10822_v50  ;;  %v6486_v44 = vrot.slane %v6485_v21, 1  ;;  %v6474_v32 = vadd.f32 %v6473_v61, %v6472_v23  ;;  %v5247_v47 = vadd.f32 %v5246_v55, %v5245_v51 }
 0x2e4   : > { %v4784_v26 = vrot.slane %v4783_v36, 1  ;;  %v6469_v24 = vadd.f32 %v6468_v33, %v6467_v1  ;;  %v6490_v14 = vadd.f32 %v6489_v12, %v6304_v41  ;;  %v5230_v20 = vrot.slane %v5229_v46, 2 }
 0x2e5   : > { %v4800_v37 = vrot.slane %v4799_v4, 2  ;;  %v6475_v19 = vrot.slane %v6474_v32, 2  ;;  %v5248_v57 = vrot.slane %v5247_v47, 2  ;;  %v4790_v60 = vadd.f32 %v4789_v18, %v10840_v58 }
 0x2e6   : > { %v4785_v25 = vadd.f32 %v4784_v26, %v4783_v36  ;;  %v6491_v40 = vrot.slane %v6490_v14, 4  ;;  %v5231_v17 = vadd.f32 %v5230_v20, %v5229_v46  ;;  %v5236_v28 = vadd.f32 %v10833_v56, %v10848_v10 }
 0x2e7   : > { %v4801_v50 = vadd.f32 %v4800_v37, %v4799_v4  ;;  %v6476_v13 = vadd.f32 %v6475_v19, %v6474_v32  ;;  %v5249_v39 = vadd.f32 %v5248_v57, %v5247_v47  ;;  %v4791_v51 = vrot.slane %v4790_v60, 2  ;;  %v10975_v32 = vpop.f32.mrf.mxu0  ;;  %v10980_v19 = vpop.f32.mrf.mxu1 }
 0x2e8   : > { %v10962_v29 = vmul.f32 0.03125, %v4785_v25  ;;  %v6492_v1 = vadd.f32 %v6491_v40, %v6490_v14  ;;  %v5004_v62 = vmul.f32 %v10775_v52, %v10775_v52  ;;  %v5232_v33 = vrot.slane %v5231_v17, 1 }
 0x2e9   : > { %v4802_v35 = vrot.slane %v4801_v50, 1  ;;  %v5036_v23 = vmul.f32 %v10949_v8, %v10949_v8  ;;  %v6627_v58 = vadd.f32 %v10568_v2, %v6469_v24  ;;  %v6487_v18 = vadd.f32 %v6486_v44, %v6485_v21 }
 0x2ea   : > { %v6477_v27 = vrot.slane %v6476_v13, 1  ;;  %v5385_v9 = vmul.f32 %v10962_v29, %v10962_v29  ;;  %v6493_v56 = vrot.slane %v6492_v1, 2  ;;  %v5233_v10 = vadd.f32 %v5232_v33, %v5231_v17 }
 0x2eb   : > { %v4803_v36 = vadd.f32 %v4802_v35, %v4801_v50  ;;  %v5250_v63 = vrot.slane %v5249_v39, 1  ;;  %v4792_v34 = vadd.f32 %v4791_v51, %v4790_v60  ;;  %v5237_v4 = vrot.slane %v5236_v28, 4  ;;  %v11984_v35 = vld [vmem:[#allocation23_spill] sm:$0xff] }
 0x2ec   : > { %v6478_v61 = vadd.f32 %v6477_v27, %v6476_v13  ;;  %v4807_v55 = vrot.slane %v4806_v54, 4  ;;  %v6494_v41 = vadd.f32 %v6493_v56, %v6492_v1  ;;  %v5353_v12 = vmul.f32 0.03125, %v5233_v10 }
 0x2ed   : > { %v10973_v26 = vmul.f32 0.03125, %v4803_v36  ;;  %v5251_v46 = vadd.f32 %v5250_v63, %v5249_v39  ;;  %v4793_v44 = vrot.slane %v4792_v34, 1  ;;  %v5238_v37 = vadd.f32 %v5237_v4, %v5236_v28  ;;  %v11986_v36 = vld [vmem:[#allocation10_spill] sm:$0xff] }
 0x2ee   : > { %v6628_v21 = vadd.f32 %v10568_v2, %v6478_v61  ;;  %v4808_v47 = vadd.f32 %v4807_v55, %v4806_v54  ;;  %v6495_v24 = vrot.slane %v6494_v41, 1  ;;  %v5417_v14 = vsub.f32 %v5353_v12, %v5385_v9  ;;  %v10986_v54 = vpop.f32.mrf.mxu0  ;;  %v11987_v55 = vld [vmem:[#allocation17_spill] sm:$0xff] }
 0x2ef   : > { %v5355_v25 = vmul.f32 0.03125, %v5251_v46  ;;  %v5387_v20 = vmul.f32 %v10973_v26, %v10973_v26  ;;  %v6629_v50 = vadd.f32 %v10568_v2, %v6487_v18  ;;  %v5253_v57 = vadd.f32 %v10826_v6, %v5004_v62  ;;  %11983 = vst [vmem:[#allocation21_spill] sm:$0xff] %v10986_v54  ;;  %v10991_v62 = vpop.f32.mrf.mxu1 }
 0x2f0   : > { %v5449_v60 = vsub.f32 %v10707_v30, %v10962_v29  ;;  %v6773_v40 = vcombine.low %v6627_v58, %v6628_v21  ;;  %v6496_v17 = vadd.f32 %v6495_v24, %v6494_v41  ;;  %v5577_v13 = vadd.f32 1e-05, %v5417_v14  ;;  %11985 = vst [vmem:[#allocation22_spill] sm:$0xff] %v10991_v62  ;;  %v11000_v4 = vpop.f32.mrf.mxu0 }
 0x2f1   : > { %v5419_v28 = vsub.f32 %v5355_v25, %v5387_v20  ;;  %v4794_v51 = vadd.f32 %v4793_v44, %v4792_v34  ;;  %v5239_v1 = vrot.slane %v5238_v37, 2  ;;  %v4809_v33 = vrot.slane %v4808_v47, 2  ;;  %v11015_v24 = vpop.f32.mrf.mxu1 }
 0x2f2   : > { %v6630_v27 = vadd.f32 %v10568_v2, %v6496_v17  ;;  %7791 = vrsqrt.f32 %v5577_v13  ;;  %v5254_v6 = vadd.f32 %v5253_v57, %v5036_v23  ;;  %v5513_v58 = vsub.f32 %v10739_v45, %v10962_v29  ;;  %v11988_v45 = vld [vmem:[#allocation29_spill] sm:$0xff]  ;;  %11989 = vst [vmem:[#allocation27_spill] sm:$0xff] %v11015_v24  ;;  %v11991_v17 = vld [vmem:[#allocation20_spill] sm:$0xff] }
 0x2f3   : > { %v5579_v18 = vadd.f32 1e-05, %v5419_v28  ;;  %v10995_v9 = vmul.f32 0.03125, %v4794_v51  ;;  %v5240_v56 = vadd.f32 %v5239_v1, %v5238_v37  ;;  %v4810_v10 = vadd.f32 %v4809_v33, %v4808_v47  ;;  %v11992_v1 = vld [vmem:[#allocation32_spill] sm:$0xff] }
 0x2f4   : > { %v10998_v63 = vrot.slane %v6773_v40, %v11986_v36  ;;  %v6774_v61 = vcombine.low %v6629_v50, %v6630_v27  ;;  %v5255_v34 = vrot.slane %v5254_v6, 4  ;;  %v5545_v23 = vsub.f32 %v10791_v11, %v10962_v29 }
 0x2f5   : > { %7793 = vrsqrt.f32 %v5579_v18  ;;  %v5451_v41 = vsub.f32 %v11987_v55, %v10973_v26  ;;  %v5483_v12 = vsub.f32 %v11988_v45, %v10973_v26  ;;  %v5241_v46 = vrot.slane %v5240_v56, 1  ;;  %v11993_v18 = vld [vmem:[#allocation25_spill] sm:$0xff] }
 0x2f6   : > { %v11009_v21 = vrot.slane %v6774_v61, %v11986_v36  ;;  %v5515_v44 = vsub.f32 %v10751_v43, %v10973_v26  ;;  %v5547_v37 = vsub.f32 %v10805_v16, %v10973_v26  ;;  %v4811_v47 = vrot.slane %v4810_v10, 1  ;;  %v11027_v26 = vpop.f32.mrf.mxu0 }
 0x2f7   : > { %v5242_v11 = vadd.f32 %v5241_v46, %v5240_v56  ;;  %v5386_v14 = vmul.f32 %v10995_v9, %v10995_v9  ;;  %v5256_v25 = vadd.f32 %v5255_v34, %v5254_v6  ;;  %v4941_v20 = vmul.f32 %v10975_v32, %v10975_v32  ;;  %11990 = vst [vmem:[#allocation26_spill] sm:$0xff] %v11027_v26  ;;  %v11996_v6 = vld [vmem:[#allocation30_spill] sm:$0xff] }
 0x2f8   : > { %v4812_v57 = vadd.f32 %v4811_v47, %v4810_v10  ;;  %v4943_v43 = vmul.f32 %v10980_v19, %v10980_v19  ;;  %v4973_v16 = vmul.f32 %v11000_v4, %v11000_v4  ;;  %v4975_v51 = vmul.f32 %v11015_v24, %v11015_v24  ;;  %v11073_v33 = vpop.f32.mrf.mxu0 }
 0x2f9   : > { %v5354_v40 = vmul.f32 0.03125, %v5242_v11  ;;  %v5257_v28 = vrot.slane %v5256_v25, 2  ;;  %v4942_v34 = vmul.f32 %v10986_v54, %v10986_v54  ;;  %v4974_v55 = vmul.f32 %v11027_v26, %v11027_v26 }
 0x2fa   : > { %v11039_v56 = vmul.f32 0.03125, %v4812_v57  ;;  %v11047_v45 = vmul.f32 %v10991_v62, %v10991_v62  ;;  %v4813_v46 = vadd.f32 %v11000_v4, %v10975_v32  ;;  %v11051_v47 = vadd.f32 %v4973_v16, %v4941_v20  ;;  %v11995_v20 = vld [vmem:[#allocation19_spill] sm:$0xff] }
 0x2fb   : > { %v5418_v10 = vsub.f32 %v5354_v40, %v5386_v14  ;;  %v5258_v61 = vadd.f32 %v5257_v28, %v5256_v25  ;;  %v4831_v11 = vadd.f32 %v11015_v24, %v10980_v19  ;;  %v11055_v14 = vpop.f32.mrf.mxu1  ;;  %v11057_v40 = vadd.f32 %v4975_v51, %v4943_v43 }
 0x2fc   : > { %11994 = vst [vmem:[#allocation3_spill] sm:$0xff] %v11055_v14  ;;  %v11061_v28 = vadd.f32 %v11027_v26, %v10986_v54  ;;  %v11065_v50 = vmul.f32 %v11039_v56, %v11039_v56  ;;  %v11077_v13 = vadd.f32 %v4974_v55, %v4942_v34  ;;  %v11081_v39 = vadd.f32 %v11055_v14, %v10991_v62 }
 0x2fd   : > { %v5578_v25 = vadd.f32 1e-05, %v5418_v10  ;;  %v5259_v57 = vrot.slane %v5258_v61, 1  ;;  %v11997_v10 = vsub.f32 %v11984_v35, %v10962_v29  ;;  %v4976_v34 = vmul.f32 %v11055_v14, %v11055_v14 }
 0x2fe   : > { %v11092_v55 = vadd.f32 %v4813_v46, %v11073_v33  ;;  %v5005_v51 = vmul.f32 %v11073_v33, %v11073_v33 }
 0x2ff   : > { %v7792_v43 = vpop.eup %7791  ;;  %7795 = vrsqrt.f32 %v5578_v25  ;;  %v5260_v24 = vadd.f32 %v5259_v57, %v5258_v61 }
 0x300   : > { %v5641_v27 = vmul.f32 %v7792_v43, %v5449_v60  ;;  %v5673_v16 = vmul.f32 %v7792_v43, %v11997_v10  ;;  %v5705_v26 = vmul.f32 %v7792_v43, %v5513_v58  ;;  %v5737_v54 = vmul.f32 %v7792_v43, %v5545_v23 }
 0x302   : > { %v7794_v25 = vpop.eup %7793  ;;  %v5793_v30 = vmul.f32 %v9540_v0, %v5641_v27  ;;  %v5825_v60 = vmul.f32 %v9724_v53, %v5673_v16  ;;  %v5857_v29 = vmul.f32 %v9595_v7, %v5705_v26  ;;  %v5889_v35 = vmul.f32 %v9895_v5, %v5737_v54 }
 0x303   : > { %v5643_v58 = vmul.f32 %v7794_v25, %v5451_v41  ;;  %v5675_v23 = vmul.f32 %v7794_v25, %v5483_v12  ;;  %v5707_v61 = vmul.f32 %v7794_v25, %v5515_v44  ;;  %v5739_v57 = vmul.f32 %v7794_v25, %v5547_v37  ;;  %v11108_v41 = vpop.f32.mrf.mxu1 }
 0x304   : > { %v5937_v10 = vadd.f32 %v9682_v59, %v5793_v30  ;;  %v5969_v46 = vadd.f32 %v9770_v38, %v5825_v60  ;;  %v6001_v43 = vadd.f32 %v9915_v31, %v5857_v29  ;;  %v6033_v14 = vadd.f32 %v9970_v3, %v5889_v35  ;;  %11998 = vst [vmem:[#allocation31_spill] sm:$0xff] %v11108_v41 }
 0x305   : > { %v5795_v27 = vmul.f32 %v9540_v0, %v5643_v58  ;;  %v5827_v16 = vmul.f32 %v9724_v53, %v5675_v23  ;;  %v5859_v26 = vmul.f32 %v9595_v7, %v5707_v61  ;;  %v5891_v54 = vmul.f32 %v9895_v5, %v5739_v57 }
 0x306   : > { %v6065_v12 = vmax.f32 %v5937_v10, 0.0  ;;  %v6097_v44 = vmax.f32 %v5969_v46, 0.0  ;;  %v6129_v37 = vmax.f32 %v6001_v43, 0.0  ;;  %v5356_v25 = vmul.f32 0.03125, %v5260_v24 }
 0x307   : > { %v5939_v30 = vadd.f32 %v9682_v59, %v5795_v27  ;;  %v5971_v60 = vadd.f32 %v9770_v38, %v5827_v16  ;;  %v6003_v29 = vadd.f32 %v9915_v31, %v5859_v26  ;;  %v6035_v35 = vadd.f32 %v9970_v3, %v5891_v54  ;;  %v11123_v27 = vpop.f32.mrf.mxu0 }
 0x308   : > { %v6161_v58 = vmax.f32 %v6033_v14, 0.0  ;;  %v6209_v23 = vmul.f32 %v9946_v22, %v6065_v12  ;;  %v6241_v61 = vmul.f32 %v10413_v42, %v6097_v44  ;;  %v11117_v57 = vadd.f32 %v4831_v11, %v11108_v41 }
 0x309   : > { %v6067_v10 = vmax.f32 %v5939_v30, 0.0  ;;  %v6099_v46 = vmax.f32 %v5971_v60, 0.0  ;;  %v6131_v43 = vmax.f32 %v6003_v29, 0.0  ;;  %v11121_v24 = vmul.f32 %v11108_v41, %v11108_v41 }
 0x30a   : > { %v6273_v16 = vmul.f32 %v11896_v15, %v6129_v37  ;;  %v6497_v26 = vadd.f32 %v6241_v61, %v6209_v23  ;;  %v6163_v14 = vmax.f32 %v6035_v35, 0.0  ;;  %v5420_v54 = vsub.f32 %v5356_v25, %v11065_v50 }
 0x30b   : > { %v6211_v12 = vmul.f32 %v9946_v22, %v6067_v10  ;;  %v6243_v11 = vmul.f32 %v10413_v42, %v6099_v46  ;;  %v11130_v44 = vadd.f32 %v4976_v34, %v11047_v45  ;;  %v5262_v30 = vadd.f32 %v11051_v47, %v5005_v51  ;;  %v11144_v51 = vpop.f32.mrf.mxu0 }
 0x30c   : > { %v7796_v60 = vpop.eup %7795  ;;  %v6305_v29 = vmul.f32 %v11897_v48, %v6161_v58  ;;  %v6498_v62 = vadd.f32 %v6497_v26, %v6273_v16  ;;  %v6275_v41 = vmul.f32 %v11896_v15, %v6131_v43  ;;  %v5580_v37 = vadd.f32 1e-05, %v5420_v54  ;;  %v11156_v54 = vpop.f32.mrf.mxu1 }
 0x30d   : > { %v6515_v23 = vadd.f32 %v6243_v11, %v6211_v12  ;;  %v11999_v50 = vsub.f32 %v11991_v17, %v10995_v9  ;;  %v12000_v35 = vsub.f32 %v11992_v1, %v10995_v9  ;;  %v12001_v45 = vsub.f32 %v10761_v49, %v10995_v9 }
 0x30e   : > { %v6499_v34 = vadd.f32 %v6498_v62, %v6305_v29  ;;  %v6307_v58 = vmul.f32 %v11897_v48, %v6163_v14  ;;  %v12002_v10 = vsub.f32 %v11993_v18, %v10995_v9  ;;  %7797 = vrsqrt.f32 %v5580_v37 }
 0x30f   : > { %v5642_v25 = vmul.f32 %v7796_v60, %v11999_v50  ;;  %v5674_v61 = vmul.f32 %v7796_v60, %v12000_v35  ;;  %v5706_v47 = vmul.f32 %v7796_v60, %v12001_v45  ;;  %v6516_v17 = vadd.f32 %v6515_v23, %v6275_v41 }
 0x310   : > { %v5738_v46 = vmul.f32 %v7796_v60, %v12002_v10  ;;  %v6500_v26 = vrot.slane %v6499_v34, 4  ;;  %v4823_v62 = vadd.f32 %v11061_v28, %v11123_v27  ;;  %v4815_v9 = vadd.f32 %v11092_v55, %v11144_v51 }
 0x311   : > { %v5794_v43 = vmul.f32 %v9540_v0, %v5642_v25  ;;  %v5826_v1 = vmul.f32 %v9724_v53, %v5674_v61  ;;  %v5858_v16 = vmul.f32 %v9595_v7, %v5706_v47  ;;  %v6517_v18 = vadd.f32 %v6516_v17, %v6307_v58  ;;  %v11168_v47 = vpop.f32.mrf.mxu1 }
 0x312   : > { %v5890_v49 = vmul.f32 %v9895_v5, %v5738_v46  ;;  %v6501_v11 = vadd.f32 %v6500_v26, %v6499_v34  ;;  %v4816_v29 = vrot.slane %v4815_v9, 4  ;;  %v5037_v37 = vmul.f32 %v11144_v51, %v11144_v51  ;;  %v11173_v26 = vpop.f32.mrf.mxu0 }
 0x313   : > { %v5938_v41 = vadd.f32 %v9682_v59, %v5794_v43  ;;  %v5970_v14 = vadd.f32 %v9770_v38, %v5826_v1  ;;  %v6002_v12 = vadd.f32 %v9915_v31, %v5858_v16  ;;  %v6518_v28 = vrot.slane %v6517_v18, 4 }
 0x314   : > { %v6034_v60 = vadd.f32 %v9970_v3, %v5890_v49  ;;  %v6502_v35 = vrot.slane %v6501_v11, 2  ;;  %v5006_v55 = vmul.f32 %v11123_v27, %v11123_v27  ;;  %v4817_v61 = vadd.f32 %v4816_v29, %v4815_v9 }
 0x315   : > { %v6066_v23 = vmax.f32 %v5938_v41, 0.0  ;;  %v6098_v50 = vmax.f32 %v5970_v14, 0.0  ;;  %v6130_v25 = vmax.f32 %v6002_v12, 0.0  ;;  %v5263_v45 = vadd.f32 %v5262_v30, %v5037_v37 }
 0x316   : > { %v6519_v58 = vadd.f32 %v6518_v28, %v6517_v18  ;;  %v6162_v34 = vmax.f32 %v6034_v60, 0.0  ;;  %v6503_v17 = vadd.f32 %v6502_v35, %v6501_v11  ;;  %v4818_v1 = vrot.slane %v4817_v61, 2 }
 0x317   : > { %v6210_v10 = vmul.f32 %v9946_v22, %v6066_v23  ;;  %v6242_v46 = vmul.f32 %v10413_v42, %v6098_v50  ;;  %v6274_v43 = vmul.f32 %v11896_v15, %v6130_v25  ;;  %v5264_v16 = vrot.slane %v5263_v45, 4 }
 0x318   : > { %v6520_v49 = vrot.slane %v6519_v58, 2  ;;  %v4833_v30 = vadd.f32 %v11117_v57, %v11168_v47  ;;  %v5039_v9 = vmul.f32 %v11168_v47, %v11168_v47  ;;  %v6504_v18 = vrot.slane %v6503_v17, 1 }
 0x319   : > { %v6506_v41 = vadd.f32 %v6242_v46, %v6210_v10  ;;  %v5280_v14 = vadd.f32 %v11057_v40, %v11121_v24  ;;  %v4819_v12 = vadd.f32 %v4818_v1, %v4817_v61  ;;  %v5265_v11 = vadd.f32 %v5264_v16, %v5263_v45 }
 0x31a   : > { %v6306_v60 = vmul.f32 %v11897_v48, %v6162_v34  ;;  %v11183_v37 = vadd.f32 %v11077_v13, %v5006_v55  ;;  %v4824_v28 = vadd.f32 %v4823_v62, %v11173_v26  ;;  %v4841_v57 = vadd.f32 %v11081_v39, %v11156_v54 }
 0x31b   : > { %v6507_v29 = vadd.f32 %v6506_v41, %v6274_v43  ;;  %v5008_v23 = vmul.f32 %v11156_v54, %v11156_v54  ;;  %v4820_v50 = vrot.slane %v4819_v12, 1  ;;  %v5266_v25 = vrot.slane %v5265_v11, 2  ;;  %v7798_v35 = vpop.eup %7797 }
 0x31c   : > { %v11190_v40 = vadd.f32 %v6520_v49, %v6519_v58  ;;  %v4834_v61 = vrot.slane %v4833_v30, 4  ;;  %v5281_v45 = vadd.f32 %v5280_v14, %v5039_v9  ;;  %v6505_v34 = vadd.f32 %v6504_v18, %v6503_v17 }
 0x31d   : > { %v6508_v24 = vadd.f32 %v6507_v29, %v6306_v60  ;;  %v12003_v13 = vsub.f32 %v11995_v20, %v11039_v56  ;;  %v12004_v62 = vsub.f32 %v11996_v6, %v11039_v56  ;;  %v12005_v10 = vsub.f32 %v10775_v52, %v11039_v56 }
 0x31e   : > { %v12006_v58 = vsub.f32 %v10949_v8, %v11039_v56  ;;  %v4821_v16 = vadd.f32 %v4820_v50, %v4819_v12  ;;  %v4825_v49 = vrot.slane %v4824_v28, 4  ;;  %v5267_v9 = vadd.f32 %v5266_v25, %v5265_v11 }
 0x31f   : > { %v5644_v55 = vmul.f32 %v7798_v35, %v12003_v13  ;;  %v5676_v39 = vmul.f32 %v7798_v35, %v12004_v62  ;;  %v5708_v46 = vmul.f32 %v7798_v35, %v12005_v10  ;;  %v6509_v43 = vrot.slane %v6508_v24, 4 }
 0x320   : > { %v5740_v1 = vmul.f32 %v7798_v35, %v12006_v58  ;;  %v11208_v14 = vmul.f32 0.03125, %v4821_v16  ;;  %v4835_v52 = vadd.f32 %v4834_v61, %v4833_v30  ;;  %v5268_v12 = vrot.slane %v5267_v9, 1 }
 0x321   : > { %v5796_v17 = vmul.f32 %v9540_v0, %v5644_v55  ;;  %v5828_v20 = vmul.f32 %v9724_v53, %v5676_v39  ;;  %v5860_v41 = vmul.f32 %v9595_v7, %v5708_v46  ;;  %v6510_v6 = vadd.f32 %v6509_v43, %v6508_v24 }
 0x322   : > { %v5892_v18 = vmul.f32 %v9895_v5, %v5740_v1  ;;  %v5389_v35 = vmul.f32 %v11208_v14, %v11208_v14  ;;  %v5282_v11 = vrot.slane %v5281_v45, 4  ;;  %v5269_v55 = vadd.f32 %v5268_v12, %v5267_v9  ;;  %v11221_v1 = vpop.f32.mrf.mxu1 }
 0x323   : > { %v5940_v60 = vadd.f32 %v9682_v59, %v5796_v17  ;;  %v5972_v8 = vadd.f32 %v9770_v38, %v5828_v20  ;;  %v6004_v56 = vadd.f32 %v9915_v31, %v5860_v41  ;;  %v6511_v29 = vrot.slane %v6510_v6, 2 }
 0x324   : > { %v6036_v50 = vadd.f32 %v9970_v3, %v5892_v18  ;;  %v6522_v30 = vrot.slane %v11190_v40, 1  ;;  %v5289_v39 = vadd.f32 %v11130_v44, %v5008_v23  ;;  %v6631_v10 = vadd.f32 %v10568_v2, %v6505_v34 }
 0x325   : > { %v6068_v25 = vmax.f32 %v5940_v60, 0.0  ;;  %v6100_v24 = vmax.f32 %v5972_v8, 0.0  ;;  %v6132_v13 = vmax.f32 %v6004_v56, 0.0  ;;  %v6512_v61 = vadd.f32 %v6511_v29, %v6510_v6 }
 0x326   : > { %v6164_v62 = vmax.f32 %v6036_v50, 0.0  ;;  %v5357_v58 = vmul.f32 0.03125, %v5269_v55  ;;  %v4836_v41 = vrot.slane %v4835_v52, 2  ;;  %v5283_v18 = vadd.f32 %v5282_v11, %v5281_v45 }
 0x327   : > { %v6212_v46 = vmul.f32 %v9946_v22, %v6068_v25  ;;  %v6244_v43 = vmul.f32 %v10413_v42, %v6100_v24  ;;  %v6513_v16 = vrot.slane %v6512_v61, 1  ;;  %v6276_v17 = vmul.f32 %v11896_v15, %v6132_v13 }
 0x328   : > { %v6308_v20 = vmul.f32 %v11897_v48, %v6164_v62  ;;  %v5421_v6 = vsub.f32 %v5357_v58, %v5389_v35  ;;  %v4826_v60 = vadd.f32 %v4825_v49, %v4824_v28  ;;  %v4837_v23 = vadd.f32 %v4836_v41, %v4835_v52 }
 0x329   : > { %v6524_v9 = vadd.f32 %v6244_v43, %v6212_v46  ;;  %v6514_v44 = vadd.f32 %v6513_v16, %v6512_v61  ;;  %v5038_v34 = vmul.f32 %v11173_v26, %v11173_v26  ;;  %v4842_v8 = vadd.f32 %v4841_v57, %v11221_v1 }
 0x32a   : > { %v5581_v12 = vadd.f32 1e-05, %v5421_v6  ;;  %v5284_v29 = vrot.slane %v5283_v18, 2  ;;  %v4827_v50 = vrot.slane %v4826_v60, 2  ;;  %v4838_v24 = vrot.slane %v4837_v23, 1 }
 0x32b   : > { %v6525_v56 = vadd.f32 %v6524_v9, %v6276_v17  ;;  %v6632_v25 = vadd.f32 %v10568_v2, %v6514_v44  ;;  %v5272_v13 = vadd.f32 %v11183_v37, %v5038_v34  ;;  %v4843_v55 = vrot.slane %v4842_v8, 4 }
 0x32c   : > { %7799 = vrsqrt.f32 %v5581_v12  ;;  %v5285_v28 = vadd.f32 %v5284_v29, %v5283_v18  ;;  %v4828_v45 = vadd.f32 %v4827_v50, %v4826_v60  ;;  %v6523_v49 = vadd.f32 %v6522_v30, %v11190_v40 }
 0x32d   : > { %v6526_v35 = vadd.f32 %v6525_v56, %v6308_v20  ;;  %v4839_v52 = vadd.f32 %v4838_v24, %v4837_v23  ;;  %v5273_v11 = vrot.slane %v5272_v13, 4  ;;  %v4844_v61 = vadd.f32 %v4843_v55, %v4842_v8 }
 0x32e   : > { %v5286_v62 = vrot.slane %v5285_v28, 1  ;;  %v4829_v46 = vrot.slane %v4828_v45, 1  ;;  %v5040_v43 = vmul.f32 %v11221_v1, %v11221_v1  ;;  %v6775_v58 = vcombine.low %v6631_v10, %v6632_v25  ;;  %v11257_v25 = vpop.f32.mrf.mxu0 }
 0x32f   : > { %v6527_v57 = vrot.slane %v6526_v35, 4  ;;  %v11233_v16 = vmul.f32 0.03125, %v4839_v52  ;;  %v5274_v37 = vadd.f32 %v5273_v11, %v5272_v13  ;;  %v4845_v17 = vrot.slane %v4844_v61, 2  ;;  %v12009_v13 = vld [vmem:[#allocation31_spill] sm:$0xff] }
 0x330   : > { %v5287_v41 = vadd.f32 %v5286_v62, %v5285_v28  ;;  %v4830_v9 = vadd.f32 %v4829_v46, %v4828_v45  ;;  %v5290_v6 = vadd.f32 %v5289_v39, %v5040_v43  ;;  %v12007_v40 = vcombine.low %v10998_v63, %v11009_v21 }
 0x331   : > { %v6528_v20 = vadd.f32 %v6527_v57, %v6526_v35  ;;  %v6633_v18 = vadd.f32 %v10568_v2, %v6523_v49  ;;  %v5453_v60 = vsub.f32 %v10975_v32, %v11208_v14  ;;  %v5391_v10 = vmul.f32 %v11233_v16, %v11233_v16 }
 0x332   : > { %v11239_v30 = vrot.slane %v12007_v40, %v11986_v36  ;;  %v5485_v23 = vsub.f32 %v11000_v4, %v11208_v14  ;;  %v5517_v39 = vsub.f32 %v11073_v33, %v11208_v14  ;;  %v5359_v34 = vmul.f32 0.03125, %v5287_v41  ;;  %v12008_v33 = vld [vmem:[#allocation27_spill] sm:$0xff] }
 0x333   : > { %v6529_v44 = vrot.slane %v6528_v20, 2  ;;  %v11250_v8 = vmul.f32 0.03125, %v4830_v9  ;;  %v5275_v63 = vrot.slane %v5274_v37, 2  ;;  %v4846_v21 = vadd.f32 %v4845_v17, %v4844_v61 }
 0x334   : > { %v5291_v56 = vrot.slane %v5290_v6, 4  ;;  %v11253_v12 = vrot.slane %v6775_v58, %v11986_v36  ;;  %v5549_v29 = vsub.f32 %v11144_v51, %v11208_v14  ;;  %v5423_v50 = vsub.f32 %v5359_v34, %v5391_v10 }
 0x335   : > { %v6530_v32 = vadd.f32 %v6529_v44, %v6528_v20  ;;  %v5455_v4 = vsub.f32 %v10980_v19, %v11233_v16  ;;  %v5487_v24 = vsub.f32 %v12008_v33, %v11233_v16  ;;  %v5519_v55 = vsub.f32 %v12009_v13, %v11233_v16  ;;  %v12011_v20 = vld [vmem:[#allocation26_spill] sm:$0xff] }
 0x336   : > { %v5276_v35 = vadd.f32 %v5275_v63, %v5274_v37  ;;  %v5583_v45 = vadd.f32 1e-05, %v5423_v50  ;;  %v4847_v49 = vrot.slane %v4846_v21, 1  ;;  %v5292_v52 = vadd.f32 %v5291_v56, %v5290_v6  ;;  %v12010_v37 = vld [vmem:[#allocation21_spill] sm:$0xff]  ;;  %v11279_v6 = vpop.f32.mrf.mxu1 }
 0x337   : > { %v6531_v28 = vrot.slane %v6530_v32, 1  ;;  %v5551_v51 = vsub.f32 %v11168_v47, %v11233_v16  ;;  %v5390_v11 = vmul.f32 %v11250_v8, %v11250_v8  ;;  %v11271_v61 = vmul.f32 %v11257_v25, %v11257_v25 }
 0x338   : > { %v5277_v14 = vrot.slane %v5276_v35, 1  ;;  %7801 = vrsqrt.f32 %v5583_v45  ;;  %v4848_v62 = vadd.f32 %v4847_v49, %v4846_v21  ;;  %v5293_v46 = vrot.slane %v5292_v52, 2  ;;  %v11287_v49 = vpop.f32.mrf.mxu0 }
 0x339   : > { %v6532_v57 = vadd.f32 %v6531_v28, %v6530_v32  ;;  %v7800_v43 = vpop.eup %7799  ;;  %v5454_v17 = vsub.f32 %v12010_v37, %v11250_v8 }
 0x33a   : > { %v5278_v58 = vadd.f32 %v5277_v14, %v5276_v35  ;;  %v5645_v10 = vmul.f32 %v7800_v43, %v5453_v60  ;;  %v5677_v44 = vmul.f32 %v7800_v43, %v5485_v23  ;;  %v5709_v34 = vmul.f32 %v7800_v43, %v5517_v39  ;;  %v11292_v39 = vpop.f32.mrf.mxu1 }
 0x33b   : > { %v6634_v40 = vadd.f32 %v10568_v2, %v6532_v57  ;;  %v5741_v63 = vmul.f32 %v7800_v43, %v5549_v29  ;;  %v11282_v56 = vmul.f32 0.03125, %v4848_v62  ;;  %v5294_v32 = vadd.f32 %v5293_v46, %v5292_v52  ;;  %12012 = vst [vmem:[#allocation24_spill] sm:$0xff] %v11292_v39 }
 0x33c   : > { %v5358_v21 = vmul.f32 0.03125, %v5278_v58  ;;  %v5797_v35 = vmul.f32 %v9540_v0, %v5645_v10  ;;  %v5829_v28 = vmul.f32 %v9724_v53, %v5677_v44  ;;  %v5861_v45 = vmul.f32 %v9595_v7, %v5709_v34 }
 0x33d   : > { %v6776_v50 = vcombine.low %v6633_v18, %v6634_v40  ;;  %v5893_v14 = vmul.f32 %v9895_v5, %v5741_v63  ;;  %v5295_v23 = vrot.slane %v5294_v32, 1  ;;  %v11302_v63 = vpop.f32.mrf.mxu0 }
 0x33e   : > { %v5422_v57 = vsub.f32 %v5358_v21, %v5390_v11  ;;  %v5941_v18 = vadd.f32 %v9682_v59, %v5797_v35  ;;  %v5973_v52 = vadd.f32 %v9770_v38, %v5829_v28  ;;  %v6005_v62 = vadd.f32 %v9915_v31, %v5861_v45  ;;  %v11306_v28 = vpop.f32.mrf.mxu1 }
 0x33f   : > { %v6804_v29 = vrot.slane %v6776_v50, %v11986_v36  ;;  %v6037_v46 = vadd.f32 %v9970_v3, %v5893_v14  ;;  %v5296_v58 = vadd.f32 %v5295_v23, %v5294_v32  ;;  %v5392_v11 = vmul.f32 %v11282_v56, %v11282_v56 }
 0x340   : > { %v5582_v43 = vadd.f32 1e-05, %v5422_v57  ;;  %v6069_v10 = vmax.f32 %v5941_v18, 0.0  ;;  %v6101_v44 = vmax.f32 %v5973_v52, 0.0  ;;  %v6133_v34 = vmax.f32 %v6005_v62, 0.0 }
 0x341   : > { %v6806_v40 = vcombine.low %v11253_v12, %v6804_v29  ;;  %v6165_v21 = vmax.f32 %v6037_v46, 0.0  ;;  %v5360_v50 = vmul.f32 0.03125, %v5296_v58  ;;  %v4947_v35 = vmul.f32 %v11279_v6, %v11279_v6  ;;  %v11323_v58 = vpop.f32.mrf.mxu0 }
 0x342   : > { %7803 = vrsqrt.f32 %v5582_v43  ;;  %v6213_v45 = vmul.f32 %v9946_v22, %v6069_v10  ;;  %v6245_v14 = vmul.f32 %v10413_v42, %v6101_v44  ;;  %v4946_v12 = vmul.f32 %v11287_v49, %v11287_v49  ;;  %v12013_v10 = vld [vmem:[#allocation22_spill] sm:$0xff] }
 0x343   : > { %v6820_v32 = vrot.slane %v6806_v40, %v11986_v36  ;;  %v5424_v57 = vsub.f32 %v5360_v50, %v5392_v11  ;;  %v4948_v23 = vmul.f32 %v11292_v39, %v11292_v39  ;;  %v4849_v29 = vadd.f32 %v11302_v63, %v11257_v25  ;;  %v12014_v50 = vld [vmem:[#allocation3_spill] sm:$0xff] }
 0x344   : > { %v4977_v18 = vmul.f32 %v11302_v63, %v11302_v63  ;;  %v6277_v62 = vmul.f32 %v11896_v15, %v6133_v34  ;;  %v6533_v46 = vadd.f32 %v6245_v14, %v6213_v45  ;;  %v4867_v43 = vadd.f32 %v11306_v28, %v11279_v6  ;;  %v11340_v45 = vpop.f32.mrf.mxu1 }
 0x345   : > { %v6821_v52 = vcombine.low %v11239_v30, %v6820_v32  ;;  %v7802_v11 = vpop.eup %7801  ;;  %v6309_v40 = vmul.f32 %v11897_v48, %v6165_v21  ;;  %v5584_v9 = vadd.f32 1e-05, %v5424_v57  ;;  %12015 = vst [vmem:[#allocation41_spill] sm:$0xff] %v11340_v45  ;;  %v4979_v47 = vmul.f32 %v11306_v28, %v11306_v28 }
 0x346   : > { %v6534_v30 = vadd.f32 %v6533_v46, %v6277_v62  ;;  %v5647_v34 = vmul.f32 %v7802_v11, %v5455_v4  ;;  %v5679_v32 = vmul.f32 %v7802_v11, %v5487_v24  ;;  %v5711_v21 = vmul.f32 %v7802_v11, %v5519_v55  ;;  %v11352_v55 = vpop.f32.mrf.mxu0 }
 0x347   : > { %6877 = vst [vmem:[%s10645_s16 + $0x10] sm:$0xff] %v6821_v52  ;;  %v5743_v14 = vmul.f32 %v7802_v11, %v5551_v51  ;;  %7805 = vrsqrt.f32 %v5584_v9  ;;  %v4978_v16 = vmul.f32 %v11323_v58, %v11323_v58  ;;  %v4980_v51 = vmul.f32 %v11340_v45, %v11340_v45 }
 0x348   : > { %v6535_v4 = vadd.f32 %v6534_v30, %v6309_v40  ;;  %v5799_v33 = vmul.f32 %v9540_v0, %v5647_v34  ;;  %v5831_v24 = vmul.f32 %v9724_v53, %v5679_v32  ;;  %v5863_v13 = vmul.f32 %v9595_v7, %v5711_v21 }
 0x349   : > { %v5895_v52 = vmul.f32 %v9895_v5, %v5743_v14  ;;  %v5297_v30 = vadd.f32 %v4977_v18, %v11271_v61  ;;  %v4858_v34 = vadd.f32 %v11323_v58, %v11287_v49  ;;  %v5009_v32 = vmul.f32 %v11352_v55, %v11352_v55 }
 0x34a   : > { %v6536_v9 = vrot.slane %v6535_v4, 4  ;;  %v5943_v62 = vadd.f32 %v9682_v59, %v5799_v33  ;;  %v5975_v46 = vadd.f32 %v9770_v38, %v5831_v24  ;;  %v6007_v11 = vadd.f32 %v9915_v31, %v5863_v13 }
 0x34b   : > { %v6039_v40 = vadd.f32 %v9970_v3, %v5895_v52  ;;  %v5315_v60 = vadd.f32 %v4979_v47, %v4947_v35  ;;  %v11370_v33 = vadd.f32 %v4978_v16, %v4946_v12  ;;  %v11374_v24 = vadd.f32 %v11340_v45, %v11292_v39 }
 0x34c   : > { %v6537_v21 = vadd.f32 %v6536_v9, %v6535_v4  ;;  %v6071_v14 = vmax.f32 %v5943_v62, 0.0  ;;  %v6103_v19 = vmax.f32 %v5975_v46, 0.0  ;;  %v6135_v57 = vmax.f32 %v6007_v11, 0.0  ;;  %v11381_v4 = vpop.f32.mrf.mxu1  ;;  %v11392_v62 = vpop.f32.mrf.mxu0 }
 0x34d   : > { %v4850_v13 = vadd.f32 %v4849_v29, %v11352_v55  ;;  %v6167_v18 = vmax.f32 %v6039_v40, 0.0  ;;  %v11379_v41 = vadd.f32 %v4980_v51, %v4948_v23  ;;  %v12016_v12 = vsub.f32 %v12011_v20, %v11250_v8 }
 0x34e   : > { %v6215_v52 = vmul.f32 %v9946_v22, %v6071_v14  ;;  %v6247_v44 = vmul.f32 %v10413_v42, %v6103_v19  ;;  %v12017_v29 = vsub.f32 %v11123_v27, %v11250_v8  ;;  %v5298_v9 = vadd.f32 %v5297_v30, %v5009_v32 }
 0x34f   : > { %v7804_v61 = vpop.eup %7803  ;;  %v6538_v19 = vrot.slane %v6537_v21, 2  ;;  %v6279_v23 = vmul.f32 %v11896_v15, %v6135_v57  ;;  %v12018_v46 = vsub.f32 %v11173_v26, %v11250_v8  ;;  %v11402_v27 = vadd.f32 %v4867_v43, %v11381_v4 }
 0x350   : > { %v5646_v35 = vmul.f32 %v7804_v61, %v5454_v17  ;;  %v5678_v47 = vmul.f32 %v7804_v61, %v12016_v12  ;;  %v5710_v16 = vmul.f32 %v7804_v61, %v12017_v29  ;;  %v6551_v51 = vadd.f32 %v6247_v44, %v6215_v52 }
 0x351   : > { %v5742_v37 = vmul.f32 %v7804_v61, %v12018_v46  ;;  %v6311_v40 = vmul.f32 %v11897_v48, %v6167_v18  ;;  %v5011_v44 = vmul.f32 %v11381_v4, %v11381_v4  ;;  %v11412_v14 = vadd.f32 %v4858_v34, %v11392_v62  ;;  %v11414_v61 = vpop.f32.mrf.mxu0 }
 0x352   : > { %v5798_v17 = vmul.f32 %v9540_v0, %v5646_v35  ;;  %v5830_v20 = vmul.f32 %v9724_v53, %v5678_v47  ;;  %v5862_v11 = vmul.f32 %v9595_v7, %v5710_v16  ;;  %v6552_v30 = vadd.f32 %v6551_v51, %v6279_v23 }
 0x353   : > { %v5894_v32 = vmul.f32 %v9895_v5, %v5742_v37  ;;  %v6539_v52 = vadd.f32 %v6538_v19, %v6537_v21  ;;  %v5010_v12 = vmul.f32 %v11392_v62, %v11392_v62  ;;  %v12019_v23 = vsub.f32 %v12013_v10, %v11282_v56 }
 0x354   : > { %v5942_v26 = vadd.f32 %v9682_v59, %v5798_v17  ;;  %v5974_v8 = vadd.f32 %v9770_v38, %v5830_v20  ;;  %v6006_v57 = vadd.f32 %v9915_v31, %v5862_v11  ;;  %v7806_v43 = vpop.eup %7805  ;;  %v6553_v18 = vadd.f32 %v6552_v30, %v6311_v40 }
 0x355   : > { %v6038_v35 = vadd.f32 %v9970_v3, %v5894_v32  ;;  %v5648_v51 = vmul.f32 %v7806_v43, %v12019_v23  ;;  %v12020_v37 = vsub.f32 %v12014_v50, %v11282_v56  ;;  %v4851_v21 = vadd.f32 %v4850_v13, %v11414_v61 }
 0x356   : > { %v6070_v47 = vmax.f32 %v5942_v26, 0.0  ;;  %v6102_v29 = vmax.f32 %v5974_v8, 0.0  ;;  %v6134_v16 = vmax.f32 %v6006_v57, 0.0  ;;  %v6554_v46 = vrot.slane %v6553_v18, 4 }
 0x357   : > { %v6166_v34 = vmax.f32 %v6038_v35, 0.0  ;;  %v5680_v17 = vmul.f32 %v7806_v43, %v12020_v37  ;;  %v12021_v11 = vsub.f32 %v11156_v54, %v11282_v56  ;;  %v5316_v30 = vadd.f32 %v5315_v60, %v5011_v44 }
 0x358   : > { %v6214_v19 = vmul.f32 %v9946_v22, %v6070_v47  ;;  %v6246_v20 = vmul.f32 %v10413_v42, %v6102_v29  ;;  %v6540_v32 = vrot.slane %v6539_v52, 1  ;;  %v6555_v10 = vadd.f32 %v6554_v46, %v6553_v18  ;;  %v11438_v29 = vpop.f32.mrf.mxu1 }
 0x359   : > { %v5712_v40 = vmul.f32 %v7806_v43, %v12021_v11  ;;  %v12022_v26 = vsub.f32 %v11221_v1, %v11282_v56  ;;  %v5800_v50 = vmul.f32 %v9540_v0, %v5648_v51  ;;  %v6278_v57 = vmul.f32 %v11896_v15, %v6134_v16  ;;  %12023 = vst [vmem:[#allocation37_spill] sm:$0xff] %v11438_v29 }
 0x35a   : > { %v6542_v13 = vadd.f32 %v6246_v20, %v6214_v19  ;;  %v5832_v35 = vmul.f32 %v9724_v53, %v5680_v17  ;;  %v6310_v54 = vmul.f32 %v11897_v48, %v6166_v34  ;;  %v4852_v18 = vrot.slane %v4851_v21, 4  ;;  %v11448_v11 = vpop.f32.mrf.mxu1 }
 0x35b   : > { %v5744_v8 = vmul.f32 %v7806_v43, %v12022_v26  ;;  %v5864_v47 = vmul.f32 %v9595_v7, %v5712_v40  ;;  %v5944_v44 = vadd.f32 %v9682_v59, %v5800_v50  ;;  %v5041_v16 = vmul.f32 %v11414_v61, %v11414_v61 }
 0x35c   : > { %v6543_v1 = vadd.f32 %v6542_v13, %v6278_v57  ;;  %v5976_v56 = vadd.f32 %v9770_v38, %v5832_v35  ;;  %v6556_v23 = vrot.slane %v6555_v10, 2  ;;  %v4853_v37 = vadd.f32 %v4852_v18, %v4851_v21 }
 0x35d   : > { %v5896_v60 = vmul.f32 %v9895_v5, %v5744_v8  ;;  %v6008_v43 = vadd.f32 %v9915_v31, %v5864_v47  ;;  %v6072_v46 = vmax.f32 %v5944_v44, 0.0  ;;  %v5299_v20 = vadd.f32 %v5298_v9, %v5041_v16 }
 0x35e   : > { %v6544_v17 = vadd.f32 %v6543_v1, %v6310_v54  ;;  %v6104_v34 = vmax.f32 %v5976_v56, 0.0  ;;  %v5307_v8 = vadd.f32 %v11370_v33, %v5010_v12  ;;  %v4854_v50 = vrot.slane %v4853_v37, 2 }
 0x35f   : > { %v6040_v51 = vadd.f32 %v9970_v3, %v5896_v60  ;;  %v6136_v19 = vmax.f32 %v6008_v43, 0.0  ;;  %v6216_v26 = vmul.f32 %v9946_v22, %v6072_v46  ;;  %v6541_v57 = vadd.f32 %v6540_v32, %v6539_v52  ;;  %v11453_v60 = vpop.f32.mrf.mxu0 }
 0x360   : > { %v6545_v13 = vrot.slane %v6544_v17, 4  ;;  %v6248_v35 = vmul.f32 %v10413_v42, %v6104_v34  ;;  %v5300_v47 = vrot.slane %v5299_v20, 4  ;;  %v6557_v21 = vadd.f32 %v6556_v23, %v6555_v10 }
 0x361   : > { %v6168_v40 = vmax.f32 %v6040_v51, 0.0  ;;  %v6280_v54 = vmul.f32 %v11896_v15, %v6136_v19  ;;  %v4855_v44 = vadd.f32 %v4854_v50, %v4853_v37  ;;  %v4869_v9 = vadd.f32 %v11402_v27, %v11448_v11 }
 0x362   : > { %v6546_v18 = vadd.f32 %v6545_v13, %v6544_v17  ;;  %v6560_v1 = vadd.f32 %v6248_v35, %v6216_v26  ;;  %v5301_v56 = vadd.f32 %v5300_v47, %v5299_v20  ;;  %v5043_v33 = vmul.f32 %v11448_v11, %v11448_v11 }
 0x363   : > { %v6312_v52 = vmul.f32 %v11897_v48, %v6168_v40  ;;  %v4856_v12 = vrot.slane %v4855_v44, 1  ;;  %v4870_v32 = vrot.slane %v4869_v9, 4  ;;  %v4860_v43 = vadd.f32 %v11412_v14, %v11453_v60 }
 0x364   : > { %v6547_v10 = vrot.slane %v6546_v18, 2  ;;  %v6561_v16 = vadd.f32 %v6560_v1, %v6280_v54  ;;  %v5302_v23 = vrot.slane %v5301_v56, 2  ;;  %v5317_v51 = vadd.f32 %v5316_v30, %v5043_v33 }
 0x365   : > { %v4857_v46 = vadd.f32 %v4856_v12, %v4855_v44  ;;  %v4871_v37 = vadd.f32 %v4870_v32, %v4869_v9  ;;  %v4861_v27 = vrot.slane %v4860_v43, 4  ;;  %v5042_v17 = vmul.f32 %v11453_v60, %v11453_v60 }
 0x366   : > { %v6548_v34 = vadd.f32 %v6547_v10, %v6546_v18  ;;  %v6562_v19 = vadd.f32 %v6561_v16, %v6312_v52  ;;  %v5303_v20 = vadd.f32 %v5302_v23, %v5301_v56  ;;  %v5318_v26 = vrot.slane %v5317_v51, 4  ;;  %v11472_v56 = vpop.f32.mrf.mxu1 }
 0x367   : > { %v11465_v40 = vmul.f32 0.03125, %v4857_v46  ;;  %v4872_v50 = vrot.slane %v4871_v37, 2  ;;  %v4862_v13 = vadd.f32 %v4861_v27, %v4860_v43  ;;  %v5308_v35 = vadd.f32 %v5307_v8, %v5042_v17 }
 0x368   : > { %v6549_v14 = vrot.slane %v6548_v34, 1  ;;  %v6563_v47 = vrot.slane %v6562_v19, 4  ;;  %v5304_v54 = vrot.slane %v5303_v20, 1  ;;  %v5319_v1 = vadd.f32 %v5318_v26, %v5317_v51 }
 0x369   : > { %v6635_v30 = vadd.f32 %v10568_v2, %v6541_v57  ;;  %v6558_v44 = vrot.slane %v6557_v21, 1  ;;  %v4877_v9 = vadd.f32 %v11374_v24, %v11438_v29  ;;  %v5012_v18 = vmul.f32 %v11438_v29, %v11438_v29 }
 0x36a   : > { %v6550_v33 = vadd.f32 %v6549_v14, %v6548_v34  ;;  %v6564_v52 = vadd.f32 %v6563_v47, %v6562_v19  ;;  %v5305_v12 = vadd.f32 %v5304_v54, %v5303_v20  ;;  %v5393_v8 = vmul.f32 %v11465_v40, %v11465_v40 }
 0x36b   : > { %v4873_v32 = vadd.f32 %v4872_v50, %v4871_v37  ;;  %v5320_v43 = vrot.slane %v5319_v1, 2  ;;  %v4863_v10 = vrot.slane %v4862_v13, 2  ;;  %v5309_v16 = vrot.slane %v5308_v35, 4 }
 0x36c   : > { %v6636_v57 = vadd.f32 %v10568_v2, %v6550_v33  ;;  %v6565_v23 = vrot.slane %v6564_v52, 2  ;;  %v5361_v51 = vmul.f32 0.03125, %v5305_v12  ;;  %v4878_v24 = vadd.f32 %v4877_v9, %v11472_v56 }
 0x36d   : > { %v4874_v46 = vrot.slane %v4873_v32, 1  ;;  %v5321_v27 = vadd.f32 %v5320_v43, %v5319_v1  ;;  %v4864_v17 = vadd.f32 %v4863_v10, %v4862_v13  ;;  %v5310_v26 = vadd.f32 %v5309_v16, %v5308_v35 }
 0x36e   : > { %v6559_v34 = vadd.f32 %v6558_v44, %v6557_v21  ;;  %v6566_v19 = vadd.f32 %v6565_v23, %v6564_v52  ;;  %v5425_v20 = vsub.f32 %v5361_v51, %v5393_v8  ;;  %v4879_v14 = vrot.slane %v4878_v24, 4 }
 0x36f   : > { %v4875_v47 = vadd.f32 %v4874_v46, %v4873_v32  ;;  %v5322_v54 = vrot.slane %v5321_v27, 1  ;;  %v4865_v37 = vrot.slane %v4864_v17, 1  ;;  %v5311_v50 = vrot.slane %v5310_v26, 2 }
 0x370   : > { %v6822_v29 = vcombine.low %v6635_v30, %v6636_v57  ;;  %v6567_v45 = vrot.slane %v6566_v19, 1  ;;  %v5585_v39 = vadd.f32 1e-05, %v5425_v20  ;;  %v4880_v33 = vadd.f32 %v4879_v14, %v4878_v24 }
 0x371   : > { %v11478_v48 = vmul.f32 0.03125, %v4875_v47  ;;  %v5323_v12 = vadd.f32 %v5322_v54, %v5321_v27  ;;  %v4866_v9 = vadd.f32 %v4865_v37, %v4864_v17  ;;  %v5312_v15 = vadd.f32 %v5311_v50, %v5310_v26 }
 0x372   : > { %v6568_v1 = vadd.f32 %v6567_v45, %v6566_v19  ;;  %7807 = vrsqrt.f32 %v5585_v39  ;;  %v4881_v13 = vrot.slane %v4880_v33, 2  ;;  %v5044_v21 = vmul.f32 %v11472_v56, %v11472_v56 }
 0x373   : > { %v5325_v35 = vadd.f32 %v11379_v41, %v5012_v18  ;;  %v5363_v44 = vmul.f32 0.03125, %v5323_v12  ;;  %v5395_v30 = vmul.f32 %v11478_v48, %v11478_v48  ;;  %v6637_v52 = vadd.f32 %v10568_v2, %v6559_v34 }
 0x374   : > { %v6638_v8 = vadd.f32 %v10568_v2, %v6568_v1  ;;  %v11487_v32 = vmul.f32 0.03125, %v4866_v9  ;;  %v5313_v10 = vrot.slane %v5312_v15, 1  ;;  %v11490_v39 = vrot.slane %v6822_v29, %v11986_v36 }
 0x375   : > { %v5427_v43 = vsub.f32 %v5363_v44, %v5395_v30  ;;  %v5326_v45 = vadd.f32 %v5325_v35, %v5044_v21  ;;  %v4882_v57 = vadd.f32 %v4881_v13, %v4880_v33  ;;  %v5489_v20 = vsub.f32 %v11302_v63, %v11465_v40 }
 0x376   : > { %v6823_v16 = vcombine.low %v6637_v52, %v6638_v8  ;;  %v5314_v41 = vadd.f32 %v5313_v10, %v5312_v15  ;;  %v5394_v18 = vmul.f32 %v11487_v32, %v11487_v32  ;;  %v5457_v15 = vsub.f32 %v11257_v25, %v11465_v40 }
 0x377   : > { %v5587_v23 = vadd.f32 1e-05, %v5427_v43  ;;  %v5327_v24 = vrot.slane %v5326_v45, 4  ;;  %v4883_v17 = vrot.slane %v4882_v57, 1  ;;  %v5521_v12 = vsub.f32 %v11352_v55, %v11465_v40 }
 0x378   : > { %v11495_v51 = vrot.slane %v6823_v16, %v11986_v36  ;;  %v5362_v46 = vmul.f32 0.03125, %v5314_v41  ;;  %v5553_v63 = vsub.f32 %v11414_v61, %v11465_v40  ;;  %v5459_v44 = vsub.f32 %v11279_v6, %v11478_v48 }
 0x379   : > { %7809 = vrsqrt.f32 %v5587_v23  ;;  %v5328_v26 = vadd.f32 %v5327_v24, %v5326_v45  ;;  %v4884_v14 = vadd.f32 %v4883_v17, %v4882_v57  ;;  %v5491_v30 = vsub.f32 %v11306_v28, %v11478_v48 }
 0x37a   : > { %v6854_v27 = vcombine.low %v11490_v39, %v11495_v51  ;;  %v5426_v29 = vsub.f32 %v5362_v46, %v5394_v18  ;;  %v5523_v45 = vsub.f32 %v11381_v4, %v11478_v48  ;;  %v5555_v18 = vsub.f32 %v11448_v11, %v11478_v48 }
 0x37b   : > { %v5329_v34 = vrot.slane %v5328_v26, 2  ;;  %v11507_v13 = vmul.f32 0.03125, %v4884_v14  ;;  %v5554_v48 = vsub.f32 %v11453_v60, %v11487_v32 }
 0x37c   : > { %v5586_v19 = vadd.f32 1e-05, %v5426_v29 }
 0x37d   : > { %v5330_v47 = vadd.f32 %v5329_v34, %v5328_v26  ;;  %v5396_v43 = vmul.f32 %v11507_v13, %v11507_v13  ;;  %v5458_v26 = vsub.f32 %v11287_v49, %v11487_v32 }
 0x37e   : > { %7811 = vrsqrt.f32 %v5586_v19  ;;  %v5490_v19 = vsub.f32 %v11323_v58, %v11487_v32 }
 0x37f   : > { %v7808_v54 = vpop.eup %7807  ;;  %v5331_v33 = vrot.slane %v5330_v47, 1 }
 0x380   : > { %v5649_v37 = vmul.f32 %v7808_v54, %v5457_v15  ;;  %v5681_v50 = vmul.f32 %v7808_v54, %v5489_v20  ;;  %v5713_v21 = vmul.f32 %v7808_v54, %v5521_v12  ;;  %v5745_v10 = vmul.f32 %v7808_v54, %v5553_v63 }
 0x381   : > { %v5332_v25 = vadd.f32 %v5331_v33, %v5330_v47  ;;  %v5522_v15 = vsub.f32 %v11392_v62, %v11487_v32 }
 0x382   : > { %v5801_v9 = vmul.f32 %v9540_v0, %v5649_v37  ;;  %v5833_v1 = vmul.f32 %v9724_v53, %v5681_v50  ;;  %v5865_v16 = vmul.f32 %v9595_v7, %v5713_v21  ;;  %v5897_v46 = vmul.f32 %v9895_v5, %v5745_v10  ;;  %v12024_v10 = vld [vmem:[#allocation33_spill] sm:$0xff] }
 0x383   : > { %v5364_v8 = vmul.f32 0.03125, %v5332_v25 }
 0x384   : > { %v5945_v35 = vadd.f32 %v9682_v59, %v5801_v9  ;;  %v5977_v52 = vadd.f32 %v9770_v38, %v5833_v1  ;;  %v6009_v34 = vadd.f32 %v9915_v31, %v5865_v16  ;;  %v6041_v33 = vadd.f32 %v9970_v3, %v5897_v46 }
 0x385   : > { %v5428_v24 = vsub.f32 %v5364_v8, %v5396_v43 }
 0x386   : > { %v7810_v55 = vpop.eup %7809  ;;  %v6073_v57 = vmax.f32 %v5945_v35, 0.0  ;;  %v6105_v41 = vmax.f32 %v5977_v52, 0.0  ;;  %v6137_v9 = vmax.f32 %v6009_v34, 0.0 }
 0x387   : > { %v5651_v61 = vmul.f32 %v7810_v55, %v5459_v44  ;;  %v5683_v40 = vmul.f32 %v7810_v55, %v5491_v30  ;;  %v5715_v6 = vmul.f32 %v7810_v55, %v5523_v45  ;;  %v5747_v20 = vmul.f32 %v7810_v55, %v5555_v18 }
 0x388   : > { %v6217_v11 = vmul.f32 %v9946_v22, %v6073_v57  ;;  %v5588_v47 = vadd.f32 1e-05, %v5428_v24  ;;  %v6249_v49 = vmul.f32 %v10413_v42, %v6105_v41  ;;  %v6169_v55 = vmax.f32 %v6041_v33, 0.0  ;;  %v12028_v33 = vld [vmem:[#allocation37_spill] sm:$0xff] }
 0x389   : > { %v5803_v23 = vmul.f32 %v9540_v0, %v5651_v61  ;;  %v5835_v28 = vmul.f32 %v9724_v53, %v5683_v40  ;;  %v5867_v14 = vmul.f32 %v9595_v7, %v5715_v6  ;;  %v5899_v32 = vmul.f32 %v9895_v5, %v5747_v20 }
 0x38a   : > { %7813 = vrsqrt.f32 %v5588_v47  ;;  %v6569_v63 = vadd.f32 %v6249_v49, %v6217_v11  ;;  %v6281_v45 = vmul.f32 %v12024_v10, %v6137_v9  ;;  %v12026_v49 = vld [vmem:[#allocation24_spill] sm:$0xff] }
 0x38b   : > { %v5947_v17 = vadd.f32 %v9682_v59, %v5803_v23  ;;  %v5979_v4 = vadd.f32 %v9770_v38, %v5835_v28  ;;  %v7812_v29 = vpop.eup %7811  ;;  %v6011_v25 = vadd.f32 %v9915_v31, %v5867_v14  ;;  %v6043_v57 = vadd.f32 %v9970_v3, %v5899_v32 }
 0x38c   : > { %v5650_v54 = vmul.f32 %v7812_v29, %v5458_v26  ;;  %v5682_v37 = vmul.f32 %v7812_v29, %v5490_v19  ;;  %v5714_v50 = vmul.f32 %v7812_v29, %v5522_v15  ;;  %v5746_v62 = vmul.f32 %v7812_v29, %v5554_v48 }
 0x38d   : > { %v6075_v58 = vmax.f32 %v5947_v17, 0.0  ;;  %v6107_v12 = vmax.f32 %v5979_v4, 0.0  ;;  %v6139_v6 = vmax.f32 %v6011_v25, 0.0  ;;  %v6570_v28 = vadd.f32 %v6569_v63, %v6281_v45  ;;  %v12025_v17 = vld [vmem:[#allocation9_spill] sm:$0xff] }
 0x38e   : > { %v5802_v1 = vmul.f32 %v9540_v0, %v5650_v54  ;;  %v5834_v60 = vmul.f32 %v9724_v53, %v5682_v37  ;;  %v5866_v21 = vmul.f32 %v9595_v7, %v5714_v50  ;;  %v5898_v35 = vmul.f32 %v9895_v5, %v5746_v62  ;;  %v12027_v37 = vld [vmem:[#allocation41_spill] sm:$0xff] }
 0x38f   : > { %v6219_v52 = vmul.f32 %v9946_v22, %v6075_v58  ;;  %v6251_v8 = vmul.f32 %v10413_v42, %v6107_v12  ;;  %v6313_v4 = vmul.f32 %v12025_v17, %v6169_v55  ;;  %v6171_v34 = vmax.f32 %v6043_v57, 0.0 }
 0x390   : > { %v5946_v44 = vadd.f32 %v9682_v59, %v5802_v1  ;;  %v5978_v30 = vadd.f32 %v9770_v38, %v5834_v60  ;;  %v6010_v43 = vadd.f32 %v9915_v31, %v5866_v21  ;;  %v6042_v61 = vadd.f32 %v9970_v3, %v5898_v35 }
 0x391   : > { %v6587_v46 = vadd.f32 %v6251_v8, %v6219_v52  ;;  %v6283_v19 = vmul.f32 %v12024_v10, %v6139_v6  ;;  %v6571_v15 = vadd.f32 %v6570_v28, %v6313_v4  ;;  %v6315_v47 = vmul.f32 %v12025_v17, %v6171_v34 }
 0x392   : > { %v6074_v40 = vmax.f32 %v5946_v44, 0.0  ;;  %v6106_v16 = vmax.f32 %v5978_v30, 0.0  ;;  %v6138_v23 = vmax.f32 %v6010_v43, 0.0  ;;  %v6170_v41 = vmax.f32 %v6042_v61, 0.0 }
 0x393   : > { %v6588_v20 = vadd.f32 %v6587_v46, %v6283_v19  ;;  %v5460_v54 = vsub.f32 %v12026_v49, %v11507_v13  ;;  %v5492_v50 = vsub.f32 %v12027_v37, %v11507_v13  ;;  %v5524_v58 = vsub.f32 %v12028_v33, %v11507_v13 }
 0x394   : > { %v6218_v18 = vmul.f32 %v9946_v22, %v6074_v40  ;;  %v6250_v24 = vmul.f32 %v10413_v42, %v6106_v16  ;;  %v6282_v26 = vmul.f32 %v12024_v10, %v6138_v23  ;;  %v6314_v48 = vmul.f32 %v12025_v17, %v6170_v41 }
 0x395   : > { %v6572_v9 = vrot.slane %v6571_v15, 4  ;;  %v5556_v1 = vsub.f32 %v11472_v56, %v11507_v13  ;;  %v6589_v60 = vadd.f32 %v6588_v20, %v6315_v47 }
 0x396   : > { %v6578_v29 = vadd.f32 %v6250_v24, %v6218_v18 }
 0x397   : > { %v7814_v12 = vpop.eup %7813  ;;  %v6573_v52 = vadd.f32 %v6572_v9, %v6571_v15  ;;  %v6590_v43 = vrot.slane %v6589_v60, 4 }
 0x398   : > { %v6579_v11 = vadd.f32 %v6578_v29, %v6282_v26  ;;  %v5652_v32 = vmul.f32 %v7814_v12, %v5460_v54  ;;  %v5684_v25 = vmul.f32 %v7814_v12, %v5492_v50  ;;  %v5716_v21 = vmul.f32 %v7814_v12, %v5524_v58 }
 0x399   : > { %v5748_v63 = vmul.f32 %v7814_v12, %v5556_v1  ;;  %v6574_v6 = vrot.slane %v6573_v52, 2  ;;  %v6862_v12 = vrot.slane %v6854_v27, %v11986_v36 }
 0x39a   : > { %v6580_v14 = vadd.f32 %v6579_v11, %v6314_v48  ;;  %v5804_v44 = vmul.f32 %v9540_v0, %v5652_v32  ;;  %v5836_v30 = vmul.f32 %v9724_v53, %v5684_v25  ;;  %v5868_v55 = vmul.f32 %v9595_v7, %v5716_v21 }
 0x39b   : > { %v5900_v8 = vmul.f32 %v9895_v5, %v5748_v63  ;;  %v6591_v53 = vadd.f32 %v6590_v43, %v6589_v60 }
 0x39c   : > { %v6581_v62 = vrot.slane %v6580_v14, 4  ;;  %v5948_v45 = vadd.f32 %v9682_v59, %v5804_v44  ;;  %v5980_v56 = vadd.f32 %v9770_v38, %v5836_v30  ;;  %v6012_v13 = vadd.f32 %v9915_v31, %v5868_v55 }
 0x39d   : > { %v6044_v61 = vadd.f32 %v9970_v3, %v5900_v8  ;;  %v6575_v38 = vadd.f32 %v6574_v6, %v6573_v52  ;;  %v6592_v18 = vrot.slane %v6591_v53, 2 }
 0x39e   : > { %v6582_v35 = vadd.f32 %v6581_v62, %v6580_v14  ;;  %v6076_v16 = vmax.f32 %v5948_v45, 0.0  ;;  %v6108_v57 = vmax.f32 %v5980_v56, 0.0  ;;  %v6140_v0 = vmax.f32 %v6012_v13, 0.0 }
 0x39f   : > { %v6172_v23 = vmax.f32 %v6044_v61, 0.0  ;;  %v6576_v4 = vrot.slane %v6575_v38, 1  ;;  %v6593_v26 = vadd.f32 %v6592_v18, %v6591_v53 }
 0x3a0   : > { %v6583_v40 = vrot.slane %v6582_v35, 2  ;;  %v6220_v7 = vmul.f32 %v9946_v22, %v6076_v16  ;;  %v6252_v5 = vmul.f32 %v10413_v42, %v6108_v57  ;;  %v6284_v59 = vmul.f32 %v12024_v10, %v6140_v0 }
 0x3a1   : > { %v6316_v31 = vmul.f32 %v12025_v17, %v6172_v23  ;;  %v6577_v15 = vadd.f32 %v6576_v4, %v6575_v38  ;;  %v6594_v22 = vrot.slane %v6593_v26, 1 }
 0x3a2   : > { %v6584_v28 = vadd.f32 %v6583_v40, %v6582_v35  ;;  %v6596_v41 = vadd.f32 %v6252_v5, %v6220_v7 }
 0x3a3   : > { %v6639_v11 = vadd.f32 %v10568_v2, %v6577_v15  ;;  %v6595_v20 = vadd.f32 %v6594_v22, %v6593_v26 }
 0x3a4   : > { %v6597_v3 = vadd.f32 %v6596_v41, %v6284_v59  ;;  %v6585_v24 = vrot.slane %v6584_v28, 1 }
 0x3a5   : > { %v6641_v49 = vadd.f32 %v10568_v2, %v6595_v20 }
 0x3a6   : > { %v6598_v46 = vadd.f32 %v6597_v3, %v6316_v31  ;;  %v6586_v34 = vadd.f32 %v6585_v24, %v6584_v28 }
 0x3a8   : > { %v6599_v29 = vrot.slane %v6598_v46, 4  ;;  %v6640_v42 = vadd.f32 %v10568_v2, %v6586_v34 }
 0x3aa   : > { %v6600_v19 = vadd.f32 %v6599_v29, %v6598_v46  ;;  %v6824_v17 = vcombine.low %v6639_v11, %v6640_v42 }
 0x3ac   : > { %v6601_v48 = vrot.slane %v6600_v19, 2  ;;  %v6846_v37 = vrot.slane %v6824_v17, %v11986_v36 }
 0x3ae   : > { %v6602_v10 = vadd.f32 %v6601_v48, %v6600_v19 }
 0x3b0   : > { %v6603_v14 = vrot.slane %v6602_v10, 1 }
 0x3b2   : > { %v6604_v47 = vadd.f32 %v6603_v14, %v6602_v10 }
 0x3b4   : > { %v6642_v54 = vadd.f32 %v10568_v2, %v6604_v47 }
 0x3b6   : > { %v6825_v50 = vcombine.low %v6641_v49, %v6642_v54 }
 0x3b8   : > { %v6853_v33 = vrot.slane %v6825_v50, %v11986_v36 }
 0x3ba   : > { %v6855_v58 = vcombine.low %v6846_v37, %v6853_v33 }
 0x3bc   : > { %v6869_v9 = vrot.slane %v6855_v58, %v11986_v36 }
 0x3be   : > { %v6870_v62 = vcombine.low %v6862_v12, %v6869_v9 }
 0x3c0   : > { %6878 = vst [vmem:[%s10645_s16 + $0x18] sm:$0xff] %v6870_v62 }
 0x3c1 PF: > { %s16_s23 = sadd.s32 1, %s7842_s23   ;;  %s12029_s21 = smov %s7838_s22 }
 0x3c2   : > { %p13_p5 = scmp.ge.s32.totalorder %s16_s23, 4   ;;  %s12030_s22 = smov %s12032_s24 }
 0x3c4   :  { %15 = sbr.rel (!%p13_p5) target bundleno = 2 (0x2), region = 83 }

</bundles_post_ra>
